<compile_context>
chip_gen: v6e
topology: v6e:2x2x1
jax: 0.10.0
libtpu: 0.0.40
codegen_flags: <defaults>
</compile_context>

<pallas_src>
import math
import numpy as np

import jax
import jax.numpy as jnp
from jax.experimental import pallas as pl
from jax.experimental.pallas import tpu as pltpu

TT_INPUT_SHAPE = [4, 7, 4, 7]     # prod = 784
TT_OUTPUT_SHAPE = [5, 5, 8, 4]    # prod = 800
TT_RANKS = [1, 3, 3, 3, 1]

N_CLASSES = 10
N_OUT_PAD = 128                   # lane-dense padded output width


# ----------------------------------------------------------------------------
# Deterministic parameter construction (numpy replica of the PyTorch __init__)
# ----------------------------------------------------------------------------
def _generate_orthogonal_tt_cores(input_shape, output_shape, ranks):
    input_shape = np.array(input_shape)
    output_shape = np.array(output_shape)
    ranks = np.array(ranks)
    cores_arr_len = np.sum(input_shape * output_shape * ranks[1:] * ranks[:-1])
    cores_arr = np.zeros(cores_arr_len).astype(float)
    cores_arr_idx = 0
    rv = 1
    shapes = []
    cores_indexes = []
    for k in range(input_shape.shape[0]):
        shape = [ranks[k], input_shape[k], output_shape[k], ranks[k + 1]]
        shapes.append((input_shape[k] * ranks[k + 1], ranks[k] * output_shape[k]))
        tall_shape = (np.prod(shape[:3]), shape[3])
        curr_core = np.dot(rv, np.random.normal(0, 1, (shape[0], np.prod(shape[1:]))))
        curr_core = curr_core.reshape(tall_shape)
        if k < input_shape.shape[0] - 1:
            curr_core, rv = np.linalg.qr(curr_core)
        cores_arr[cores_arr_idx:cores_arr_idx + curr_core.size] = curr_core.flatten()
        cores_indexes.append((cores_arr_idx, cores_arr_idx + curr_core.size))
        cores_arr_idx += curr_core.size
    glarot_style = (np.prod(input_shape) * np.prod(ranks)) ** (1.0 / input_shape.shape[0])
    cores_arr = 0.1 / glarot_style * cores_arr
    return cores_arr, shapes, cores_indexes


def _compose_tt_dense(tt_cores):
    """Materialize the TT layer's linear map as a dense [784, 800] matrix.

    The TT layer is a fixed sequence of reshapes + matmuls (no nonlinearity),
    i.e. a linear map on the flattened input.  Push the identity matrix through
    the exact factorized contraction chain once (plain JAX, init-time only).
    """
    f_in = int(np.prod(TT_INPUT_SHAPE))          # 784
    out_rev = TT_OUTPUT_SHAPE[::-1]              # [4, 8, 5, 5]
    x = jnp.eye(f_in, dtype=jnp.float32)         # each row = basis vector e_i
    b = f_in
    for i, w in enumerate(tt_cores):
        k = w.shape[0]
        x = x.reshape(b, -1, k)
        x = jnp.einsum("bmk,kn->bmn", x, w)
        x = x.reshape(b, -1, out_rev[i])
    return x.reshape(b, -1)                      # [784, 800]


def init_params(seed=0):
    np.random.seed(seed)
    cores_arr, cores_shape, cores_indexes = _generate_orthogonal_tt_cores(
        TT_INPUT_SHAPE, TT_OUTPUT_SHAPE, TT_RANKS)
    # TTLayer reverses the core order before its forward loop.
    cores_indexes = list(reversed(cores_indexes))
    cores_shape = list(reversed(cores_shape))
    tt_cores = []
    for (lo, hi), shp in zip(cores_indexes, cores_shape):
        tt_cores.append(jnp.asarray(cores_arr[lo:hi].reshape(shp), dtype=jnp.float32))

    num_units = int(np.prod(TT_OUTPUT_SHAPE))          # 800
    tt_bias = jnp.zeros((1, num_units), dtype=jnp.float32)

    # nn.Linear init from the module: weight ~ N(0, sqrt(2/(in*out))), bias = 0.
    w1 = np.random.normal(0.0, math.sqrt(2.0 / (num_units * 800)), (800, num_units))
    b1 = np.zeros((800,))
    w2 = np.random.normal(0.0, math.sqrt(2.0 / (800 * N_CLASSES)), (N_CLASSES, 800))
    b2 = np.zeros((N_CLASSES,))

    w1_t = jnp.asarray(w1.T, dtype=jnp.float32)        # [in=800, out=800]
    w2_t = jnp.asarray(w2.T, dtype=jnp.float32)        # [in=800, out=10]

    w_tt = _compose_tt_dense(tt_cores)                 # [784, 800] f32 (exact)

    # Lane-dense fc2: zero-pad out dim 10 -> 128 so the kernel's final store is
    # an unmasked full-lane vst; extra FLOPs in the 800x128 matmul are noise.
    w2_pad = jnp.zeros((800, N_OUT_PAD), dtype=jnp.float32).at[:, :N_CLASSES].set(w2_t)
    b2_pad = jnp.zeros((1, N_OUT_PAD), dtype=jnp.float32).at[:, :N_CLASSES].set(
        jnp.asarray(b2, dtype=jnp.float32))

    return {
        # factorized cores kept only for the pure-JAX reference
        "tt_cores": tt_cores,
        # f32 copies for the reference path
        "w_tt": w_tt,
        "tt_bias": tt_bias,                            # [1, 800]  f32
        "w1": w1_t,                                    # [800, 800] f32
        "b1": jnp.asarray(b1.reshape(1, -1), dtype=jnp.float32),
        "w2": w2_t,                                    # [800, 10] f32
        "b2": jnp.asarray(b2.reshape(1, -1), dtype=jnp.float32),
        # kernel-side parameters (MXU-friendly dtypes / lane-dense padding)
        "w_tt_bf16": w_tt.astype(jnp.bfloat16),        # [784, 800] bf16
        "w1_bf16": w1_t.astype(jnp.bfloat16),          # [800, 800] bf16
        "w2_pad": w2_pad,                              # [800, 128] f32
        "b2_pad": b2_pad,                              # [1, 128]   f32
    }


# ----------------------------------------------------------------------------
# Fused Pallas kernel: (x @ W_tt + tt_bias) -> ReLU -> fc1 -> ReLU -> fc2
# ----------------------------------------------------------------------------
def _tt_net_kernel(x_ref, wtt_ref, ttb_ref, w1_ref, b1_ref, w2_ref, b2_ref, o_ref):
    x = x_ref[...]                                                    # [tb, 784] f32
    # TT layer (pre-composed dense weight): bf16 operands on the MXU, f32 acc.
    h = jnp.dot(x.astype(wtt_ref.dtype), wtt_ref[...],
                preferred_element_type=jnp.float32) + ttb_ref[...]
    h = jnp.maximum(h, 0.0)
    # fc1: bf16 operands on the MXU, f32 accumulation; bias/ReLU stay f32.
    h1 = jnp.dot(h.astype(w1_ref.dtype), w1_ref[...],
                 preferred_element_type=jnp.float32) + b1_ref[...]
    h1 = jnp.maximum(h1, 0.0)
    # fc2 (padded to 128 lanes -> unmasked full-lane store): f32.
    out = jnp.dot(h1, w2_ref[...], preferred_element_type=jnp.float32) + b2_ref[...]
    o_ref[...] = out.astype(o_ref.dtype)


def _round_up(v, m):
    return ((v + m - 1) // m) * m


def _pick_batch_tile(batch, batch_tile):
    """Multiple-of-8 batch tile; >=2 grid points when B > 8 (v7x megacore);
    prefers a tile that divides B so no wrapper-side pad copy is needed."""
    b8 = _round_up(batch, 8)
    if b8 <= 8:
        return 8
    cap = min(batch_tile, _round_up(-(-b8 // 2), 8))   # ceil(B/2), rounded to 8
    cap = max(cap, 8)
    for t in range(cap, 7, -8):                        # prefer no padding
        if batch % t == 0:
            return t
    return cap


def tt_net_forward(x, params, *, batch_tile=256):
    """Single pallas_call for the whole TT_Net forward."""
    B, F = x.shape
    w_tt, ttb = params["w_tt_bf16"], params["tt_bias"]
    w1, b1 = params["w1_bf16"], params["b1"]
    w2, b2 = params["w2_pad"], params["b2_pad"]

    tile = _pick_batch_tile(B, batch_tile)
    bp = _round_up(B, tile)
    xp = x if bp == B else jnp.pad(x, ((0, bp - B), (0, 0)))

    # Weights stay VMEM-resident across batch tiles (constant index_map) and are
    # single-buffered: no point double-buffering blocks that never change.
    resident = lambda shape: pl.BlockSpec(shape, lambda i: (0, 0),
                                          pipeline_mode=pl.Buffered(1))

    out = pl.pallas_call(
        _tt_net_kernel,
        out_shape=jax.ShapeDtypeStruct((bp, N_OUT_PAD), x.dtype),
        grid_spec=pltpu.PrefetchScalarGridSpec(
            num_scalar_prefetch=0,
            grid=(bp // tile,),
            in_specs=[
                pl.BlockSpec((tile, F), lambda i: (i, 0)),            # x batch tile
                resident(w_tt.shape),                                 # [784, 800] bf16
                resident(ttb.shape),                                  # [1, 800]   f32
                resident(w1.shape),                                   # [800, 800] bf16
                resident(b1.shape),                                   # [1, 800]   f32
                resident(w2.shape),                                   # [800, 128] f32
                resident(b2.shape),                                   # [1, 128]   f32
            ],
            out_specs=pl.BlockSpec((tile, N_OUT_PAD), lambda i: (i, 0)),
        ),
        compiler_params=pltpu.CompilerParams(
            dimension_semantics=("parallel",),
            vmem_limit_bytes=32 * 1024 * 1024,
        ),
    )(xp, w_tt, ttb, w1, b1, w2, b2)
    return out[:B, :N_CLASSES]


# ----------------------------------------------------------------------------
# Pure-JAX reference: exact replica of the PyTorch module's factorized forward
# ----------------------------------------------------------------------------
def _reference_forward(x, params):
    B = x.shape[0]
    out_rev = TT_OUTPUT_SHAPE[::-1]
    for i, W in enumerate(params["tt_cores"]):
        k_dim = W.shape[0]
        x = x.reshape(B, -1, k_dim)
        x = jnp.einsum("bmk,kn->bmn", x, W)
        x = x.reshape(B, -1, out_rev[i])
    x = x.reshape(B, -1) + params["tt_bias"]
    h = jax.nn.relu(x)
    h = jax.nn.relu(h @ params["w1"] + params["b1"])
    return h @ params["w2"] + params["b2"]


if __name__ == "__main__":
    params = init_params(seed=0)

    key = jax.random.PRNGKey(0)
    B = 2
    x = jax.random.normal(key, (B, int(np.prod(TT_INPUT_SHAPE))), dtype=jnp.float32)  # [2, 784]

    fwd = jax.jit(lambda inp: tt_net_forward(inp, params))
    out = jax.block_until_ready(fwd(x))

    assert out.shape == (B, N_CLASSES) and out.dtype == jnp.float32

    ref = jax.block_until_ready(_reference_forward(x, params))
    np.testing.assert_allclose(np.asarray(out), np.asarray(ref), rtol=2e-2, atol=2e-2)

    print("KERNEL_OK")
</pallas_src>

<mosaic_0001>
module attributes {stable_mosaic.version = 11 : i64} {
  func.func @_tt_net_kernel(%arg0: i32, %arg1: memref<8x784xf32, #tpu.memory_space<vmem>>, %arg2: memref<784x800xbf16, #tpu.memory_space<vmem>>, %arg3: memref<1x800xf32, #tpu.memory_space<vmem>>, %arg4: memref<800x800xbf16, #tpu.memory_space<vmem>>, %arg5: memref<1x800xf32, #tpu.memory_space<vmem>>, %arg6: memref<800x128xf32, #tpu.memory_space<vmem>>, %arg7: memref<1x128xf32, #tpu.memory_space<vmem>>, %arg8: memref<8x128xf32, #tpu.memory_space<vmem>>) attributes {dimension_semantics = [#tpu.dimension_semantics<parallel>], iteration_bounds = array<i64: 1>, scalar_prefetch = 0 : i64, scratch_operands = 0 : i64, tpu.core_type = #tpu.core_type<tc>, window_params = [{transform_indices = @transform_0, window_bounds = array<i64: 8, 784>}, {pipeline_mode = #tpu.pipeline_mode<synchronous>, transform_indices = @transform_1, window_bounds = array<i64: 784, 800>}, {pipeline_mode = #tpu.pipeline_mode<synchronous>, transform_indices = @transform_2, window_bounds = array<i64: 1, 800>}, {pipeline_mode = #tpu.pipeline_mode<synchronous>, transform_indices = @transform_3, window_bounds = array<i64: 800, 800>}, {pipeline_mode = #tpu.pipeline_mode<synchronous>, transform_indices = @transform_4, window_bounds = array<i64: 1, 800>}, {pipeline_mode = #tpu.pipeline_mode<synchronous>, transform_indices = @transform_5, window_bounds = array<i64: 800, 128>}, {pipeline_mode = #tpu.pipeline_mode<synchronous>, transform_indices = @transform_6, window_bounds = array<i64: 1, 128>}, {transform_indices = @transform_7, window_bounds = array<i64: 8, 128>}]} {
    %c0 = arith.constant 0 : index
    %c0_0 = arith.constant 0 : index
    %0 = vector.load %arg1[%c0, %c0_0] : memref<8x784xf32, #tpu.memory_space<vmem>>, vector<8x784xf32>
    %1 = arith.truncf %0 : vector<8x784xf32> to vector<8x784xbf16>
    %c0_1 = arith.constant 0 : index
    %c0_2 = arith.constant 0 : index
    %2 = vector.load %arg2[%c0_1, %c0_2] : memref<784x800xbf16, #tpu.memory_space<vmem>>, vector<784x800xbf16>
    %cst = arith.constant dense<0.000000e+00> : vector<8x800xf32>
    %3 = tpu.matmul %1, %2, %cst {dimension_numbers = #tpu.dot_dimension_numbers<[1], [0], [0], [1], [0, 0, 1, 1], [], []>} : vector<8x784xbf16>, vector<784x800xbf16>, vector<8x800xf32> -> vector<8x800xf32>
    %c0_3 = arith.constant 0 : index
    %c0_4 = arith.constant 0 : index
    %4 = vector.load %arg3[%c0_3, %c0_4] : memref<1x800xf32, #tpu.memory_space<vmem>>, vector<1x800xf32>
    %5 = vector.broadcast %4 : vector<1x800xf32> to vector<8x800xf32>
    %6 = arith.addf %3, %5 : vector<8x800xf32>
    %cst_5 = arith.constant 0.000000e+00 : f32
    %7 = vector.broadcast %cst_5 : f32 to vector<8x800xf32>
    %8 = arith.maximumf %6, %7 : vector<8x800xf32>
    %9 = arith.truncf %8 : vector<8x800xf32> to vector<8x800xbf16>
    %c0_6 = arith.constant 0 : index
    %c0_7 = arith.constant 0 : index
    %10 = vector.load %arg4[%c0_6, %c0_7] : memref<800x800xbf16, #tpu.memory_space<vmem>>, vector<800x800xbf16>
    %cst_8 = arith.constant dense<0.000000e+00> : vector<8x800xf32>
    %11 = tpu.matmul %9, %10, %cst_8 {dimension_numbers = #tpu.dot_dimension_numbers<[1], [0], [0], [1], [0, 0, 1, 1], [], []>} : vector<8x800xbf16>, vector<800x800xbf16>, vector<8x800xf32> -> vector<8x800xf32>
    %c0_9 = arith.constant 0 : index
    %c0_10 = arith.constant 0 : index
    %12 = vector.load %arg5[%c0_9, %c0_10] : memref<1x800xf32, #tpu.memory_space<vmem>>, vector<1x800xf32>
    %13 = vector.broadcast %12 : vector<1x800xf32> to vector<8x800xf32>
    %14 = arith.addf %11, %13 : vector<8x800xf32>
    %cst_11 = arith.constant 0.000000e+00 : f32
    %15 = vector.broadcast %cst_11 : f32 to vector<8x800xf32>
    %16 = arith.maximumf %14, %15 : vector<8x800xf32>
    %c0_12 = arith.constant 0 : index
    %c0_13 = arith.constant 0 : index
    %17 = vector.load %arg6[%c0_12, %c0_13] : memref<800x128xf32, #tpu.memory_space<vmem>>, vector<800x128xf32>
    %cst_14 = arith.constant dense<0.000000e+00> : vector<8x128xf32>
    %18 = tpu.matmul %16, %17, %cst_14 {dimension_numbers = #tpu.dot_dimension_numbers<[1], [0], [0], [1], [0, 0, 1, 1], [], []>} : vector<8x800xf32>, vector<800x128xf32>, vector<8x128xf32> -> vector<8x128xf32>
    %c0_15 = arith.constant 0 : index
    %c0_16 = arith.constant 0 : index
    %19 = vector.load %arg7[%c0_15, %c0_16] : memref<1x128xf32, #tpu.memory_space<vmem>>, vector<1x128xf32>
    %20 = vector.broadcast %19 : vector<1x128xf32> to vector<8x128xf32>
    %21 = arith.addf %18, %20 : vector<8x128xf32>
    %c0_17 = arith.constant 0 : index
    %c0_18 = arith.constant 0 : index
    %22 = vector.load %arg8[%c0_17, %c0_18] : memref<8x128xf32, #tpu.memory_space<vmem>>, vector<8x128xf32>
    tpu.vector_store %arg8[%c0_17, %c0_18], %21 {strides = array<i32>} : memref<8x128xf32, #tpu.memory_space<vmem>>, vector<8x128xf32>,
    return
  }
  func.func @transform_0(%arg0: i32) -> (i32, i32) {
    %c0_i32 = arith.constant 0 : i32
    %c0_i32_0 = arith.constant 0 : i32
    return %arg0, %c0_i32 : i32, i32
  }
  func.func @transform_1(%arg0: i32) -> (i32, i32) {
    %c0_i32 = arith.constant 0 : i32
    %c0_i32_0 = arith.constant 0 : i32
    %c0_i32_1 = arith.constant 0 : i32
    return %c0_i32, %c0_i32_0 : i32, i32
  }
  func.func @transform_2(%arg0: i32) -> (i32, i32) {
    %c0_i32 = arith.constant 0 : i32
    %c0_i32_0 = arith.constant 0 : i32
    %c0_i32_1 = arith.constant 0 : i32
    return %c0_i32, %c0_i32_0 : i32, i32
  }
  func.func @transform_3(%arg0: i32) -> (i32, i32) {
    %c0_i32 = arith.constant 0 : i32
    %c0_i32_0 = arith.constant 0 : i32
    %c0_i32_1 = arith.constant 0 : i32
    return %c0_i32, %c0_i32_0 : i32, i32
  }
  func.func @transform_4(%arg0: i32) -> (i32, i32) {
    %c0_i32 = arith.constant 0 : i32
    %c0_i32_0 = arith.constant 0 : i32
    %c0_i32_1 = arith.constant 0 : i32
    return %c0_i32, %c0_i32_0 : i32, i32
  }
  func.func @transform_5(%arg0: i32) -> (i32, i32) {
    %c0_i32 = arith.constant 0 : i32
    %c0_i32_0 = arith.constant 0 : i32
    %c0_i32_1 = arith.constant 0 : i32
    return %c0_i32, %c0_i32_0 : i32, i32
  }
  func.func @transform_6(%arg0: i32) -> (i32, i32) {
    %c0_i32 = arith.constant 0 : i32
    %c0_i32_0 = arith.constant 0 : i32
    %c0_i32_1 = arith.constant 0 : i32
    return %c0_i32, %c0_i32_0 : i32, i32
  }
  func.func @transform_7(%arg0: i32) -> (i32, i32) {
    %c0_i32 = arith.constant 0 : i32
    %c0_i32_0 = arith.constant 0 : i32
    return %arg0, %c0_i32 : i32, i32
  }
}

</mosaic_0001>

<bundles_post_ra>
// kernel: _lambda_.1
= control target key start
LH: loop header
LB: loop body
LE: loop exit
PB: predicated region body
PF: predicated region fallthrough
CT: control target
= control target key end

     0   :  { %12 = vsyncpa [#allocation3], 0  ;;  %s8607_s0 = inlined_call_operand.vmem [shape: f32[8,784], index: 0, kind: input, shape index: {}]   ;;  %s8608_s1 = inlined_call_operand.hbm [shape: bf16[784,800], index: 1, kind: input, shape index: {}]   ;;  %s8609_s2 = inlined_call_operand.vmem [shape: f32[1,800], index: 2, kind: input, shape index: {}, may-alias: {2,4}]   ;;  %s8610_s3 = inlined_call_operand.hbm [shape: bf16[800,800], index: 3, kind: input, shape index: {}]   ;;  %s8611_s4 = inlined_call_operand.vmem [shape: f32[1,800], index: 4, kind: input, shape index: {}, may-alias: {2,4}]   ;;  %s8612_s5 = inlined_call_operand.hbm [shape: f32[800,128], index: 5, kind: input, shape index: {}]   ;;  %s8613_s6 = inlined_call_operand.vmem [shape: f32[1,128], index: 6, kind: input, shape index: {}]   ;;  %s8614_s7 = inlined_call_operand.vmem [shape: f32[8,128], index: 7, kind: output, shape index: {}]  }
   0x1   :  { %13 = vsyncpa [#allocation5], 0  ;;  %s8283_s24 = smov [#allocation4]   ;;  %s8284_s26 = smov [#allocation2]  }
   0x2   :  { %s35_s25 = sshll.u32 %s8283_s24, 4  ;;  %s21_s27 = sshll.u32 %s8284_s26, 4  ;;  %s36_s25 = int_to_ptr.vmem [resolvable:$true] %s35_s25  ;;  %s22_s27 = int_to_ptr.vmem [resolvable:$true] %s21_s27 }
   0x3   :  { %s8227_s28 = scalar_lea.vmem %s36_s25, 44800  ;;  %p8232_p1 = scmp.lt.s32.totalorder %s36_s25, %s36_s25 }
   0x4   :  { %p8228_p0 = scmp.ne.s32.totalorder %s36_s25, %s8227_s28  ;;  %p8233_p2 = scmp.lt.s32.totalorder %s8227_s28, %s8227_s28 }
   0x6   :  { %p8234_p3 = por %p8233_p2, %p8232_p1 }
   0x8   :  { %p8235_p4 = pnand %p8234_p3, %p8228_p0 }
   0xa   :  { %8238 = shalt.err (!%p8235_p4)
}
   0xb   :  { %s8285_s29 = smov 448   ;;  %s8286_s30 = smov 28  }
   0xc   :  { %41 = dma.hbm_to_vmem [thread:$0]  %s8610_s3, 44800, %s36_s25, [#allocation5], %s8285_s29, %s8285_s29, %s8286_s30  }
   0xd   :  { %s8247_s10 = scalar_lea.vmem %s22_s27, 43904  ;;  %p8252_p6 = scmp.lt.s32.totalorder %s22_s27, %s22_s27 }
   0xe   :  { %p8248_p5 = scmp.ne.s32.totalorder %s22_s27, %s8247_s10  ;;  %p8253_p7 = scmp.lt.s32.totalorder %s8247_s10, %s8247_s10 }
  0x10   :  { %p8254_p8 = por %p8253_p7, %p8252_p6 }
  0x12   :  { %p8255_p9 = pnand %p8254_p8, %p8248_p5 }
  0x14   :  { %8258 = shalt.err (!%p8255_p9)
}
  0x15   :  { %27 = dma.hbm_to_vmem [thread:$0]  %s8608_s1, 43904, %s22_s27, [#allocation3], %s8285_s29, %s8285_s29, %s8286_s30  }
  0x16   :  { %s8287_s13 = smov [#allocation6]  }
  0x17   :  { %s49_s14 = sshll.u32 %s8287_s13, 4  ;;  %s50_s14 = int_to_ptr.vmem [resolvable:$true] %s49_s14 }
  0x18   :  { %s8267_s15 = scalar_lea.vmem %s50_s14, 12800  ;;  %p8272_p11 = scmp.lt.s32.totalorder %s50_s14, %s50_s14 }
  0x19   :  { %p8268_p10 = scmp.ne.s32.totalorder %s50_s14, %s8267_s15  ;;  %p8273_p12 = scmp.lt.s32.totalorder %s8267_s15, %s8267_s15 }
  0x1b   :  { %p8274_p13 = por %p8273_p12, %p8272_p11 }
  0x1d   :  { %p8275_p0 = pnand %p8274_p13, %p8268_p10 }
  0x1f   :  { %8278 = shalt.err (!%p8275_p0)
}
  0x20   :  { %s8288_s3 = smov 128   ;;  %s8289_s16 = smov 8  }
  0x21   :  { %55 = dma.hbm_to_vmem [thread:$0]  %s8612_s5, 12800, %s50_s14, [#allocation5], %s8288_s3, %s8288_s3, %s8289_s16  }
  0x22   :  { %8279 = dma.done.wait [#allocation3], 43904  }
  0x23   :  { %8280 = vsyncadd [#allocation3], 4294923392 }
  0x24   :  { %8281 = dma.done.wait [#allocation5], 57600  }
  0x25   :  { %8282 = vsyncadd [#allocation5], 4294909696  ;;  %v7227_v0 = vld [vmem:[#allocation2 + $0x18c] ss:$28 sps:$4 sm:$0xff]   ;;  %v7233_v4 = vld [vmem:[#allocation2 + $0x154] ss:$28 sps:$4 sm:$0xff]  }
  0x26   :  { %v7229_v1 = vld [vmem:[#allocation2 + $0x50c] ss:$28 sps:$4 sm:$0xff]   ;;  %2279 = vmatprep.subr.bf16.mxu0 %v7227_v0  ;;  %v7235_v5 = vld [vmem:[#allocation2 + $0x4d4] ss:$28 sps:$4 sm:$0xff]   ;;  %v7239_v8 = vld [vmem:[#allocation2 + $0x11c] ss:$28 sps:$4 sm:$0xff]  }
  0x27   :  { %v7231_v2 = vld [vmem:[#allocation2 + $0x188] ss:$28 sps:$4 sm:$0xff]   ;;  %2320 = vmatprep.subr.bf16.mxu1 %v7229_v1  ;;  %v7237_v6 = vld [vmem:[#allocation2 + $0x150] ss:$28 sps:$4 sm:$0xff]   ;;  %v7241_v9 = vld [vmem:[#allocation2 + $0x49c] ss:$28 sps:$4 sm:$0xff]  }
  0x28   :  { %v7232_v3 = vld [vmem:[#allocation2 + $0x508] ss:$28 sps:$4 sm:$0xff]   ;;  %2280 = vmatpush1.bf16.msra.mxu0 %v7231_v2  ;;  %v7238_v7 = vld [vmem:[#allocation2 + $0x4d0] ss:$28 sps:$4 sm:$0xff]   ;;  %v7243_v10 = vld [vmem:[#allocation2 + $0x118] ss:$28 sps:$4 sm:$0xff]  }
  0x29   :  { %2321 = vmatpush1.bf16.msra.mxu1 %v7232_v3  ;;  %2281 = vmatprep.subr.bf16.mxu0 %v7233_v4  ;;  %v7244_v11 = vld [vmem:[#allocation2 + $0x498] ss:$28 sps:$4 sm:$0xff]   ;;  %v7245_v12 = vld [vmem:[#allocation2 + $0xe4] ss:$28 sps:$4 sm:$0xff]   ;;  %v7251_v16 = vld [vmem:[#allocation2 + $0xac] ss:$28 sps:$4 sm:$0xff]  }
  0x2a   :  { %2322 = vmatprep.subr.bf16.mxu1 %v7235_v5  ;;  %v7247_v13 = vld [vmem:[#allocation2 + $0x464] ss:$28 sps:$4 sm:$0xff]   ;;  %v7253_v17 = vld [vmem:[#allocation2 + $0x42c] ss:$28 sps:$4 sm:$0xff]   ;;  %v7257_v20 = vld [vmem:[#allocation2 + $0x74] ss:$28 sps:$4 sm:$0xff]  }
  0x2b   :  { %v7249_v14 = vld [vmem:[#allocation2 + $0xe0] ss:$28 sps:$4 sm:$0xff]   ;;  %v7255_v18 = vld [vmem:[#allocation2 + $0xa8] ss:$28 sps:$4 sm:$0xff]   ;;  %v7259_v21 = vld [vmem:[#allocation2 + $0x3f4] ss:$28 sps:$4 sm:$0xff]  }
  0x2c   :  { %2282 = vmatpush1.bf16.msra.mxu0 %v7237_v6  ;;  %v7250_v15 = vld [vmem:[#allocation2 + $0x460] ss:$28 sps:$4 sm:$0xff]   ;;  %v7256_v19 = vld [vmem:[#allocation2 + $0x428] ss:$28 sps:$4 sm:$0xff]   ;;  %v7261_v22 = vld [vmem:[#allocation2 + $0x70] ss:$28 sps:$4 sm:$0xff]  }
  0x2d   :  { %2323 = vmatpush1.bf16.msra.mxu1 %v7238_v7  ;;  %2283 = vmatprep.subr.bf16.mxu0 %v7239_v8  ;;  %v7262_v23 = vld [vmem:[#allocation2 + $0x3f0] ss:$28 sps:$4 sm:$0xff]   ;;  %v7263_v24 = vld [vmem:[#allocation2 + $0x3c] ss:$28 sps:$4 sm:$0xff]   ;;  %v7269_v28 = vld [vmem:[#allocation2 + $0x4] ss:$28 sps:$4 sm:$0xff]  }
  0x2e   :  { %2324 = vmatprep.subr.bf16.mxu1 %v7241_v9  ;;  %v7265_v25 = vld [vmem:[#allocation2 + $0x3bc] ss:$28 sps:$4 sm:$0xff]   ;;  %v7271_v29 = vld [vmem:[#allocation2 + $0x384] ss:$28 sps:$4 sm:$0xff]   ;;  %v7275_v32 = vld [vmem:[#allocation2 + $0x34c] ss:$28 sps:$4 sm:$0xff]  }
  0x2f   :  { %v7267_v26 = vld [vmem:[#allocation2 + $0x38] ss:$28 sps:$4 sm:$0xff]   ;;  %v7273_v30 = vld [vmem:[#allocation2] ss:$28 sps:$4 sm:$0xff]   ;;  %v7277_v33 = vld [vmem:[#allocation2 + $0x6cc] ss:$28 sps:$4 sm:$0xff]  }
  0x30   :  { %2284 = vmatpush1.bf16.msra.mxu0 %v7243_v10  ;;  %v7268_v27 = vld [vmem:[#allocation2 + $0x3b8] ss:$28 sps:$4 sm:$0xff]   ;;  %v7274_v31 = vld [vmem:[#allocation2 + $0x380] ss:$28 sps:$4 sm:$0xff]   ;;  %v7279_v34 = vld [vmem:[#allocation2 + $0x348] ss:$28 sps:$4 sm:$0xff]  }
  0x31   :  { %2325 = vmatpush1.bf16.msra.mxu1 %v7244_v11  ;;  %2285 = vmatprep.subr.bf16.mxu0 %v7245_v12  ;;  %v7280_v35 = vld [vmem:[#allocation2 + $0x6c8] ss:$28 sps:$4 sm:$0xff]   ;;  %v7281_v36 = vld [vmem:[#allocation2 + $0x314] ss:$28 sps:$4 sm:$0xff]   ;;  %v7287_v40 = vld [vmem:[#allocation2 + $0x2dc] ss:$28 sps:$4 sm:$0xff]  }
  0x32   :  { %2326 = vmatprep.subr.bf16.mxu1 %v7247_v13  ;;  %v7283_v37 = vld [vmem:[#allocation2 + $0x694] ss:$28 sps:$4 sm:$0xff]   ;;  %v7289_v41 = vld [vmem:[#allocation2 + $0x65c] ss:$28 sps:$4 sm:$0xff]   ;;  %v7293_v44 = vld [vmem:[#allocation2 + $0x2a4] ss:$28 sps:$4 sm:$0xff]  }
  0x33   :  { %v7285_v38 = vld [vmem:[#allocation2 + $0x310] ss:$28 sps:$4 sm:$0xff]   ;;  %v7291_v42 = vld [vmem:[#allocation2 + $0x2d8] ss:$28 sps:$4 sm:$0xff]   ;;  %v7295_v45 = vld [vmem:[#allocation2 + $0x624] ss:$28 sps:$4 sm:$0xff]  }
  0x34   :  { %2286 = vmatpush1.bf16.msra.mxu0 %v7249_v14  ;;  %v7286_v39 = vld [vmem:[#allocation2 + $0x690] ss:$28 sps:$4 sm:$0xff]   ;;  %v7292_v43 = vld [vmem:[#allocation2 + $0x658] ss:$28 sps:$4 sm:$0xff]   ;;  %v7297_v47 = vld [vmem:[#allocation2 + $0x2a0] ss:$28 sps:$4 sm:$0xff]  }
  0x35   :  { %2327 = vmatpush1.bf16.msra.mxu1 %v7250_v15  ;;  %2287 = vmatprep.subr.bf16.mxu0 %v7251_v16  ;;  %v69_v46 = vld [vmem:[%s8607_s0 + $0x8] sm:$0xff]  ;;  %v7298_v48 = vld [vmem:[#allocation2 + $0x620] ss:$28 sps:$4 sm:$0xff]   ;;  %v7305_v56 = vld [vmem:[#allocation2 + $0x234] ss:$28 sps:$4 sm:$0xff]   ;;  %v8290_v16 = vmov 0  }
  0x36   :  { %2328 = vmatprep.subr.bf16.mxu1 %v7253_v17  ;;  %v8345_v49 = vpack.c.bf16 %v69_v46, %v69_v46  ;;  %v71_v50 = vld [vmem:[%s8607_s0 + $0x18] sm:$0xff]  ;;  %v7299_v51 = vld [vmem:[#allocation2 + $0x26c] ss:$28 sps:$4 sm:$0xff]   ;;  %v7307_v57 = vld [vmem:[#allocation2 + $0x5b4] ss:$28 sps:$4 sm:$0xff]   ;;  %vm2275_vm0 = vcmask 130048  }
  0x37   :  { %v8350_v52 = vpack.c.bf16 %v71_v50, %v71_v50  ;;  %v7301_v53 = vld [vmem:[#allocation2 + $0x5ec] ss:$28 sps:$4 sm:$0xff]   ;;  %v7311_v60 = vld [vmem:[#allocation2 + $0x1fc] ss:$28 sps:$4 sm:$0xff]   ;;  %v7317_v0 = vld [vmem:[#allocation2 + $0x1c4] ss:$28 sps:$4 sm:$0xff]  }
  0x38   :  { %2288 = vmatpush1.bf16.msra.mxu0 %v7255_v18  ;;  %2311 = vmatprep.mubr.bf16.mxu0 %v8345_v49  ;;  %v7303_v54 = vld [vmem:[#allocation2 + $0x268] ss:$28 sps:$4 sm:$0xff]   ;;  %v7309_v58 = vld [vmem:[#allocation2 + $0x230] ss:$28 sps:$4 sm:$0xff]   ;;  %v7313_v61 = vld [vmem:[#allocation2 + $0x57c] ss:$28 sps:$4 sm:$0xff]  }
  0x39   :  { %2329 = vmatpush1.bf16.msra.mxu1 %v7256_v19  ;;  %2289 = vmatprep.subr.bf16.mxu0 %v7257_v20  ;;  %v7304_v55 = vld [vmem:[#allocation2 + $0x5e8] ss:$28 sps:$4 sm:$0xff]   ;;  %v7310_v59 = vld [vmem:[#allocation2 + $0x5b0] ss:$28 sps:$4 sm:$0xff]   ;;  %v7315_v62 = vld [vmem:[#allocation2 + $0x1f8] ss:$28 sps:$4 sm:$0xff]  }
  0x3a   :  { %2330 = vmatprep.subr.bf16.mxu1 %v7259_v21  ;;  %2352 = vmatprep.mubr.bf16.mxu1 %v8350_v52  ;;  %v7316_v63 = vld [vmem:[#allocation2 + $0x578] ss:$28 sps:$4 sm:$0xff]   ;;  %v7319_v1 = vld [vmem:[#allocation2 + $0x544] ss:$28 sps:$4 sm:$0xff]   ;;  %v7325_v6 = vld [vmem:[#allocation2 + $0x88c] ss:$28 sps:$4 sm:$0xff]  }
  0x3b   :  { %v7321_v2 = vld [vmem:[#allocation2 + $0x1c0] ss:$28 sps:$4 sm:$0xff]   ;;  %v70_v5 = vld [vmem:[%s8607_s0 + $0x10] sm:$0xff]  ;;  %v7323_v10 = vld [vmem:[#allocation2 + $0x888] ss:$28 sps:$4 sm:$0xff]   ;;  %vm8292_vm1 = vmmov 0  }
  0x3c   :  { %2290 = vmatpush1.bf16.msra.mxu0 %v7261_v22  ;;  %v7322_v3 = vld [vmem:[#allocation2 + $0x540] ss:$28 sps:$4 sm:$0xff]   ;;  %v8362_v9 = vpack.c.bf16 %v70_v5, %v70_v5  ;;  %v7331_v12 = vld [vmem:[#allocation2 + $0x854] ss:$28 sps:$4 sm:$0xff]   ;;  %v7371_v46 = vld [vmem:[#allocation2 + $0xa48] ss:$28 sps:$4 sm:$0xff]  }
  0x3d   :  { %2331 = vmatpush1.bf16.msra.mxu1 %v7262_v23  ;;  %2291 = vmatprep.subr.bf16.mxu0 %v7263_v24  ;;  %v68_v4 = vld [vmem:[%s8607_s0] sm:$0xff]  ;;  %v7334_v13 = vld [vmem:[#allocation2 + $0x194] ss:$28 sps:$4 sm:$0xff]   ;;  %v7337_v17 = vld [vmem:[#allocation2 + $0x81c] ss:$28 sps:$4 sm:$0xff]   ;;  %vm5182_vm2 = vcmask 261120  }
  0x3e   :  { %2332 = vmatprep.subr.bf16.mxu1 %v7265_v25  ;;  %v7328_v7 = vld [vmem:[#allocation2 + $0xa84] ss:$28 sps:$4 sm:$0xff]   ;;  %v8360_v8 = vpack.c.bf16 %v68_v4, %v68_v4  ;;  %v7329_v14 = vld [vmem:[#allocation2 + $0x850] ss:$28 sps:$4 sm:$0xff]   ;;  %v7335_v20 = vld [vmem:[#allocation2 + $0x818] ss:$28 sps:$4 sm:$0xff]  }
  0x3f   :  { %v7326_v11 = vld [vmem:[#allocation2 + $0xa80] ss:$28 sps:$4 sm:$0xff]   ;;  %v74_v15 = vld [vmem:[%s8607_s0 + $0x30] sm:$0xff]  ;;  %v7374_v50 = vld [vmem:[#allocation2 + $0x8] ss:$28 sps:$4 sm:$0xff]  }
  0x40   :  { %2292 = vmatpush1.bf16.msra.mxu0 %v7267_v26  ;;  %v7332_v18 = vld [vmem:[#allocation2 + $0x190] ss:$28 sps:$4 sm:$0xff]   ;;  %v8370_v19 = vpack.c.bf16 %v74_v15, %v74_v15  ;;  %v7340_v21 = vld [vmem:[#allocation2 + $0x15c] ss:$28 sps:$4 sm:$0xff]   ;;  %v7343_v22 = vld [vmem:[#allocation2 + $0x7e4] ss:$28 sps:$4 sm:$0xff]  }
  0x41   :  { %2333 = vmatpush1.bf16.msra.mxu1 %v7268_v27  ;;  %2293 = vmatprep.subr.bf16.mxu0 %v7269_v28  ;;  %v7338_v23 = vld [vmem:[#allocation2 + $0x158] ss:$28 sps:$4 sm:$0xff]   ;;  %v7341_v24 = vld [vmem:[#allocation2 + $0x7e0] ss:$28 sps:$4 sm:$0xff]   ;;  %v7349_v26 = vld [vmem:[#allocation2 + $0x7ac] ss:$28 sps:$4 sm:$0xff]  }
  0x42   :  { %2334 = vmatprep.subr.bf16.mxu1 %v7271_v29  ;;  %v7346_v25 = vld [vmem:[#allocation2 + $0x124] ss:$28 sps:$4 sm:$0xff]   ;;  %v7352_v29 = vld [vmem:[#allocation2 + $0xec] ss:$28 sps:$4 sm:$0xff]   ;;  %v7406_v5 = vld [vmem:[#allocation2 + $0x274] ss:$28 sps:$4 sm:$0xff]  }
  0x43   :  { %v7344_v27 = vld [vmem:[#allocation2 + $0x120] ss:$28 sps:$4 sm:$0xff]   ;;  %v7347_v28 = vld [vmem:[#allocation2 + $0x7a8] ss:$28 sps:$4 sm:$0xff]   ;;  %v7401_v4 = vld [vmem:[#allocation2 + $0x930] ss:$28 sps:$4 sm:$0xff]  }
  0x44   :  { %2294 = vmatpush1.bf16.msra.mxu0 %v7273_v30  ;;  %v7355_v30 = vld [vmem:[#allocation2 + $0x774] ss:$28 sps:$4 sm:$0xff]   ;;  %v7418_v15 = vld [vmem:[#allocation2 + $0x204] ss:$28 sps:$4 sm:$0xff]  }
  0x45   :  { %2335 = vmatpush1.bf16.msra.mxu1 %v7274_v31  ;;  %2295 = vmatprep.subr.bf16.mxu0 %v7275_v32  ;;  %v7350_v31 = vld [vmem:[#allocation2 + $0xe8] ss:$28 sps:$4 sm:$0xff]   ;;  %v7353_v32 = vld [vmem:[#allocation2 + $0x770] ss:$28 sps:$4 sm:$0xff]  }
  0x46   :  { %2336 = vmatprep.subr.bf16.mxu1 %v7277_v33  ;;  %v7358_v33 = vld [vmem:[#allocation2 + $0xb4] ss:$28 sps:$4 sm:$0xff]  }
  0x48   :  { %2296 = vmatpush2.bf16.msra.mxu0 %v7279_v34  ;;  %v7361_v34 = vld [vmem:[#allocation2 + $0x73c] ss:$28 sps:$4 sm:$0xff]  }
  0x49   :  { %2337 = vmatpush2.bf16.msra.mxu1 %v7280_v35  ;;  %2297 = vmatprep.subr.bf16.mxu0 %v7281_v36  ;;  %v73_v35 = vld [vmem:[%s8607_s0 + $0x28] sm:$0xff] }
  0x4a   :  { %2338 = vmatprep.subr.bf16.mxu1 %v7283_v37  ;;  %v8378_v36 = vpack.c.bf16 %v73_v35, %v73_v35  ;;  %v7356_v37 = vld [vmem:[#allocation2 + $0xb0] ss:$28 sps:$4 sm:$0xff]   ;;  %v7442_v35 = vld [vmem:[#allocation2 + $0x824] ss:$28 sps:$4 sm:$0xff]  }
  0x4c   :  { %2298 = vmatpush2.bf16.msra.mxu0 %v7285_v38  ;;  %v7359_v38 = vld [vmem:[#allocation2 + $0x738] ss:$28 sps:$4 sm:$0xff]  }
  0x4d   :  { %2339 = vmatpush2.bf16.msra.mxu1 %v7286_v39  ;;  %2299 = vmatprep.subr.bf16.mxu0 %v7287_v40  ;;  %v7364_v39 = vld [vmem:[#allocation2 + $0x7c] ss:$28 sps:$4 sm:$0xff]   ;;  %v7367_v40 = vld [vmem:[#allocation2 + $0x704] ss:$28 sps:$4 sm:$0xff]  }
  0x4e   :  { %2340 = vmatprep.subr.bf16.mxu1 %v7289_v41  ;;  %v7362_v41 = vld [vmem:[#allocation2 + $0x78] ss:$28 sps:$4 sm:$0xff]  }
  0x50   :  { %2300 = vmatpush2.bf16.msra.mxu0 %v7291_v42  ;;  %v7365_v42 = vld [vmem:[#allocation2 + $0x700] ss:$28 sps:$4 sm:$0xff]  }
  0x51   :  { %2341 = vmatpush2.bf16.msra.mxu1 %v7292_v43  ;;  %2301 = vmatprep.subr.bf16.mxu0 %v7293_v44  ;;  %v7370_v43 = vld [vmem:[#allocation2 + $0x44] ss:$28 sps:$4 sm:$0xff]   ;;  %v7373_v44 = vld [vmem:[#allocation2 + $0xa4c] ss:$28 sps:$4 sm:$0xff]  }
  0x52   :  { %2342 = vmatprep.subr.bf16.mxu1 %v7295_v45  ;;  %v7368_v45 = vld [vmem:[#allocation2 + $0x40] ss:$28 sps:$4 sm:$0xff]  }
  0x54   :  { %2302 = vmatpush2.bf16.msra.mxu0 %v7297_v47  ;;  %v7376_v47 = vld [vmem:[#allocation2 + $0xc] ss:$28 sps:$4 sm:$0xff]  }
  0x55   :  { %2343 = vmatpush2.bf16.msra.mxu1 %v7298_v48  ;;  %2303 = vmatprep.subr.bf16.mxu0 %v7299_v51  ;;  %v7379_v48 = vld [vmem:[#allocation2 + $0xa14] ss:$28 sps:$4 sm:$0xff]  }
  0x56   :  { %2344 = vmatprep.subr.bf16.mxu1 %v7301_v53  ;;  %v7377_v51 = vld [vmem:[#allocation2 + $0xa10] ss:$28 sps:$4 sm:$0xff]  }
  0x57   :  { %v7382_v53 = vld [vmem:[#allocation2 + $0x354] ss:$28 sps:$4 sm:$0xff]  }
  0x58   :  { %2304 = vmatpush2.bf16.msra.mxu0 %v7303_v54  ;;  %v7385_v54 = vld [vmem:[#allocation2 + $0x9dc] ss:$28 sps:$4 sm:$0xff]  }
  0x59   :  { %2345 = vmatpush2.bf16.msra.mxu1 %v7304_v55  ;;  %2305 = vmatprep.subr.bf16.mxu0 %v7305_v56  ;;  %v7380_v55 = vld [vmem:[#allocation2 + $0x350] ss:$28 sps:$4 sm:$0xff]   ;;  %v7383_v56 = vld [vmem:[#allocation2 + $0x9d8] ss:$28 sps:$4 sm:$0xff]  }
  0x5a   :  { %2346 = vmatprep.subr.bf16.mxu1 %v7307_v57  ;;  %v7388_v57 = vld [vmem:[#allocation2 + $0x31c] ss:$28 sps:$4 sm:$0xff]  }
  0x5c   :  { %2306 = vmatpush2.bf16.msra.mxu0 %v7309_v58  ;;  %v7391_v58 = vld [vmem:[#allocation2 + $0x9a4] ss:$28 sps:$4 sm:$0xff]  }
  0x5d   :  { %2347 = vmatpush2.bf16.msra.mxu1 %v7310_v59  ;;  %2307 = vmatprep.subr.bf16.mxu0 %v7311_v60  ;;  %v7386_v59 = vld [vmem:[#allocation2 + $0x318] ss:$28 sps:$4 sm:$0xff]   ;;  %v7389_v60 = vld [vmem:[#allocation2 + $0x9a0] ss:$28 sps:$4 sm:$0xff]  }
  0x5e   :  { %2348 = vmatprep.subr.bf16.mxu1 %v7313_v61  ;;  %v7394_v61 = vld [vmem:[#allocation2 + $0x2e4] ss:$28 sps:$4 sm:$0xff]  }
  0x60   :  { %2308 = vmatpush2.bf16.msra.mxu0 %v7315_v62  ;;  %v7397_v62 = vld [vmem:[#allocation2 + $0x96c] ss:$28 sps:$4 sm:$0xff]  }
  0x61   :  { %2349 = vmatpush2.bf16.msra.mxu1 %v7316_v63  ;;  %2309 = vmatprep.subr.bf16.mxu0 %v7317_v0  ;;  %v7392_v63 = vld [vmem:[#allocation2 + $0x2e0] ss:$28 sps:$4 sm:$0xff]   ;;  %v7395_v0 = vld [vmem:[#allocation2 + $0x968] ss:$28 sps:$4 sm:$0xff]  }
  0x62   :  { %2350 = vmatprep.subr.bf16.mxu1 %v7319_v1  ;;  %v7400_v1 = vld [vmem:[#allocation2 + $0x2ac] ss:$28 sps:$4 sm:$0xff]  }
  0x64   :  { %2310 = vmatpush2.bf16.msra.mxu0 %v7321_v2  ;;  %v7403_v2 = vld [vmem:[#allocation2 + $0x934] ss:$28 sps:$4 sm:$0xff]  }
  0x65   :  { %2351 = vmatpush2.bf16.msra.mxu1 %v7322_v3  ;;  %2361 = vmatprep.subr.bf16.mxu0 %v7325_v6  ;;  %v7398_v3 = vld [vmem:[#allocation2 + $0x2a8] ss:$28 sps:$4 sm:$0xff]   ;;  %v7409_v6 = vld [vmem:[#allocation2 + $0x8fc] ss:$28 sps:$4 sm:$0xff]  }
  0x66   :  { %2416 = vmatprep.subr.bf16.mxu1 %v7328_v7  ;;  %v7404_v7 = vld [vmem:[#allocation2 + $0x270] ss:$28 sps:$4 sm:$0xff]  }
  0x67   :  { %2312 = vmatmul.mubr.bf16.vlgmr.msra.gmra.mxu0 %v8360_v8 }
  0x68   :  { %2353 = vmatmul.mubr.bf16.vlgmr.msra.gmra.mxu1 %v8362_v9  ;;  %2362 = vmatpush1.bf16.msra.mxu0 %v7323_v10  ;;  %v7407_v10 = vld [vmem:[#allocation2 + $0x8f8] ss:$28 sps:$4 sm:$0xff]  }
  0x69   :  { %2417 = vmatpush1.bf16.msra.mxu1 %v7326_v11  ;;  %2363 = vmatprep.subr.bf16.mxu0 %v7331_v12  ;;  %v7412_v11 = vld [vmem:[#allocation2 + $0x23c] ss:$28 sps:$4 sm:$0xff]   ;;  %v7415_v12 = vld [vmem:[#allocation2 + $0x8c4] ss:$28 sps:$4 sm:$0xff]  }
  0x6a   :  { %2434 = vmatprep.mubr.bf16.mxu1 %v8290_v16  ;;  %2443 = vmatprep.subr.bf16.mxu1 %v7334_v13  ;;  %v7410_v13 = vld [vmem:[#allocation2 + $0x238] ss:$28 sps:$4 sm:$0xff]  }
  0x6b   :  { %2393 = vmatprep.mubr.bf16.mxu0 %v8378_v36 }
  0x6c   :  { %2364 = vmatpush1.bf16.msra.mxu0 %v7329_v14  ;;  %v7413_v14 = vld [vmem:[#allocation2 + $0x8c0] ss:$28 sps:$4 sm:$0xff]  }
  0x6d   :  { %2365 = vmatprep.subr.bf16.mxu0 %v7337_v17  ;;  %v72_v17 = vld [vmem:[%s8607_s0 + $0x20] sm:$0xff] }
  0x70   :  { %6585 = vmatmul.mubr.msk.bf16.vlgmr.msra.gmra.mxu1 %vm2275_vm0, %v8370_v19  ;;  %2366 = vmatpush1.bf16.msra.mxu0 %v7335_v20  ;;  %v7416_v20 = vld [vmem:[#allocation2 + $0x200] ss:$28 sps:$4 sm:$0xff]  }
  0x71   :  { %2444 = vmatpush1.bf16.msra.mxu1 %v7332_v18  ;;  %2367 = vmatprep.subr.bf16.mxu0 %v7343_v22  ;;  %v7421_v18 = vld [vmem:[#allocation2 + $0x514] ss:$28 sps:$4 sm:$0xff]  }
  0x72   :  { %2445 = vmatprep.subr.bf16.mxu1 %v7340_v21  ;;  %2475 = vmatprep.mubr.bf16.mxu1 %v8345_v49  ;;  %v8384_v21 = vpack.c.bf16 %v72_v17, %v72_v17  ;;  %v7419_v22 = vld [vmem:[#allocation2 + $0x510] ss:$28 sps:$4 sm:$0xff]  }
  0x73   :  { %v7502_v17 = vld [vmem:[#allocation2 + $0x974] ss:$28 sps:$4 sm:$0xff]  }
  0x74   :  { %2368 = vmatpush1.bf16.msra.mxu0 %v7341_v24  ;;  %v7427_v24 = vld [vmem:[#allocation2 + $0x4dc] ss:$28 sps:$4 sm:$0xff]  }
  0x75   :  { %2446 = vmatpush1.bf16.msra.mxu1 %v7338_v23  ;;  %2369 = vmatprep.subr.bf16.mxu0 %v7349_v26  ;;  %v7424_v23 = vld [vmem:[#allocation2 + $0x1cc] ss:$28 sps:$4 sm:$0xff]   ;;  %v7425_v26 = vld [vmem:[#allocation2 + $0x4d8] ss:$28 sps:$4 sm:$0xff]  }
  0x76   :  { %2447 = vmatprep.subr.bf16.mxu1 %v7346_v25  ;;  %v7422_v25 = vld [vmem:[#allocation2 + $0x1c8] ss:$28 sps:$4 sm:$0xff]  }
  0x78   :  { %2370 = vmatpush1.bf16.msra.mxu0 %v7347_v28  ;;  %v7433_v28 = vld [vmem:[#allocation2 + $0x4a4] ss:$28 sps:$4 sm:$0xff]  }
  0x79   :  { %2448 = vmatpush1.bf16.msra.mxu1 %v7344_v27  ;;  %2371 = vmatprep.subr.bf16.mxu0 %v7355_v30  ;;  %v7430_v27 = vld [vmem:[#allocation2 + $0x894] ss:$28 sps:$4 sm:$0xff]   ;;  %v7431_v30 = vld [vmem:[#allocation2 + $0x4a0] ss:$28 sps:$4 sm:$0xff]  }
  0x7a   :  { %2449 = vmatprep.subr.bf16.mxu1 %v7352_v29  ;;  %v7428_v29 = vld [vmem:[#allocation2 + $0x890] ss:$28 sps:$4 sm:$0xff]  }
  0x7c   :  { %2372 = vmatpush1.bf16.msra.mxu0 %v7353_v32  ;;  %v7439_v32 = vld [vmem:[#allocation2 + $0x46c] ss:$28 sps:$4 sm:$0xff]  }
  0x7d   :  { %2450 = vmatpush1.bf16.msra.mxu1 %v7350_v31  ;;  %2373 = vmatprep.subr.bf16.mxu0 %v7361_v34  ;;  %v7436_v31 = vld [vmem:[#allocation2 + $0x85c] ss:$28 sps:$4 sm:$0xff]   ;;  %v7437_v34 = vld [vmem:[#allocation2 + $0x468] ss:$28 sps:$4 sm:$0xff]  }
  0x7e   :  { %2451 = vmatprep.subr.bf16.mxu1 %v7358_v33  ;;  %v7434_v33 = vld [vmem:[#allocation2 + $0x858] ss:$28 sps:$4 sm:$0xff]  }
  0x80   :  { %2374 = vmatpush1.bf16.msra.mxu0 %v7359_v38  ;;  %v7440_v38 = vld [vmem:[#allocation2 + $0x820] ss:$28 sps:$4 sm:$0xff]  }
  0x81   :  { %2452 = vmatpush1.bf16.msra.mxu1 %v7356_v37  ;;  %2375 = vmatprep.subr.bf16.mxu0 %v7367_v40  ;;  %v7445_v37 = vld [vmem:[#allocation2 + $0x434] ss:$28 sps:$4 sm:$0xff]   ;;  %v7448_v40 = vld [vmem:[#allocation2 + $0x7ec] ss:$28 sps:$4 sm:$0xff]  }
  0x82   :  { %2453 = vmatprep.subr.bf16.mxu1 %v7364_v39  ;;  %v7443_v39 = vld [vmem:[#allocation2 + $0x430] ss:$28 sps:$4 sm:$0xff]  }
  0x84   :  { %2376 = vmatpush1.bf16.msra.mxu0 %v7365_v42  ;;  %v7446_v42 = vld [vmem:[#allocation2 + $0x7e8] ss:$28 sps:$4 sm:$0xff]  }
  0x85   :  { %2454 = vmatpush1.bf16.msra.mxu1 %v7362_v41  ;;  %2377 = vmatprep.subr.bf16.mxu0 %v7373_v44  ;;  %v7451_v41 = vld [vmem:[#allocation2 + $0x3fc] ss:$28 sps:$4 sm:$0xff]   ;;  %v7454_v44 = vld [vmem:[#allocation2 + $0x7b4] ss:$28 sps:$4 sm:$0xff]  }
  0x86   :  { %2455 = vmatprep.subr.bf16.mxu1 %v7370_v43  ;;  %v7449_v43 = vld [vmem:[#allocation2 + $0x3f8] ss:$28 sps:$4 sm:$0xff]  }
  0x88   :  { %2378 = vmatpush2.bf16.msra.mxu0 %v7371_v46  ;;  %v7452_v46 = vld [vmem:[#allocation2 + $0x7b0] ss:$28 sps:$4 sm:$0xff]  }
  0x89   :  { %2456 = vmatpush1.bf16.msra.mxu1 %v7368_v45  ;;  %2379 = vmatprep.subr.bf16.mxu0 %v7379_v48  ;;  %v7457_v45 = vld [vmem:[#allocation2 + $0x3c4] ss:$28 sps:$4 sm:$0xff]   ;;  %v7460_v48 = vld [vmem:[#allocation2 + $0x77c] ss:$28 sps:$4 sm:$0xff]  }
  0x8a   :  { %2457 = vmatprep.subr.bf16.mxu1 %v7376_v47  ;;  %v7455_v47 = vld [vmem:[#allocation2 + $0x3c0] ss:$28 sps:$4 sm:$0xff]  }
  0x8c   :  { %2380 = vmatpush2.bf16.msra.mxu0 %v7377_v51  ;;  %v7458_v51 = vld [vmem:[#allocation2 + $0x778] ss:$28 sps:$4 sm:$0xff]  }
  0x8d   :  { %2458 = vmatpush1.bf16.msra.mxu1 %v7374_v50  ;;  %2381 = vmatprep.subr.bf16.mxu0 %v7385_v54  ;;  %v7463_v50 = vld [vmem:[#allocation2 + $0x38c] ss:$28 sps:$4 sm:$0xff]   ;;  %v7466_v54 = vld [vmem:[#allocation2 + $0x744] ss:$28 sps:$4 sm:$0xff]  }
  0x8e   :  { %2459 = vmatprep.subr.bf16.mxu1 %v7382_v53  ;;  %v7461_v53 = vld [vmem:[#allocation2 + $0x388] ss:$28 sps:$4 sm:$0xff]  }
  0x90   :  { %2382 = vmatpush2.bf16.msra.mxu0 %v7383_v56  ;;  %v7464_v56 = vld [vmem:[#allocation2 + $0x740] ss:$28 sps:$4 sm:$0xff]  }
  0x91   :  { %2460 = vmatpush2.bf16.msra.mxu1 %v7380_v55  ;;  %2383 = vmatprep.subr.bf16.mxu0 %v7391_v58  ;;  %v7469_v55 = vld [vmem:[#allocation2 + $0x6d4] ss:$28 sps:$4 sm:$0xff]   ;;  %v7472_v58 = vld [vmem:[#allocation2 + $0x70c] ss:$28 sps:$4 sm:$0xff]  }
  0x92   :  { %2461 = vmatprep.subr.bf16.mxu1 %v7388_v57  ;;  %v7467_v57 = vld [vmem:[#allocation2 + $0x6d0] ss:$28 sps:$4 sm:$0xff]  }
  0x94   :  { %2384 = vmatpush2.bf16.msra.mxu0 %v7389_v60  ;;  %v7470_v60 = vld [vmem:[#allocation2 + $0x708] ss:$28 sps:$4 sm:$0xff]  }
  0x95   :  { %2462 = vmatpush2.bf16.msra.mxu1 %v7386_v59  ;;  %2385 = vmatprep.subr.bf16.mxu0 %v7397_v62  ;;  %v7475_v59 = vld [vmem:[#allocation2 + $0x69c] ss:$28 sps:$4 sm:$0xff]   ;;  %v7478_v62 = vld [vmem:[#allocation2 + $0xa54] ss:$28 sps:$4 sm:$0xff]  }
  0x96   :  { %2463 = vmatprep.subr.bf16.mxu1 %v7394_v61  ;;  %v7473_v61 = vld [vmem:[#allocation2 + $0x698] ss:$28 sps:$4 sm:$0xff]  }
  0x98   :  { %2386 = vmatpush2.bf16.msra.mxu0 %v7395_v0  ;;  %v7476_v0 = vld [vmem:[#allocation2 + $0xa50] ss:$28 sps:$4 sm:$0xff]  }
  0x99   :  { %2464 = vmatpush2.bf16.msra.mxu1 %v7392_v63  ;;  %2387 = vmatprep.subr.bf16.mxu0 %v7403_v2  ;;  %v7481_v63 = vld [vmem:[#allocation2 + $0x664] ss:$28 sps:$4 sm:$0xff]   ;;  %v7484_v2 = vld [vmem:[#allocation2 + $0xa1c] ss:$28 sps:$4 sm:$0xff]  }
  0x9a   :  { %2465 = vmatprep.subr.bf16.mxu1 %v7400_v1  ;;  %v7479_v1 = vld [vmem:[#allocation2 + $0x660] ss:$28 sps:$4 sm:$0xff]  }
  0x9c   :  { %2388 = vmatpush2.bf16.msra.mxu0 %v7401_v4  ;;  %v7482_v4 = vld [vmem:[#allocation2 + $0xa18] ss:$28 sps:$4 sm:$0xff]  }
  0x9d   :  { %2466 = vmatpush2.bf16.msra.mxu1 %v7398_v3  ;;  %2389 = vmatprep.subr.bf16.mxu0 %v7409_v6  ;;  %v7487_v3 = vld [vmem:[#allocation2 + $0x62c] ss:$28 sps:$4 sm:$0xff]   ;;  %v7490_v6 = vld [vmem:[#allocation2 + $0x9e4] ss:$28 sps:$4 sm:$0xff]  }
  0x9e   :  { %2467 = vmatprep.subr.bf16.mxu1 %v7406_v5  ;;  %v7485_v5 = vld [vmem:[#allocation2 + $0x628] ss:$28 sps:$4 sm:$0xff]  }
  0xa0   :  { %2390 = vmatpush2.bf16.msra.mxu0 %v7407_v10  ;;  %v7488_v10 = vld [vmem:[#allocation2 + $0x9e0] ss:$28 sps:$4 sm:$0xff]  }
  0xa1   :  { %2468 = vmatpush2.bf16.msra.mxu1 %v7404_v7  ;;  %2391 = vmatprep.subr.bf16.mxu0 %v7415_v12  ;;  %v7493_v7 = vld [vmem:[#allocation2 + $0x5f4] ss:$28 sps:$4 sm:$0xff]   ;;  %v7496_v12 = vld [vmem:[#allocation2 + $0x9ac] ss:$28 sps:$4 sm:$0xff]  }
  0xa2   :  { %2469 = vmatprep.subr.bf16.mxu1 %v7412_v11  ;;  %v7491_v11 = vld [vmem:[#allocation2 + $0x5f0] ss:$28 sps:$4 sm:$0xff]  }
  0xa4   :  { %2392 = vmatpush2.bf16.msra.mxu0 %v7413_v14  ;;  %v7494_v14 = vld [vmem:[#allocation2 + $0x9a8] ss:$28 sps:$4 sm:$0xff]  }
  0xa5   :  { %2470 = vmatpush2.bf16.msra.mxu1 %v7410_v13  ;;  %2484 = vmatprep.subr.bf16.mxu0 %v7421_v18  ;;  %v7499_v13 = vld [vmem:[#allocation2 + $0x5bc] ss:$28 sps:$4 sm:$0xff]   ;;  %v7505_v18 = vld [vmem:[#allocation2 + $0x584] ss:$28 sps:$4 sm:$0xff]  }
  0xa6   :  { %2471 = vmatprep.subr.bf16.mxu1 %v7418_v15  ;;  %v7497_v15 = vld [vmem:[#allocation2 + $0x5b8] ss:$28 sps:$4 sm:$0xff]  }
  0xa7   :  { %2394 = vmatmul.mubr.bf16.vlgmr.msra.gmra.mxu0 %v8384_v21 }
  0xa8   :  { %2485 = vmatpush1.bf16.msra.mxu0 %v7419_v22  ;;  %2516 = vmatprep.mubr.bf16.mxu0 %v8350_v52  ;;  %v7503_v22 = vld [vmem:[#allocation2 + $0x580] ss:$28 sps:$4 sm:$0xff]  }
  0xa9   :  { %2472 = vmatpush2.bf16.msra.mxu1 %v7416_v20  ;;  %2486 = vmatprep.subr.bf16.mxu0 %v7427_v24  ;;  %v7500_v20 = vld [vmem:[#allocation2 + $0x970] ss:$28 sps:$4 sm:$0xff]  }
  0xaa   :  { %2473 = vmatprep.subr.bf16.mxu1 %v7424_v23  ;;  %v7508_v23 = vld [vmem:[#allocation2 + $0x93c] ss:$28 sps:$4 sm:$0xff]   ;;  %v7511_v24 = vld [vmem:[#allocation2 + $0x54c] ss:$28 sps:$4 sm:$0xff]  }
  0xac   :  { %2487 = vmatpush1.bf16.msra.mxu0 %v7425_v26  ;;  %v7509_v26 = vld [vmem:[#allocation2 + $0x548] ss:$28 sps:$4 sm:$0xff]  }
  0xad   :  { %2474 = vmatpush2.bf16.msra.mxu1 %v7422_v25  ;;  %2488 = vmatprep.subr.bf16.mxu0 %v7433_v28  ;;  %v7506_v25 = vld [vmem:[#allocation2 + $0x938] ss:$28 sps:$4 sm:$0xff]  }
  0xae   :  { %2525 = vmatprep.subr.bf16.mxu1 %v7430_v27  ;;  %v7514_v27 = vld [vmem:[#allocation2 + $0x904] ss:$28 sps:$4 sm:$0xff]   ;;  %v7517_v28 = vld [vmem:[#allocation2 + $0x19c] ss:$28 sps:$4 sm:$0xff]  }
  0xb0   :  { %2476 = vmatmul.mubr.bf16.vlgmr.msra.gmra.mxu1 %v8360_v8  ;;  %2489 = vmatpush1.bf16.msra.mxu0 %v7431_v30  ;;  %v7515_v30 = vld [vmem:[#allocation2 + $0x198] ss:$28 sps:$4 sm:$0xff]  }
  0xb1   :  { %2526 = vmatpush1.bf16.msra.mxu1 %v7428_v29  ;;  %2490 = vmatprep.subr.bf16.mxu0 %v7439_v32  ;;  %v7512_v29 = vld [vmem:[#allocation2 + $0x900] ss:$28 sps:$4 sm:$0xff]  }
  0xb2   :  { %2527 = vmatprep.subr.bf16.mxu1 %v7436_v31  ;;  %2557 = vmatprep.mubr.bf16.mxu1 %v8378_v36  ;;  %v7520_v31 = vld [vmem:[#allocation2 + $0x8cc] ss:$28 sps:$4 sm:$0xff]   ;;  %v7523_v32 = vld [vmem:[#allocation2 + $0x164] ss:$28 sps:$4 sm:$0xff]  }
  0xb4   :  { %2491 = vmatpush1.bf16.msra.mxu0 %v7437_v34  ;;  %v7521_v34 = vld [vmem:[#allocation2 + $0x160] ss:$28 sps:$4 sm:$0xff]  }
  0xb5   :  { %2528 = vmatpush1.bf16.msra.mxu1 %v7434_v33  ;;  %2492 = vmatprep.subr.bf16.mxu0 %v7445_v37  ;;  %v7518_v33 = vld [vmem:[#allocation2 + $0x8c8] ss:$28 sps:$4 sm:$0xff]  }
  0xb6   :  { %2529 = vmatprep.subr.bf16.mxu1 %v7442_v35  ;;  %v7526_v35 = vld [vmem:[#allocation2 + $0x12c] ss:$28 sps:$4 sm:$0xff]  }
  0xb7   :  { %v7529_v37 = vld [vmem:[#allocation2 + $0xa8c] ss:$28 sps:$4 sm:$0xff]  }
  0xb8   :  { %2493 = vmatpush1.bf16.msra.mxu0 %v7443_v39  ;;  %v7527_v39 = vld [vmem:[#allocation2 + $0xa88] ss:$28 sps:$4 sm:$0xff]  }
  0xb9   :  { %2530 = vmatpush1.bf16.msra.mxu1 %v7440_v38  ;;  %2494 = vmatprep.subr.bf16.mxu0 %v7451_v41  ;;  %v7524_v38 = vld [vmem:[#allocation2 + $0x128] ss:$28 sps:$4 sm:$0xff]   ;;  %v7535_v41 = vld [vmem:[#allocation2 + $0x51c] ss:$28 sps:$4 sm:$0xff]  }
  0xba   :  { %2531 = vmatprep.subr.bf16.mxu1 %v7448_v40  ;;  %v7532_v40 = vld [vmem:[#allocation2 + $0xf4] ss:$28 sps:$4 sm:$0xff]  }
  0xbc   :  { %2495 = vmatpush1.bf16.msra.mxu0 %v7449_v43  ;;  %v7538_v43 = vld [vmem:[#allocation2 + $0xbc] ss:$28 sps:$4 sm:$0xff]  }
  0xbd   :  { %2532 = vmatpush1.bf16.msra.mxu1 %v7446_v42  ;;  %2496 = vmatprep.subr.bf16.mxu0 %v7457_v45  ;;  %v7530_v42 = vld [vmem:[#allocation2 + $0xf0] ss:$28 sps:$4 sm:$0xff]   ;;  %v7536_v45 = vld [vmem:[#allocation2 + $0xb8] ss:$28 sps:$4 sm:$0xff]  }
  0xbe   :  { %2533 = vmatprep.subr.bf16.mxu1 %v7454_v44  ;;  %v7533_v44 = vld [vmem:[#allocation2 + $0x518] ss:$28 sps:$4 sm:$0xff]  }
  0xc0   :  { %2497 = vmatpush1.bf16.msra.mxu0 %v7455_v47  ;;  %v7544_v47 = vld [vmem:[#allocation2 + $0x84] ss:$28 sps:$4 sm:$0xff]  }
  0xc1   :  { %2534 = vmatpush1.bf16.msra.mxu1 %v7452_v46  ;;  %2498 = vmatprep.subr.bf16.mxu0 %v7463_v50  ;;  %v7541_v46 = vld [vmem:[#allocation2 + $0x4e4] ss:$28 sps:$4 sm:$0xff]  }
  0xc2   :  { %2535 = vmatprep.subr.bf16.mxu1 %v7460_v48  ;;  %v7539_v48 = vld [vmem:[#allocation2 + $0x4e0] ss:$28 sps:$4 sm:$0xff]  }
  0xc3   :  { %v7542_v50 = vld [vmem:[#allocation2 + $0x80] ss:$28 sps:$4 sm:$0xff]  }
  0xc4   :  { %2499 = vmatpush1.bf16.msra.mxu0 %v7461_v53  ;;  %v7550_v53 = vld [vmem:[#allocation2 + $0x4c] ss:$28 sps:$4 sm:$0xff]  }
  0xc5   :  { %2536 = vmatpush1.bf16.msra.mxu1 %v7458_v51  ;;  %2500 = vmatprep.subr.bf16.mxu0 %v7469_v55  ;;  %v7547_v51 = vld [vmem:[#allocation2 + $0x4ac] ss:$28 sps:$4 sm:$0xff]  }
  0xc6   :  { %2537 = vmatprep.subr.bf16.mxu1 %v7466_v54  ;;  %v7545_v54 = vld [vmem:[#allocation2 + $0x4a8] ss:$28 sps:$4 sm:$0xff]  }
  0xc7   :  { %v7548_v55 = vld [vmem:[#allocation2 + $0x48] ss:$28 sps:$4 sm:$0xff]  }
  0xc8   :  { %2501 = vmatpush2.bf16.msra.mxu0 %v7467_v57  ;;  %v7556_v57 = vld [vmem:[#allocation2 + $0x14] ss:$28 sps:$4 sm:$0xff]  }
  0xc9   :  { %2538 = vmatpush1.bf16.msra.mxu1 %v7464_v56  ;;  %2502 = vmatprep.subr.bf16.mxu0 %v7475_v59  ;;  %v7553_v56 = vld [vmem:[#allocation2 + $0x474] ss:$28 sps:$4 sm:$0xff]  }
  0xca   :  { %2539 = vmatprep.subr.bf16.mxu1 %v7472_v58  ;;  %v7551_v58 = vld [vmem:[#allocation2 + $0x470] ss:$28 sps:$4 sm:$0xff]  }
  0xcb   :  { %v7554_v59 = vld [vmem:[#allocation2 + $0x10] ss:$28 sps:$4 sm:$0xff]  }
  0xcc   :  { %2503 = vmatpush2.bf16.msra.mxu0 %v7473_v61  ;;  %v7562_v61 = vld [vmem:[#allocation2 + $0x35c] ss:$28 sps:$4 sm:$0xff]  }
  0xcd   :  { %2540 = vmatpush1.bf16.msra.mxu1 %v7470_v60  ;;  %2504 = vmatprep.subr.bf16.mxu0 %v7481_v63  ;;  %v7559_v60 = vld [vmem:[#allocation2 + $0x43c] ss:$28 sps:$4 sm:$0xff]  }
  0xce   :  { %2541 = vmatprep.subr.bf16.mxu1 %v7478_v62  ;;  %v7557_v62 = vld [vmem:[#allocation2 + $0x438] ss:$28 sps:$4 sm:$0xff]  }
  0xcf   :  { %v7560_v63 = vld [vmem:[#allocation2 + $0x358] ss:$28 sps:$4 sm:$0xff]  }
  0xd0   :  { %2505 = vmatpush2.bf16.msra.mxu0 %v7479_v1  ;;  %v7568_v1 = vld [vmem:[#allocation2 + $0x324] ss:$28 sps:$4 sm:$0xff]  }
  0xd1   :  { %2542 = vmatpush2.bf16.msra.mxu1 %v7476_v0  ;;  %2506 = vmatprep.subr.bf16.mxu0 %v7487_v3  ;;  %v7565_v0 = vld [vmem:[#allocation2 + $0x404] ss:$28 sps:$4 sm:$0xff]  }
  0xd2   :  { %2543 = vmatprep.subr.bf16.mxu1 %v7484_v2  ;;  %v7563_v2 = vld [vmem:[#allocation2 + $0x400] ss:$28 sps:$4 sm:$0xff]  }
  0xd3   :  { %v7566_v3 = vld [vmem:[#allocation2 + $0x320] ss:$28 sps:$4 sm:$0xff]  }
  0xd4   :  { %2507 = vmatpush2.bf16.msra.mxu0 %v7485_v5  ;;  %v7574_v5 = vld [vmem:[#allocation2 + $0x2ec] ss:$28 sps:$4 sm:$0xff]  }
  0xd5   :  { %2544 = vmatpush2.bf16.msra.mxu1 %v7482_v4  ;;  %2508 = vmatprep.subr.bf16.mxu0 %v7493_v7  ;;  %v7571_v4 = vld [vmem:[#allocation2 + $0x3cc] ss:$28 sps:$4 sm:$0xff]  }
  0xd6   :  { %2545 = vmatprep.subr.bf16.mxu1 %v7490_v6  ;;  %v7569_v6 = vld [vmem:[#allocation2 + $0x3c8] ss:$28 sps:$4 sm:$0xff]  }
  0xd7   :  { %v7572_v7 = vld [vmem:[#allocation2 + $0x2e8] ss:$28 sps:$4 sm:$0xff]  }
  0xd8   :  { %2509 = vmatpush2.bf16.msra.mxu0 %v7491_v11  ;;  %v7580_v11 = vld [vmem:[#allocation2 + $0x2b4] ss:$28 sps:$4 sm:$0xff]  }
  0xd9   :  { %2546 = vmatpush2.bf16.msra.mxu1 %v7488_v10  ;;  %2510 = vmatprep.subr.bf16.mxu0 %v7499_v13  ;;  %v7577_v10 = vld [vmem:[#allocation2 + $0x394] ss:$28 sps:$4 sm:$0xff]  }
  0xda   :  { %2547 = vmatprep.subr.bf16.mxu1 %v7496_v12  ;;  %v7575_v12 = vld [vmem:[#allocation2 + $0x390] ss:$28 sps:$4 sm:$0xff]  }
  0xdb   :  { %v7578_v13 = vld [vmem:[#allocation2 + $0x2b0] ss:$28 sps:$4 sm:$0xff]  }
  0xdc   :  { %2511 = vmatpush2.bf16.msra.mxu0 %v7497_v15  ;;  %v7586_v15 = vld [vmem:[#allocation2 + $0x27c] ss:$28 sps:$4 sm:$0xff]  }
  0xdd   :  { %2548 = vmatpush2.bf16.msra.mxu1 %v7494_v14  ;;  %2512 = vmatprep.subr.bf16.mxu0 %v7505_v18  ;;  %v7583_v14 = vld [vmem:[#allocation2 + $0x6dc] ss:$28 sps:$4 sm:$0xff]  }
  0xde   :  { %2549 = vmatprep.subr.bf16.mxu1 %v7502_v17  ;;  %v7581_v17 = vld [vmem:[#allocation2 + $0x6d8] ss:$28 sps:$4 sm:$0xff]  }
  0xdf   :  { %v7584_v18 = vld [vmem:[#allocation2 + $0x278] ss:$28 sps:$4 sm:$0xff]  }
  0xe0   :  { %2513 = vmatpush2.bf16.msra.mxu0 %v7503_v22  ;;  %v7592_v22 = vld [vmem:[#allocation2 + $0x244] ss:$28 sps:$4 sm:$0xff]  }
  0xe1   :  { %2550 = vmatpush2.bf16.msra.mxu1 %v7500_v20  ;;  %2514 = vmatprep.subr.bf16.mxu0 %v7511_v24  ;;  %v7589_v20 = vld [vmem:[#allocation2 + $0x6a4] ss:$28 sps:$4 sm:$0xff]  }
  0xe2   :  { %2551 = vmatprep.subr.bf16.mxu1 %v7508_v23  ;;  %v7587_v23 = vld [vmem:[#allocation2 + $0x6a0] ss:$28 sps:$4 sm:$0xff]  }
  0xe3   :  { %v7590_v24 = vld [vmem:[#allocation2 + $0x240] ss:$28 sps:$4 sm:$0xff]  }
  0xe4   :  { %2515 = vmatpush2.bf16.msra.mxu0 %v7509_v26  ;;  %v7595_v26 = vld [vmem:[#allocation2 + $0x66c] ss:$28 sps:$4 sm:$0xff]  }
  0xe5   :  { %2552 = vmatpush2.bf16.msra.mxu1 %v7506_v25  ;;  %2607 = vmatprep.subr.bf16.mxu0 %v7517_v28  ;;  %v476_v25 = vlaneseq  ;;  %v7593_v28 = vld [vmem:[#allocation2 + $0x668] ss:$28 sps:$4 sm:$0xff]  }
  0xe6   :  { %2553 = vmatprep.subr.bf16.mxu1 %v7514_v27  ;;  %v7598_v27 = vld [vmem:[#allocation2 + $0x20c] ss:$28 sps:$4 sm:$0xff]  }
  0xe7   :  { %2517 = vmatmul.mubr.bf16.vlgmr.msra.gmra.mxu0 %v8362_v9 }
  0xe8   :  { %2608 = vmatpush1.bf16.msra.mxu0 %v7515_v30  ;;  %2639 = vmatprep.mubr.bf16.mxu0 %v8345_v49  ;;  %v8397_v30 = vshrl.u32 %v476_v25, 7  ;;  %v7640_v25 = vld [vmem:[#allocation2 + $0x748] ss:$28 sps:$4 sm:$0xff]  }
  0xe9   :  { %2554 = vmatpush2.bf16.msra.mxu1 %v7512_v29  ;;  %2609 = vmatprep.subr.bf16.mxu0 %v7523_v32  ;;  %v7596_v29 = vld [vmem:[#allocation2 + $0x208] ss:$28 sps:$4 sm:$0xff]   ;;  %v7604_v32 = vld [vmem:[#allocation2 + $0x1d4] ss:$28 sps:$4 sm:$0xff]  }
  0xea   :  { %2555 = vmatprep.subr.bf16.mxu1 %v7520_v31  ;;  %v7601_v31 = vld [vmem:[#allocation2 + $0x634] ss:$28 sps:$4 sm:$0xff]  }
  0xec   :  { %2610 = vmatpush1.bf16.msra.mxu0 %v7521_v34  ;;  %v7602_v34 = vld [vmem:[#allocation2 + $0x1d0] ss:$28 sps:$4 sm:$0xff]  }
  0xed   :  { %2556 = vmatpush2.bf16.msra.mxu1 %v7518_v33  ;;  %2611 = vmatprep.subr.bf16.mxu0 %v7526_v35  ;;  %v7599_v33 = vld [vmem:[#allocation2 + $0x630] ss:$28 sps:$4 sm:$0xff]   ;;  %v7607_v35 = vld [vmem:[#allocation2 + $0x5fc] ss:$28 sps:$4 sm:$0xff]  }
  0xee   :  { %2580 = vmatprep.subr.bf16.mxu1 %v7529_v37  ;;  %v474_v37 = vld [vmem:[%s8609_s2] sm:$0x7f] }
  0xf0   :  { %2558 = vmatmul.mubr.bf16.vlgmr.msra.gmra.mxu1 %v8384_v21  ;;  %2612 = vmatpush1.bf16.msra.mxu0 %v7524_v38  ;;  %v478_v38 = vsub.s32 0, %v8397_v30 }
  0xf1   :  { %2581 = vmatpush1.bf16.msra.mxu1 %v7527_v39  ;;  %2613 = vmatprep.subr.bf16.mxu0 %v7532_v40  ;;  %v7610_v39 = vld [vmem:[#allocation2 + $0x89c] ss:$28 sps:$4 sm:$0xff]   ;;  %v482_v40 = vsub.s32 1, %v8397_v30 }
  0xf2   :  { %2598 = vmatprep.mubr.bf16.mxu1 %v8290_v16  ;;  %2648 = vmatprep.subr.bf16.mxu1 %v7535_v41  ;;  %v7605_v41 = vld [vmem:[#allocation2 + $0x5f8] ss:$28 sps:$4 sm:$0xff]  }
  0xf4   :  { %2614 = vmatpush1.bf16.msra.mxu0 %v7530_v42  ;;  %v7608_v42 = vld [vmem:[#allocation2 + $0x898] ss:$28 sps:$4 sm:$0xff]  }
  0xf5   :  { %2615 = vmatprep.subr.bf16.mxu0 %v7538_v43  ;;  %v479_v43 = vrot.slane %v474_v37, %v478_v38 }
  0xf8   :  { %6586 = vmatmul.mubr.msk.bf16.vlgmr.msra.gmra.mxu1 %vm2275_vm0, %v8370_v19  ;;  %2616 = vmatpush1.bf16.msra.mxu0 %v7536_v45  ;;  %v7616_v45 = vld [vmem:[#allocation2 + $0x864] ss:$28 sps:$4 sm:$0xff]  }
  0xf9   :  { %2649 = vmatpush1.bf16.msra.mxu1 %v7533_v44  ;;  %2617 = vmatprep.subr.bf16.mxu0 %v7544_v47  ;;  %v7613_v44 = vld [vmem:[#allocation2 + $0x5c4] ss:$28 sps:$4 sm:$0xff]  }
  0xfa   :  { %2650 = vmatprep.subr.bf16.mxu1 %v7541_v46  ;;  %2680 = vmatprep.mubr.bf16.mxu1 %v8350_v52  ;;  %v483_v46 = vrot.slane %v474_v37, %v482_v40  ;;  %v7657_v37 = vld [vmem:[#allocation2 + $0xa24] ss:$28 sps:$4 sm:$0xff]  }
  0xfc   :  { %2618 = vmatpush1.bf16.msra.mxu0 %v7542_v50  ;;  %v7611_v50 = vld [vmem:[#allocation2 + $0x5c0] ss:$28 sps:$4 sm:$0xff]  }
  0xfd   :  { %2651 = vmatpush1.bf16.msra.mxu1 %v7539_v48  ;;  %2619 = vmatprep.subr.bf16.mxu0 %v7550_v53 }
  0xfe   :  { %2652 = vmatprep.subr.bf16.mxu1 %v7547_v51  ;;  %v7614_v51 = vld [vmem:[#allocation2 + $0x860] ss:$28 sps:$4 sm:$0xff]  }
 0x100   :  { %2620 = vmatpush1.bf16.msra.mxu0 %v7548_v55 }
 0x101   :  { %2653 = vmatpush1.bf16.msra.mxu1 %v7545_v54  ;;  %2621 = vmatprep.subr.bf16.mxu0 %v7556_v57  ;;  %v7619_v54 = vld [vmem:[#allocation2 + $0x58c] ss:$28 sps:$4 sm:$0xff]  }
 0x102   :  { %2654 = vmatprep.subr.bf16.mxu1 %v7553_v56  ;;  %v7622_v57 = vld [vmem:[#allocation2 + $0x82c] ss:$28 sps:$4 sm:$0xff]  }
 0x104   :  { %2622 = vmatpush1.bf16.msra.mxu0 %v7554_v59 }
 0x105   :  { %2655 = vmatpush1.bf16.msra.mxu1 %v7551_v58  ;;  %2623 = vmatprep.subr.bf16.mxu0 %v7562_v61  ;;  %v7617_v61 = vld [vmem:[#allocation2 + $0x588] ss:$28 sps:$4 sm:$0xff]  }
 0x106   :  { %2656 = vmatprep.subr.bf16.mxu1 %v7559_v60 }
 0x108   :  { %2624 = vmatpush2.bf16.msra.mxu0 %v7560_v63  ;;  %v7620_v63 = vld [vmem:[#allocation2 + $0x828] ss:$28 sps:$4 sm:$0xff]  }
 0x109   :  { %2657 = vmatpush1.bf16.msra.mxu1 %v7557_v62  ;;  %2625 = vmatprep.subr.bf16.mxu0 %v7568_v1  ;;  %v7625_v1 = vld [vmem:[#allocation2 + $0x554] ss:$28 sps:$4 sm:$0xff]  }
 0x10a   :  { %2658 = vmatprep.subr.bf16.mxu1 %v7565_v0 }
 0x10c   :  { %2626 = vmatpush2.bf16.msra.mxu0 %v7566_v3 }
 0x10d   :  { %2659 = vmatpush1.bf16.msra.mxu1 %v7563_v2  ;;  %2627 = vmatprep.subr.bf16.mxu0 %v7574_v5  ;;  %v7623_v5 = vld [vmem:[#allocation2 + $0x550] ss:$28 sps:$4 sm:$0xff]  }
 0x10e   :  { %2660 = vmatprep.subr.bf16.mxu1 %v7571_v4  ;;  %v7628_v4 = vld [vmem:[#allocation2 + $0x7f4] ss:$28 sps:$4 sm:$0xff]  }
 0x110   :  { %2628 = vmatpush2.bf16.msra.mxu0 %v7572_v7  ;;  %v7626_v7 = vld [vmem:[#allocation2 + $0x7f0] ss:$28 sps:$4 sm:$0xff]  }
 0x111   :  { %2661 = vmatpush1.bf16.msra.mxu1 %v7569_v6  ;;  %2629 = vmatprep.subr.bf16.mxu0 %v7580_v11 }
 0x112   :  { %2662 = vmatprep.subr.bf16.mxu1 %v7577_v10  ;;  %v7631_v10 = vld [vmem:[#allocation2 + $0x7bc] ss:$28 sps:$4 sm:$0xff]  }
 0x114   :  { %2630 = vmatpush2.bf16.msra.mxu0 %v7578_v13 }
 0x115   :  { %2663 = vmatpush1.bf16.msra.mxu1 %v7575_v12  ;;  %2631 = vmatprep.subr.bf16.mxu0 %v7586_v15  ;;  %v7634_v12 = vld [vmem:[#allocation2 + $0xa94] ss:$28 sps:$4 sm:$0xff]  }
 0x116   :  { %2664 = vmatprep.subr.bf16.mxu1 %v7583_v14  ;;  %v7629_v14 = vld [vmem:[#allocation2 + $0x7b8] ss:$28 sps:$4 sm:$0xff]   ;;  %v7632_v15 = vld [vmem:[#allocation2 + $0xa90] ss:$28 sps:$4 sm:$0xff]  }
 0x118   :  { %2632 = vmatpush2.bf16.msra.mxu0 %v7584_v18  ;;  %v7637_v18 = vld [vmem:[#allocation2 + $0x784] ss:$28 sps:$4 sm:$0xff]  }
 0x119   :  { %2665 = vmatpush2.bf16.msra.mxu1 %v7581_v17  ;;  %2633 = vmatprep.subr.bf16.mxu0 %v7592_v22  ;;  %v7635_v22 = vld [vmem:[#allocation2 + $0x780] ss:$28 sps:$4 sm:$0xff]  }
 0x11a   :  { %2666 = vmatprep.subr.bf16.mxu1 %v7589_v20  ;;  %v7638_v20 = vld [vmem:[#allocation2 + $0x360] ss:$28 sps:$4 sm:$0xff]  }
 0x11c   :  { %2634 = vmatpush2.bf16.msra.mxu0 %v7590_v24  ;;  %v7639_v24 = vld [vmem:[#allocation2 + $0x1a0] ss:$28 sps:$4 sm:$0xff]  }
 0x11d   :  { %2667 = vmatpush2.bf16.msra.mxu1 %v7587_v23  ;;  %2635 = vmatprep.subr.bf16.mxu0 %v7598_v27  ;;  %v7642_v23 = vld [vmem:[#allocation2 + $0x74c] ss:$28 sps:$4 sm:$0xff]   ;;  %v7647_v27 = vld [vmem:[#allocation2 + $0x714] ss:$28 sps:$4 sm:$0xff]  }
 0x11e   :  { %2668 = vmatprep.subr.bf16.mxu1 %v7595_v26  ;;  %v7643_v26 = vld [vmem:[#allocation2 + $0x328] ss:$28 sps:$4 sm:$0xff]  }
 0x120   :  { %2636 = vmatpush2.bf16.msra.mxu0 %v7596_v29  ;;  %v7645_v29 = vld [vmem:[#allocation2 + $0x710] ss:$28 sps:$4 sm:$0xff]  }
 0x121   :  { %2669 = vmatpush2.bf16.msra.mxu1 %v7593_v28  ;;  %2637 = vmatprep.subr.bf16.mxu0 %v7604_v32  ;;  %v7644_v28 = vld [vmem:[#allocation2 + $0x168] ss:$28 sps:$4 sm:$0xff]   ;;  %v7652_v32 = vld [vmem:[#allocation2 + $0xa5c] ss:$28 sps:$4 sm:$0xff]  }
 0x122   :  { %2670 = vmatprep.subr.bf16.mxu1 %v7601_v31  ;;  %v7648_v31 = vld [vmem:[#allocation2 + $0x2f0] ss:$28 sps:$4 sm:$0xff]  }
 0x124   :  { %2638 = vmatpush2.bf16.msra.mxu0 %v7602_v34  ;;  %v7650_v34 = vld [vmem:[#allocation2 + $0xa58] ss:$28 sps:$4 sm:$0xff]  }
 0x125   :  { %2671 = vmatpush2.bf16.msra.mxu1 %v7599_v33  ;;  %2689 = vmatprep.subr.bf16.mxu0 %v7610_v39  ;;  %v7649_v33 = vld [vmem:[#allocation2 + $0x130] ss:$28 sps:$4 sm:$0xff]   ;;  %v7654_v39 = vld [vmem:[#allocation2 + $0xf8] ss:$28 sps:$4 sm:$0xff]  }
 0x126   :  { %2672 = vmatprep.subr.bf16.mxu1 %v7607_v35  ;;  %v7653_v35 = vld [vmem:[#allocation2 + $0x2b8] ss:$28 sps:$4 sm:$0xff]  }
 0x127   :  { %v2313_v47 = vpop.f32.mrf.mxu0  ;;  %2640 = vmatmul.mubr.bf16.vlgmr.msra.gmra.mxu0 %v8360_v8 }
 0x128   :  { %v2354_v48 = vpop.f32.mrf.mxu1  ;;  %v2314_v53 = vadd.f32 %v2313_v47, %v479_v43  ;;  %2690 = vmatpush1.bf16.msra.mxu0 %v7608_v42  ;;  %2721 = vmatprep.mubr.bf16.mxu0 %v8378_v36  ;;  %v7658_v42 = vld [vmem:[#allocation2 + $0x280] ss:$28 sps:$4 sm:$0xff]   ;;  %v7662_v43 = vld [vmem:[#allocation2 + $0x9ec] ss:$28 sps:$4 sm:$0xff]  }
 0x129   :  { %2673 = vmatpush2.bf16.msra.mxu1 %v7605_v41  ;;  %v2315_v55 = vpop.f32.mrf.mxu0  ;;  %2691 = vmatprep.subr.bf16.mxu0 %v7616_v45  ;;  %v7655_v41 = vld [vmem:[#allocation2 + $0xa20] ss:$28 sps:$4 sm:$0xff]   ;;  %v7660_v45 = vld [vmem:[#allocation2 + $0x9e8] ss:$28 sps:$4 sm:$0xff]  }
 0x12a   :  { %2674 = vmatprep.subr.bf16.mxu1 %v7613_v44  ;;  %v2356_v56 = vpop.f32.mrf.mxu1  ;;  %v2316_v58 = vadd.f32 %v2315_v55, %v483_v46  ;;  %v8409_v59 = vadd.f32 %v2354_v48, %v2314_v53  ;;  %v7659_v44 = vld [vmem:[#allocation2 + $0xc0] ss:$28 sps:$4 sm:$0xff]   ;;  %v7663_v46 = vld [vmem:[#allocation2 + $0x248] ss:$28 sps:$4 sm:$0xff]   ;;  %v7665_v48 = vld [vmem:[#allocation2 + $0x9b0] ss:$28 sps:$4 sm:$0xff]  }
 0x12b   :  { %v2317_v60 = vpop.f32.mrf.mxu0  ;;  %v7664_v47 = vld [vmem:[#allocation2 + $0x88] ss:$28 sps:$4 sm:$0xff]   ;;  %v7669_v53 = vld [vmem:[#allocation2 + $0x50] ss:$28 sps:$4 sm:$0xff]   ;;  %v7673_v55 = vld [vmem:[#allocation2 + $0x1d8] ss:$28 sps:$4 sm:$0xff]  }
 0x12c   :  { %v2358_v62 = vpop.f32.mrf.mxu1  ;;  %v8412_v0 = vadd.f32 %v2356_v56, %v2316_v58  ;;  %2692 = vmatpush1.bf16.msra.mxu0 %v7614_v51  ;;  %v7672_v51 = vld [vmem:[#allocation2 + $0x97c] ss:$28 sps:$4 sm:$0xff]   ;;  %v7677_v56 = vld [vmem:[#allocation2 + $0x944] ss:$28 sps:$4 sm:$0xff]  }
 0x12d   :  { %2675 = vmatpush2.bf16.msra.mxu1 %v7611_v50  ;;  %v2318_v2 = vpop.f32.mrf.mxu0  ;;  %2693 = vmatprep.subr.bf16.mxu0 %v7622_v57  ;;  %v7668_v50 = vld [vmem:[#allocation2 + $0x210] ss:$28 sps:$4 sm:$0xff]   ;;  %v7674_v57 = vld [vmem:[#allocation2 + $0x18] ss:$28 sps:$4 sm:$0xff]   ;;  %v7675_v58 = vld [vmem:[#allocation2 + $0x940] ss:$28 sps:$4 sm:$0xff]  }
 0x12e   :  { %2676 = vmatprep.subr.bf16.mxu1 %v7619_v54  ;;  %v2359_v3 = vpop.f32.mrf.mxu1  ;;  %v7670_v54 = vld [vmem:[#allocation2 + $0x978] ss:$28 sps:$4 sm:$0xff]   ;;  %v7678_v60 = vld [vmem:[#allocation2 + $0x6e0] ss:$28 sps:$4 sm:$0xff]  }
 0x12f   :  { %v7679_v62 = vld [vmem:[#allocation2 + $0x520] ss:$28 sps:$4 sm:$0xff]   ;;  %v7687_v2 = vld [vmem:[#allocation2 + $0x8d4] ss:$28 sps:$4 sm:$0xff]   ;;  %v7684_v3 = vld [vmem:[#allocation2 + $0x4e8] ss:$28 sps:$4 sm:$0xff]  }
 0x130   :  { %v8414_v6 = vpop.f32.mrf.mxu1  ;;  %2694 = vmatpush1.bf16.msra.mxu0 %v7620_v63  ;;  %v7680_v63 = vld [vmem:[#allocation2 + $0x908] ss:$28 sps:$4 sm:$0xff]  }
 0x131   :  { %2677 = vmatpush2.bf16.msra.mxu1 %v7617_v61  ;;  %2695 = vmatprep.subr.bf16.mxu0 %v7628_v4  ;;  %v7682_v61 = vld [vmem:[#allocation2 + $0x90c] ss:$28 sps:$4 sm:$0xff]  }
 0x132   :  { %2678 = vmatprep.subr.bf16.mxu1 %v7625_v1  ;;  %v8416_v11 = vpop.f32.mrf.mxu1  ;;  %v7683_v1 = vld [vmem:[#allocation2 + $0x6a8] ss:$28 sps:$4 sm:$0xff]   ;;  %v7685_v4 = vld [vmem:[#allocation2 + $0x8d0] ss:$28 sps:$4 sm:$0xff]  }
 0x134   :  { %v2440_v13 = vpop.f32.mrf.mxu1  ;;  %2696 = vmatpush1.bf16.msra.mxu0 %v7626_v7  ;;  %v7690_v7 = vld [vmem:[#allocation2 + $0xa60] ss:$28 sps:$4 sm:$0xff]  }
 0x135   :  { %2679 = vmatpush2.bf16.msra.mxu1 %v7623_v5  ;;  %2697 = vmatprep.subr.bf16.mxu0 %v7631_v10  ;;  %v7688_v5 = vld [vmem:[#allocation2 + $0x670] ss:$28 sps:$4 sm:$0xff]   ;;  %v7691_v13 = vld [vmem:[#allocation2 + $0x638] ss:$28 sps:$4 sm:$0xff]  }
 0x136   :  { %v2441_v17 = vpop.f32.mrf.mxu1  ;;  %2744 = vmatprep.subr.bf16.mxu1 %v7634_v12  ;;  %v7689_v10 = vld [vmem:[#allocation2 + $0x4b0] ss:$28 sps:$4 sm:$0xff]   ;;  %v7692_v12 = vld [vmem:[#allocation2 + $0x8a0] ss:$28 sps:$4 sm:$0xff]  }
 0x137   :  { %v7696_v17 = vld [vmem:[#allocation2 + $0x868] ss:$28 sps:$4 sm:$0xff]  }
 0x138   :  { %2681 = vmatmul.mubr.bf16.vlgmr.msra.gmra.mxu1 %v8362_v9  ;;  %2698 = vmatpush1.bf16.msra.mxu0 %v7629_v14  ;;  %v7694_v14 = vld [vmem:[#allocation2 + $0xa28] ss:$28 sps:$4 sm:$0xff]  }
 0x139   :  { %2745 = vmatpush1.bf16.msra.mxu1 %v7632_v15  ;;  %2699 = vmatprep.subr.bf16.mxu0 %v7637_v18  ;;  %v7693_v15 = vld [vmem:[#allocation2 + $0x478] ss:$28 sps:$4 sm:$0xff]  }
 0x13a   :  { %2762 = vmatprep.mubr.bf16.mxu1 %v8290_v16  ;;  %6945 = vmatprep.subr.bf16.mxu1 %v7638_v20  ;;  %v7698_v20 = vld [vmem:[#allocation2 + $0x9f0] ss:$28 sps:$4 sm:$0xff]  }
 0x13c   :  { %2700 = vmatpush1.bf16.msra.mxu0 %v7635_v22 }
 0x13d   :  { %2701 = vmatprep.subr.bf16.mxu0 %v7642_v23 }
 0x140   :  { %6587 = vmatmul.mubr.msk.bf16.vlgmr.msra.gmra.mxu1 %vm2275_vm0, %v8370_v19  ;;  %2702 = vmatpush1.bf16.msra.mxu0 %v7640_v25  ;;  %v7697_v25 = vld [vmem:[#allocation2 + $0x440] ss:$28 sps:$4 sm:$0xff]  }
 0x141   :  { %6946 = vmatpush3.bf16.msra.mxu1 %v7639_v24  ;;  %2703 = vmatprep.subr.bf16.mxu0 %v7647_v27 }
 0x142   :  { %6947 = vmatprep.subr.bf16.mxu1 %v7643_v26  ;;  %2803 = vmatprep.mubr.bf16.mxu1 %v8345_v49  ;;  %v7667_v49 = vld [vmem:[#allocation2 + $0x9b4] ss:$28 sps:$4 sm:$0xff]  }
 0x143   :  { %v7700_v26 = vld [vmem:[#allocation2 + $0x830] ss:$28 sps:$4 sm:$0xff]  }
 0x144   :  { %2704 = vmatpush1.bf16.msra.mxu0 %v7645_v29  ;;  %v7699_v29 = vld [vmem:[#allocation2 + $0x5c8] ss:$28 sps:$4 sm:$0xff]  }
 0x145   :  { %6948 = vmatpush3.bf16.msra.mxu1 %v7644_v28  ;;  %2705 = vmatprep.subr.bf16.mxu0 %v7652_v32  ;;  %v7701_v32 = vld [vmem:[#allocation2 + $0x408] ss:$28 sps:$4 sm:$0xff]  }
 0x146   :  { %6949 = vmatprep.subr.bf16.mxu1 %v7648_v31  ;;  %v7702_v31 = vld [vmem:[#allocation2 + $0x9b8] ss:$28 sps:$4 sm:$0xff]  }
 0x148   :  { %2706 = vmatpush2.bf16.msra.mxu0 %v7650_v34  ;;  %v7703_v34 = vld [vmem:[#allocation2 + $0x590] ss:$28 sps:$4 sm:$0xff]  }
 0x149   :  { %6950 = vmatpush3.bf16.msra.mxu1 %v7649_v33  ;;  %2707 = vmatprep.subr.bf16.mxu0 %v7657_v37  ;;  %v7704_v33 = vld [vmem:[#allocation2 + $0x7f8] ss:$28 sps:$4 sm:$0xff]  }
 0x14a   :  { %6951 = vmatprep.subr.bf16.mxu1 %v7653_v35  ;;  %v7708_v35 = vld [vmem:[#allocation2 + $0x7c0] ss:$28 sps:$4 sm:$0xff]  }
 0x14c   :  { %2708 = vmatpush2.bf16.msra.mxu0 %v7655_v41  ;;  %v7710_v41 = vld [vmem:[#allocation2 + $0x948] ss:$28 sps:$4 sm:$0xff]  }
 0x14d   :  { %6952 = vmatpush3.bf16.msra.mxu1 %v7654_v39  ;;  %2709 = vmatprep.subr.bf16.mxu0 %v7662_v43  ;;  %v7707_v39 = vld [vmem:[#allocation2 + $0x558] ss:$28 sps:$4 sm:$0xff]  }
 0x14e   :  { %6953 = vmatprep.subr.bf16.mxu1 %v7658_v42  ;;  %v7709_v43 = vld [vmem:[#allocation2 + $0x398] ss:$28 sps:$4 sm:$0xff]  }
 0x150   :  { %2710 = vmatpush2.bf16.msra.mxu0 %v7660_v45  ;;  %v7712_v45 = vld [vmem:[#allocation2 + $0x910] ss:$28 sps:$4 sm:$0xff]  }
 0x151   :  { %6954 = vmatpush3.bf16.msra.mxu1 %v7659_v44  ;;  %2711 = vmatprep.subr.bf16.mxu0 %v7667_v49  ;;  %v7711_v44 = vld [vmem:[#allocation2 + $0x788] ss:$28 sps:$4 sm:$0xff]   ;;  %v7714_v49 = vld [vmem:[#allocation2 + $0xa98] ss:$28 sps:$4 sm:$0xff]  }
 0x152   :  { %6955 = vmatprep.subr.bf16.mxu1 %v7663_v46  ;;  %v7713_v46 = vld [vmem:[#allocation2 + $0x750] ss:$28 sps:$4 sm:$0xff]  }
 0x154   :  { %2712 = vmatpush2.bf16.msra.mxu0 %v7665_v48  ;;  %v7715_v48 = vld [vmem:[#allocation2 + $0x8d8] ss:$28 sps:$4 sm:$0xff]  }
 0x155   :  { %6956 = vmatpush3.bf16.msra.mxu1 %v7664_v47  ;;  %2713 = vmatprep.subr.bf16.mxu0 %v7672_v51  ;;  %v8291_v47 = vmov 0.0   ;;  %v7719_v51 = vld [vmem:[#allocation2 + $0x718] ss:$28 sps:$4 sm:$0xff]  }
 0x156   :  { %6957 = vmatprep.subr.bf16.mxu1 %v7668_v50  ;;  %v7718_v50 = vld [vmem:[#allocation4 + $0x18c] ss:$28 sps:$4 sm:$0xff]  }
 0x158   :  { %2714 = vmatpush2.bf16.msra.mxu0 %v7670_v54 }
 0x159   :  { %6958 = vmatpush3.bf16.msra.mxu1 %v7669_v53  ;;  %2715 = vmatprep.subr.bf16.mxu0 %v7677_v56  ;;  %v7725_v53 = vld [vmem:[#allocation4 + $0x50c] ss:$28 sps:$4 sm:$0xff]   ;;  %v7722_v56 = vld [vmem:[#allocation4 + $0x154] ss:$28 sps:$4 sm:$0xff]  }
 0x15a   :  { %6959 = vmatprep.subr.bf16.mxu1 %v7673_v55  ;;  %v7716_v55 = vld [vmem:[#allocation4 + $0x188] ss:$28 sps:$4 sm:$0xff]  }
 0x15c   :  { %2716 = vmatpush2.bf16.msra.mxu0 %v7675_v58 }
 0x15d   :  { %6960 = vmatpush3.bf16.msra.mxu1 %v7674_v57  ;;  %2717 = vmatprep.subr.bf16.mxu0 %v7682_v61  ;;  %v7723_v57 = vld [vmem:[#allocation4 + $0x508] ss:$28 sps:$4 sm:$0xff]   ;;  %v7728_v61 = vld [vmem:[#allocation4 + $0x11c] ss:$28 sps:$4 sm:$0xff]  }
 0x15e   :  { %6967 = vmatprep.subr.bf16.mxu1 %v7678_v60  ;;  %v7731_v60 = vld [vmem:[#allocation4 + $0x4d4] ss:$28 sps:$4 sm:$0xff]  }
 0x160   :  { %2804 = vmatmul.mubr.bf16.vlgmr.msra.gmra.mxu1 %v8360_v8  ;;  %2718 = vmatpush2.bf16.msra.mxu0 %v7680_v63  ;;  %v7695_v8 = vld [vmem:[#allocation2 + $0x600] ss:$28 sps:$4 sm:$0xff]   ;;  %v7737_v63 = vld [vmem:[#allocation4 + $0x49c] ss:$28 sps:$4 sm:$0xff]  }
 0x161   :  { %6968 = vmatpush3.bf16.msra.mxu1 %v7679_v62  ;;  %2719 = vmatprep.subr.bf16.mxu0 %v7687_v2  ;;  %v7729_v62 = vld [vmem:[#allocation4 + $0x4d0] ss:$28 sps:$4 sm:$0xff]   ;;  %v7734_v2 = vld [vmem:[#allocation4 + $0xe4] ss:$28 sps:$4 sm:$0xff]  }
 0x162   :  { %6969 = vmatprep.subr.bf16.mxu1 %v7683_v1  ;;  %2843 = vmatprep.mubr.bf16.mxu1 %v8350_v52  ;;  %v7726_v1 = vld [vmem:[#allocation4 + $0x118] ss:$28 sps:$4 sm:$0xff]  }
 0x164   :  { %2720 = vmatpush2.bf16.msra.mxu0 %v7685_v4  ;;  %v7743_v4 = vld [vmem:[#allocation4 + $0x464] ss:$28 sps:$4 sm:$0xff]  }
 0x165   :  { %6970 = vmatpush3.bf16.msra.mxu1 %v7684_v3  ;;  %6989 = vmatprep.subr.bf16.mxu0 %v7690_v7  ;;  %v7735_v3 = vld [vmem:[#allocation4 + $0x498] ss:$28 sps:$4 sm:$0xff]   ;;  %v7749_v7 = vld [vmem:[#allocation4 + $0x42c] ss:$28 sps:$4 sm:$0xff]  }
 0x166   :  { %6971 = vmatprep.subr.bf16.mxu1 %v7688_v5  ;;  %v7741_v5 = vld [vmem:[#allocation4 + $0x460] ss:$28 sps:$4 sm:$0xff]  }
 0x167   :  { %v2395_v18 = vpop.f32.mrf.mxu0  ;;  %2722 = vmatmul.mubr.bf16.vlgmr.msra.gmra.mxu0 %v8384_v21 }
 0x168   :  { %v2396_v22 = vadd.f32 %v2395_v18, %v8409_v59  ;;  %6990 = vmatpush3.bf16.msra.mxu0 %v7692_v12  ;;  %2883 = vmatprep.mubr.bf16.mxu0 %v8378_v36  ;;  %v7746_v12 = vld [vmem:[#allocation4 + $0x74] ss:$28 sps:$4 sm:$0xff]  }
 0x169   :  { %6972 = vmatpush3.bf16.msra.mxu1 %v7689_v10  ;;  %v2397_v23 = vpop.f32.mrf.mxu0  ;;  %6991 = vmatprep.subr.bf16.mxu0 %v7694_v14  ;;  %v7738_v10 = vld [vmem:[#allocation4 + $0xa8] ss:$28 sps:$4 sm:$0xff]   ;;  %v7755_v14 = vld [vmem:[#allocation4 + $0x3f4] ss:$28 sps:$4 sm:$0xff]  }
 0x16a   :  { %6973 = vmatprep.subr.bf16.mxu1 %v7691_v13  ;;  %v8428_v52 = vadd.f32 %v8414_v6, %v2396_v22  ;;  %v2398_v24 = vadd.f32 %v2397_v23, %v8412_v0  ;;  %v7706_v0 = vld [vmem:[#allocation2 + $0x980] ss:$28 sps:$4 sm:$0xff]   ;;  %v7753_v18 = vld [vmem:[#allocation4 + $0x3f0] ss:$28 sps:$4 sm:$0xff]   ;;  %v7759_v23 = vld [vmem:[#allocation4 + $0x3b8] ss:$28 sps:$4 sm:$0xff]  }
 0x16b   :  { %v2399_v27 = vpop.f32.mrf.mxu0  ;;  %v7747_v13 = vld [vmem:[#allocation4 + $0x428] ss:$28 sps:$4 sm:$0xff]  }
 0x16c   :  { %v2439_v28 = vadd.f32 %v8416_v11, %v2398_v24  ;;  %6992 = vmatpush3.bf16.msra.mxu0 %v7696_v17  ;;  %v7705_v11 = vld [vmem:[#allocation2 + $0x3d0] ss:$28 sps:$4 sm:$0xff]   ;;  %v7758_v22 = vld [vmem:[#allocation4 + $0x4] ss:$28 sps:$4 sm:$0xff]  }
 0x16d   :  { %6974 = vmatpush3.bf16.msra.mxu1 %v7693_v15  ;;  %v2400_v59 = vpop.f32.mrf.mxu0  ;;  %6993 = vmatprep.subr.bf16.mxu0 %v7698_v20  ;;  %v7744_v15 = vld [vmem:[#allocation4 + $0x70] ss:$28 sps:$4 sm:$0xff]   ;;  %v7752_v17 = vld [vmem:[#allocation4 + $0x3c] ss:$28 sps:$4 sm:$0xff]   ;;  %v7767_v24 = vld [vmem:[#allocation4 + $0x384] ss:$28 sps:$4 sm:$0xff]  }
 0x16e   :  { %6975 = vmatprep.subr.bf16.mxu1 %v7695_v8  ;;  %v2932_v54 = vmax.f32 %v2439_v28, 0.0  ;;  %v7761_v8 = vld [vmem:[#allocation4 + $0x3bc] ss:$28 sps:$4 sm:$0xff]   ;;  %v7773_v28 = vld [vmem:[#allocation4 + $0x6cc] ss:$28 sps:$4 sm:$0xff]  }
 0x16f   :  { %v7750_v20 = vld [vmem:[#allocation4 + $0x38] ss:$28 sps:$4 sm:$0xff]   ;;  %v7765_v27 = vld [vmem:[#allocation4 + $0x380] ss:$28 sps:$4 sm:$0xff]   ;;  %v7762_v59 = vld [vmem:[#allocation4 + $0x348] ss:$28 sps:$4 sm:$0xff]  }
 0x170   :  { %v8433_v6 = vpop.f32.mrf.mxu1  ;;  %6994 = vmatpush3.bf16.msra.mxu0 %v7700_v26  ;;  %v8441_v58 = vpack.c.bf16 %v2932_v54, %v2932_v54  ;;  %v7764_v26 = vld [vmem:[#allocation4 + $0x34c] ss:$28 sps:$4 sm:$0xff]  }
 0x171   :  { %6976 = vmatpush3.bf16.msra.mxu1 %v7697_v25  ;;  %6995 = vmatprep.subr.bf16.mxu0 %v7702_v31  ;;  %v7756_v25 = vld [vmem:[#allocation4] ss:$28 sps:$4 sm:$0xff]   ;;  %v7771_v31 = vld [vmem:[#allocation4 + $0x6c8] ss:$28 sps:$4 sm:$0xff]  }
 0x172   :  { %6977 = vmatprep.subr.bf16.mxu1 %v7699_v29  ;;  %v8435_v36 = vpop.f32.mrf.mxu1  ;;  %v7770_v29 = vld [vmem:[#allocation4 + $0x314] ss:$28 sps:$4 sm:$0xff]   ;;  %v7788_v54 = vld [vmem:[#allocation4 + $0x26c] ss:$28 sps:$4 sm:$0xff]  }
 0x174   :  { %v2481_v37 = vpop.f32.mrf.mxu1  ;;  %6996 = vmatpush3.bf16.msra.mxu0 %v7704_v33  ;;  %v7768_v33 = vld [vmem:[#allocation4 + $0x310] ss:$28 sps:$4 sm:$0xff]  }
 0x175   :  { %6978 = vmatpush3.bf16.msra.mxu1 %v7701_v32  ;;  %6997 = vmatprep.subr.bf16.mxu0 %v7706_v0  ;;  %v7779_v32 = vld [vmem:[#allocation4 + $0x694] ss:$28 sps:$4 sm:$0xff]   ;;  %v7776_v0 = vld [vmem:[#allocation4 + $0x2dc] ss:$28 sps:$4 sm:$0xff]   ;;  %v490_v37 = vsub.s32 3, %v8397_v30 }
 0x176   :  { %6979 = vmatprep.subr.bf16.mxu1 %v7703_v34  ;;  %v2482_v42 = vpop.f32.mrf.mxu1 }
 0x177   :  { %v7774_v42 = vld [vmem:[#allocation4 + $0x2d8] ss:$28 sps:$4 sm:$0xff]  }
 0x178   :  { %6998 = vmatpush3.bf16.msra.mxu0 %v7708_v35  ;;  %v486_v35 = vsub.s32 2, %v8397_v30 }
 0x179   :  { %6980 = vmatpush3.bf16.msra.mxu1 %v7705_v11  ;;  %6999 = vmatprep.subr.bf16.mxu0 %v7710_v41  ;;  %v7777_v11 = vld [vmem:[#allocation4 + $0x690] ss:$28 sps:$4 sm:$0xff]  }
 0x17a   :  { %6981 = vmatprep.subr.bf16.mxu1 %v7707_v39  ;;  %v7785_v39 = vld [vmem:[#allocation4 + $0x65c] ss:$28 sps:$4 sm:$0xff]  }
 0x17c   :  { %7000 = vmatpush3.bf16.msra.mxu0 %v7711_v44  ;;  %v7782_v44 = vld [vmem:[#allocation4 + $0x2a4] ss:$28 sps:$4 sm:$0xff]  }
 0x17d   :  { %6982 = vmatpush3.bf16.msra.mxu1 %v7709_v43  ;;  %7001 = vmatprep.subr.bf16.mxu0 %v7712_v45  ;;  %v7783_v45 = vld [vmem:[#allocation4 + $0x658] ss:$28 sps:$4 sm:$0xff]  }
 0x17e   :  { %7192 = vmatprep.subr.bf16.mxu1 %v8291_v47 }
 0x180   :  { %2844 = vmatmul.mubr.bf16.vlgmr.msra.gmra.mxu1 %v8362_v9  ;;  %7002 = vmatpush3.bf16.msra.mxu0 %v7713_v46  ;;  %v7720_v9 = vld [vmem:[#allocation4 + $0x150] ss:$28 sps:$4 sm:$0xff]  }
 0x181   :  { %7193 = vmatpush3.bf16.msra.mxu1 %v7714_v49  ;;  %7003 = vmatprep.subr.bf16.mxu0 %v7715_v48  ;;  %v7791_v49 = vld [vmem:[#allocation4 + $0x624] ss:$28 sps:$4 sm:$0xff]  }
 0x182   :  { %7194 = vmatprep.mubr.msk.bf16.mxu1 %vm8292_vm1, %v8291_v47  ;;  %5186 = vmatprep.subr.bf16.mxu1 %v7718_v50  ;;  %v7780_v48 = vld [vmem:[#allocation4 + $0x2a0] ss:$28 sps:$4 sm:$0xff]  }
 0x184   :  { %7004 = vmatpush3.bf16.msra.mxu0 %v7719_v51  ;;  %v8452_v51 = vld [vmem:[%s8609_s2] sm:$0x7f] }
 0x185   :  { %5227 = vmatprep.subr.bf16.mxu0 %v7725_v53  ;;  %v491_v53 = vrot.slane %v8452_v51, %v490_v37 }
 0x187   :  { %2884 = vmatmul.mubr.bf16.vlgmr.msra.gmra.mxu0 %v8384_v21  ;;  %v7740_v21 = vld [vmem:[#allocation4 + $0xac] ss:$28 sps:$4 sm:$0xff]  }
 0x188   :  { %7195 = vmatmul.mubr.msk.bf16.vlgmr.msra.gmra.mxu1 %vm2275_vm0, %v8370_v19  ;;  %5228 = vmatpush1.bf16.msra.mxu0 %v7723_v57  ;;  %v7732_v19 = vld [vmem:[#allocation4 + $0xe0] ss:$28 sps:$4 sm:$0xff]   ;;  %v7786_v57 = vld [vmem:[#allocation4 + $0x268] ss:$28 sps:$4 sm:$0xff]  }
 0x189   :  { %5187 = vmatpush1.bf16.msra.mxu1 %v7716_v55  ;;  %5218 = vmatprep.mubr.bf16.mxu1 %v8441_v58  ;;  %v7789_v55 = vld [vmem:[#allocation4 + $0x620] ss:$28 sps:$4 sm:$0xff]  }
 0x18a   :  { %5188 = vmatprep.subr.bf16.mxu1 %v7722_v56  ;;  %5229 = vmatprep.subr.bf16.mxu0 %v7731_v60  ;;  %v7797_v60 = vld [vmem:[#allocation4 + $0x5ec] ss:$28 sps:$4 sm:$0xff]  }
 0x18c   :  { %5230 = vmatpush1.bf16.msra.mxu0 %v7729_v62  ;;  %v7794_v62 = vld [vmem:[#allocation4 + $0x234] ss:$28 sps:$4 sm:$0xff]  }
 0x18d   :  { %5189 = vmatpush1.bf16.msra.mxu1 %v7720_v9  ;;  %5231 = vmatprep.subr.bf16.mxu0 %v7737_v63  ;;  %v487_v9 = vrot.slane %v8452_v51, %v486_v35  ;;  %v2480_v63 = vadd.f32 %v8435_v36, %v491_v53  ;;  %v7830_v53 = vld [vmem:[#allocation4 + $0x774] ss:$28 sps:$4 sm:$0xff]  }
 0x18e   :  { %5190 = vmatprep.subr.bf16.mxu1 %v7728_v61 }
 0x190   :  { %5232 = vmatpush1.bf16.msra.mxu0 %v7735_v3 }
 0x191   :  { %5191 = vmatpush1.bf16.msra.mxu1 %v7726_v1  ;;  %5233 = vmatprep.subr.bf16.mxu0 %v7743_v4  ;;  %v7795_v1 = vld [vmem:[#allocation4 + $0x5e8] ss:$28 sps:$4 sm:$0xff]  }
 0x192   :  { %5192 = vmatprep.subr.bf16.mxu1 %v7734_v2  ;;  %v7803_v2 = vld [vmem:[#allocation4 + $0x5b4] ss:$28 sps:$4 sm:$0xff]  }
 0x194   :  { %5234 = vmatpush1.bf16.msra.mxu0 %v7741_v5 }
 0x195   :  { %5193 = vmatpush1.bf16.msra.mxu1 %v7732_v19  ;;  %5235 = vmatprep.subr.bf16.mxu0 %v7749_v7  ;;  %v7792_v19 = vld [vmem:[#allocation4 + $0x230] ss:$28 sps:$4 sm:$0xff]  }
 0x196   :  { %5194 = vmatprep.subr.bf16.mxu1 %v7740_v21  ;;  %v2478_v21 = vadd.f32 %v8433_v6, %v487_v9  ;;  %v7812_v6 = vld [vmem:[#allocation4 + $0x544] ss:$28 sps:$4 sm:$0xff]   ;;  %v7839_v9 = vld [vmem:[#allocation4 + $0xa4c] ss:$28 sps:$4 sm:$0xff]  }
 0x198   :  { %5236 = vmatpush1.bf16.msra.mxu0 %v7747_v13 }
 0x199   :  { %5195 = vmatpush1.bf16.msra.mxu1 %v7738_v10  ;;  %5237 = vmatprep.subr.bf16.mxu0 %v7755_v14  ;;  %v7800_v10 = vld [vmem:[#allocation4 + $0x1fc] ss:$28 sps:$4 sm:$0xff]  }
 0x19a   :  { %5196 = vmatprep.subr.bf16.mxu1 %v7746_v12  ;;  %v7801_v12 = vld [vmem:[#allocation4 + $0x5b0] ss:$28 sps:$4 sm:$0xff]  }
 0x19c   :  { %5238 = vmatpush1.bf16.msra.mxu0 %v7753_v18 }
 0x19d   :  { %5197 = vmatpush1.bf16.msra.mxu1 %v7744_v15  ;;  %5239 = vmatprep.subr.bf16.mxu0 %v7761_v8  ;;  %v7798_v15 = vld [vmem:[#allocation4 + $0x1f8] ss:$28 sps:$4 sm:$0xff]  }
 0x19e   :  { %5198 = vmatprep.subr.bf16.mxu1 %v7752_v17  ;;  %v7809_v17 = vld [vmem:[#allocation4 + $0x57c] ss:$28 sps:$4 sm:$0xff]  }
 0x1a0   :  { %5240 = vmatpush1.bf16.msra.mxu0 %v7759_v23 }
 0x1a1   :  { %5199 = vmatpush1.bf16.msra.mxu1 %v7750_v20  ;;  %5241 = vmatprep.subr.bf16.mxu0 %v7767_v24  ;;  %v7806_v20 = vld [vmem:[#allocation4 + $0x1c4] ss:$28 sps:$4 sm:$0xff]  }
 0x1a2   :  { %5200 = vmatprep.subr.bf16.mxu1 %v7758_v22  ;;  %v7807_v22 = vld [vmem:[#allocation4 + $0x578] ss:$28 sps:$4 sm:$0xff]  }
 0x1a4   :  { %5242 = vmatpush1.bf16.msra.mxu0 %v7765_v27  ;;  %v7804_v27 = vld [vmem:[#allocation4 + $0x1c0] ss:$28 sps:$4 sm:$0xff]  }
 0x1a5   :  { %5201 = vmatpush1.bf16.msra.mxu1 %v7756_v25  ;;  %5243 = vmatprep.subr.bf16.mxu0 %v7773_v28  ;;  %v7810_v28 = vld [vmem:[#allocation4 + $0x540] ss:$28 sps:$4 sm:$0xff]  }
 0x1a6   :  { %5202 = vmatprep.subr.bf16.mxu1 %v7764_v26 }
 0x1a7   :  { %v2518_v34 = vpop.f32.mrf.mxu0 }
 0x1a8   :  { %5244 = vmatpush2.bf16.msra.mxu0 %v7771_v31  ;;  %v2519_v13 = vadd.f32 %v2518_v34, %v2478_v21  ;;  %v7818_v34 = vld [vmem:[#allocation4 + $0x854] ss:$28 sps:$4 sm:$0xff]  }
 0x1a9   :  { %5203 = vmatpush2.bf16.msra.mxu1 %v7762_v59  ;;  %v2520_v41 = vpop.f32.mrf.mxu0  ;;  %5245 = vmatprep.subr.bf16.mxu0 %v7779_v32  ;;  %v7815_v59 = vld [vmem:[#allocation4 + $0x88c] ss:$28 sps:$4 sm:$0xff]  }
 0x1aa   :  { %5204 = vmatprep.subr.bf16.mxu1 %v7770_v29  ;;  %v2521_v4 = vadd.f32 %v2520_v41, %v2480_v63  ;;  %v2931_v29 = vmax.f32 %v8428_v52, 0.0  ;;  %v7813_v32 = vld [vmem:[#allocation4 + $0x888] ss:$28 sps:$4 sm:$0xff]   ;;  %v7821_v52 = vld [vmem:[#allocation4 + $0x81c] ss:$28 sps:$4 sm:$0xff]  }
 0x1ab   :  { %v2522_v43 = vpop.f32.mrf.mxu0  ;;  %v7824_v41 = vld [vmem:[#allocation4 + $0x7e4] ss:$28 sps:$4 sm:$0xff]  }
 0x1ac   :  { %5246 = vmatpush2.bf16.msra.mxu0 %v7777_v11  ;;  %v7816_v11 = vld [vmem:[#allocation4 + $0x850] ss:$28 sps:$4 sm:$0xff]   ;;  %v7882_v43 = vld [vmem:[#allocation4 + $0xab8] ss:$28 sps:$4 sm:$0xff]  }
 0x1ad   :  { %5205 = vmatpush2.bf16.msra.mxu1 %v7768_v33  ;;  %v2523_v46 = vpop.f32.mrf.mxu0  ;;  %5247 = vmatprep.subr.bf16.mxu0 %v7785_v39  ;;  %v8466_v33 = vpack.c.bf16 %v2931_v29, %v2931_v29  ;;  %v7819_v39 = vld [vmem:[#allocation4 + $0x818] ss:$28 sps:$4 sm:$0xff]   ;;  %v498_v29 = vsub.s32 5, %v8397_v30 }
 0x1ae   :  { %5206 = vmatprep.subr.bf16.mxu1 %v7776_v0  ;;  %v7890_v46 = vld [vmem:[#allocation4 + $0xa84] ss:$28 sps:$4 sm:$0xff]  }
 0x1b0   :  { %v2559_v50 = vpop.f32.mrf.mxu1  ;;  %5248 = vmatpush2.bf16.msra.mxu0 %v7783_v45  ;;  %v7827_v45 = vld [vmem:[#allocation4 + $0x7ac] ss:$28 sps:$4 sm:$0xff]  }
 0x1b1   :  { %5207 = vmatpush2.bf16.msra.mxu1 %v7774_v42  ;;  %5249 = vmatprep.subr.bf16.mxu0 %v7791_v49  ;;  %v2560_v18 = vadd.f32 %v2559_v50, %v2519_v13  ;;  %v7884_v42 = vld [vmem:[#allocation4 + $0xabc] ss:$28 sps:$4 sm:$0xff]   ;;  %v7825_v50 = vld [vmem:[#allocation4 + $0x7a8] ss:$28 sps:$4 sm:$0xff]   ;;  %v7854_v13 = vld [vmem:[#allocation4 + $0x934] ss:$28 sps:$4 sm:$0xff]  }
 0x1b2   :  { %5208 = vmatprep.subr.bf16.mxu1 %v7782_v44  ;;  %v2561_v56 = vpop.f32.mrf.mxu1  ;;  %v7822_v44 = vld [vmem:[#allocation4 + $0x7e0] ss:$28 sps:$4 sm:$0xff]  }
 0x1b3   :  { %v2562_v7 = vadd.f32 %v2561_v56, %v2521_v4  ;;  %v7888_v49 = vld [vmem:[#allocation4 + $0xa80] ss:$28 sps:$4 sm:$0xff]   ;;  %v7831_v56 = vld [vmem:[#allocation4 + $0x738] ss:$28 sps:$4 sm:$0xff]  }
 0x1b4   :  { %v2563_v61 = vpop.f32.mrf.mxu1  ;;  %5250 = vmatpush2.bf16.msra.mxu0 %v7789_v55  ;;  %v7833_v55 = vld [vmem:[#allocation4 + $0x73c] ss:$28 sps:$4 sm:$0xff]  }
 0x1b5   :  { %5209 = vmatpush2.bf16.msra.mxu1 %v7780_v48  ;;  %5251 = vmatprep.subr.bf16.mxu0 %v7797_v60  ;;  %v7896_v48 = vld [vmem:[#allocation4 + $0x194] ss:$28 sps:$4 sm:$0xff]   ;;  %v7834_v60 = vld [vmem:[#allocation4 + $0x700] ss:$28 sps:$4 sm:$0xff]   ;;  %v7837_v61 = vld [vmem:[#allocation4 + $0xa48] ss:$28 sps:$4 sm:$0xff]  }
 0x1b6   :  { %5210 = vmatprep.subr.bf16.mxu1 %v7788_v54  ;;  %v2564_v3 = vpop.f32.mrf.mxu1  ;;  %v7828_v54 = vld [vmem:[#allocation4 + $0x770] ss:$28 sps:$4 sm:$0xff]  }
 0x1b7   :  { %v7845_v3 = vld [vmem:[#allocation4 + $0x9dc] ss:$28 sps:$4 sm:$0xff]  }
 0x1b8   :  { %v2600_v5 = vpop.f32.mrf.mxu1  ;;  %5252 = vmatpush2.bf16.msra.mxu0 %v7795_v1  ;;  %v7840_v1 = vld [vmem:[#allocation4 + $0xa10] ss:$28 sps:$4 sm:$0xff]  }
 0x1b9   :  { %5211 = vmatpush2.bf16.msra.mxu1 %v7786_v57  ;;  %5253 = vmatprep.subr.bf16.mxu0 %v7803_v2  ;;  %v2601_v24 = vadd.f32 %v2600_v5, %v2560_v18  ;;  %v7836_v57 = vld [vmem:[#allocation4 + $0x704] ss:$28 sps:$4 sm:$0xff]  }
 0x1ba   :  { %5212 = vmatprep.subr.bf16.mxu1 %v7794_v62  ;;  %v2602_v14 = vpop.f32.mrf.mxu1  ;;  %v7842_v62 = vld [vmem:[#allocation4 + $0xa14] ss:$28 sps:$4 sm:$0xff]   ;;  %v7848_v5 = vld [vmem:[#allocation4 + $0x9a4] ss:$28 sps:$4 sm:$0xff]  }
 0x1bb   :  { %v2603_v36 = vadd.f32 %v2602_v14, %v2562_v7  ;;  %v2933_v31 = vmax.f32 %v2601_v24, 0.0  ;;  %v7846_v7 = vld [vmem:[#allocation4 + $0x9a0] ss:$28 sps:$4 sm:$0xff]  }
 0x1bc   :  { %v2604_v8 = vpop.f32.mrf.mxu1  ;;  %5254 = vmatpush2.bf16.msra.mxu0 %v7801_v12  ;;  %v7849_v12 = vld [vmem:[#allocation4 + $0x968] ss:$28 sps:$4 sm:$0xff]  }
 0x1bd   :  { %v2934_v23 = vmax.f32 %v2603_v36, 0.0  ;;  %5213 = vmatpush2.bf16.msra.mxu1 %v7792_v19  ;;  %5255 = vmatprep.subr.bf16.mxu0 %v7809_v17  ;;  %v8468_v0 = vpack.c.bf16 %v2933_v31, %v2933_v31  ;;  %v7843_v19 = vld [vmem:[#allocation4 + $0x9d8] ss:$28 sps:$4 sm:$0xff]   ;;  %v7852_v36 = vld [vmem:[#allocation4 + $0x930] ss:$28 sps:$4 sm:$0xff]  }
 0x1be   :  { %5214 = vmatprep.subr.bf16.mxu1 %v7800_v10  ;;  %v2605_v25 = vpop.f32.mrf.mxu1  ;;  %v7851_v10 = vld [vmem:[#allocation4 + $0x96c] ss:$28 sps:$4 sm:$0xff]   ;;  %v7857_v17 = vld [vmem:[#allocation4 + $0x8fc] ss:$28 sps:$4 sm:$0xff]  }
 0x1bf   :  { %v8462_v26 = vpack.c.bf16 %v2934_v23, %v2934_v23  ;;  %v7855_v8 = vld [vmem:[#allocation4 + $0x8f8] ss:$28 sps:$4 sm:$0xff]  }
 0x1c0   :  { %5256 = vmatpush2.bf16.msra.mxu0 %v7807_v22  ;;  %v7860_v22 = vld [vmem:[#allocation4 + $0x8c4] ss:$28 sps:$4 sm:$0xff]   ;;  %v7863_v25 = vld [vmem:[#allocation4 + $0x514] ss:$28 sps:$4 sm:$0xff]  }
 0x1c1   :  { %5215 = vmatpush2.bf16.msra.mxu1 %v7798_v15  ;;  %5259 = vmatprep.mubr.bf16.mxu0 %v8462_v26 }
 0x1c2   :  { %5216 = vmatprep.subr.bf16.mxu1 %v7806_v20  ;;  %5257 = vmatprep.subr.bf16.mxu0 %v7812_v6  ;;  %v7858_v6 = vld [vmem:[#allocation4 + $0x8c0] ss:$28 sps:$4 sm:$0xff]  }
 0x1c4   :  { %5258 = vmatpush2.bf16.msra.mxu0 %v7810_v28 }
 0x1c5   :  { %5217 = vmatpush2.bf16.msra.mxu1 %v7804_v27  ;;  %5321 = vmatprep.subr.bf16.mxu0 %v7884_v42 }
 0x1c6   :  { %5268 = vmatprep.subr.bf16.mxu1 %v7815_v59  ;;  %v494_v59 = vsub.s32 4, %v8397_v30 }
 0x1c7   :  { %5260 = vmatmul.mubr.bf16.vlgmr.msra.gmra.mxu0 %v8468_v0 }
 0x1c8   :  { %5219 = vmatmul.mubr.bf16.vlgmr.msra.gmra.mxu1 %v8466_v33  ;;  %5341 = vmatprep.mubr.bf16.mxu0 %v8290_v16 }
 0x1c9   :  { %5269 = vmatpush1.bf16.msra.mxu1 %v7813_v32  ;;  %5322 = vmatpush1.bf16.msra.mxu0 %v7882_v43  ;;  %v495_v32 = vrot.slane %v8452_v51, %v494_v59 }
 0x1ca   :  { %5270 = vmatprep.subr.bf16.mxu1 %v7818_v34  ;;  %5323 = vmatprep.subr.bf16.mxu0 %v7890_v46 }
 0x1cd   :  { %5271 = vmatpush1.bf16.msra.mxu1 %v7816_v11  ;;  %5324 = vmatpush1.bf16.msra.mxu0 %v7888_v49  ;;  %v499_v11 = vrot.slane %v8452_v51, %v498_v29 }
 0x1ce   :  { %5272 = vmatprep.subr.bf16.mxu1 %v7821_v52  ;;  %5350 = vmatprep.subr.bf16.mxu0 %v7896_v48 }
 0x1d1   :  { %5273 = vmatpush1.bf16.msra.mxu1 %v7819_v39 }
 0x1d2   :  { %5274 = vmatprep.subr.bf16.mxu1 %v7824_v41 }
 0x1d5   :  { %5275 = vmatpush1.bf16.msra.mxu1 %v7822_v44 }
 0x1d6   :  { %5276 = vmatprep.subr.bf16.mxu1 %v7827_v45 }
 0x1d9   :  { %5277 = vmatpush1.bf16.msra.mxu1 %v7825_v50 }
 0x1da   :  { %5278 = vmatprep.subr.bf16.mxu1 %v7830_v53 }
 0x1dd   :  { %5279 = vmatpush1.bf16.msra.mxu1 %v7828_v54 }
 0x1de   :  { %5280 = vmatprep.subr.bf16.mxu1 %v7833_v55 }
 0x1e1   :  { %5281 = vmatpush1.bf16.msra.mxu1 %v7831_v56 }
 0x1e2   :  { %5282 = vmatprep.subr.bf16.mxu1 %v7836_v57 }
 0x1e5   :  { %5283 = vmatpush1.bf16.msra.mxu1 %v7834_v60 }
 0x1e6   :  { %5284 = vmatprep.subr.bf16.mxu1 %v7839_v9  ;;  %v7861_v9 = vld [vmem:[#allocation4 + $0x510] ss:$28 sps:$4 sm:$0xff]  }
 0x1e7   :  { %v2641_v63 = vpop.f32.mrf.mxu0 }
 0x1e8   :  { %v2642_v39 = vadd.f32 %v2641_v63, %v495_v32  ;;  %v7864_v63 = vld [vmem:[#allocation4 + $0x4d8] ss:$28 sps:$4 sm:$0xff]  }
 0x1e9   :  { %5285 = vmatpush2.bf16.msra.mxu1 %v7837_v61  ;;  %v2643_v2 = vpop.f32.mrf.mxu0 }
 0x1ea   :  { %5286 = vmatprep.subr.bf16.mxu1 %v7842_v62  ;;  %v2644_v42 = vadd.f32 %v2643_v2, %v499_v11  ;;  %v7866_v62 = vld [vmem:[#allocation4 + $0x4dc] ss:$28 sps:$4 sm:$0xff]  }
 0x1eb   :  { %v2645_v4 = vpop.f32.mrf.mxu0  ;;  %v7867_v2 = vld [vmem:[#allocation4 + $0x4a0] ss:$28 sps:$4 sm:$0xff]  }
 0x1ec   :  { %v7870_v4 = vld [vmem:[#allocation4 + $0x468] ss:$28 sps:$4 sm:$0xff]  }
 0x1ed   :  { %5287 = vmatpush2.bf16.msra.mxu1 %v7840_v1  ;;  %v2646_v21 = vpop.f32.mrf.mxu0  ;;  %v7869_v1 = vld [vmem:[#allocation4 + $0x4a4] ss:$28 sps:$4 sm:$0xff]  }
 0x1ee   :  { %5288 = vmatprep.subr.bf16.mxu1 %v7845_v3  ;;  %v7872_v3 = vld [vmem:[#allocation4 + $0x46c] ss:$28 sps:$4 sm:$0xff]  }
 0x1f1   :  { %5289 = vmatpush2.bf16.msra.mxu1 %v7843_v19  ;;  %v7875_v19 = vld [vmem:[#allocation4 + $0x434] ss:$28 sps:$4 sm:$0xff]  }
 0x1f2   :  { %5290 = vmatprep.subr.bf16.mxu1 %v7848_v5  ;;  %v502_v5 = vsub.s32 6, %v8397_v30 }
 0x1f5   :  { %5291 = vmatpush2.bf16.msra.mxu1 %v7846_v7  ;;  %v7873_v7 = vld [vmem:[#allocation4 + $0x430] ss:$28 sps:$4 sm:$0xff]  }
 0x1f6   :  { %5292 = vmatprep.subr.bf16.mxu1 %v7851_v10 }
 0x1f8   :  { %v2682_v14 = vpop.f32.mrf.mxu1 }
 0x1f9   :  { %5293 = vmatpush2.bf16.msra.mxu1 %v7849_v12  ;;  %v2683_v43 = vadd.f32 %v2682_v14, %v2642_v39  ;;  %v7878_v12 = vld [vmem:[#allocation4 + $0x3fc] ss:$28 sps:$4 sm:$0xff]   ;;  %v503_v14 = vrot.slane %v8452_v51, %v502_v5 }
 0x1fa   :  { %v2684_v15 = vpop.f32.mrf.mxu1  ;;  %5294 = vmatprep.subr.bf16.mxu1 %v7854_v13 }
 0x1fb   :  { %v2685_v45 = vadd.f32 %v2684_v15, %v2644_v42  ;;  %v7876_v15 = vld [vmem:[#allocation4 + $0x3f8] ss:$28 sps:$4 sm:$0xff]  }
 0x1fc   :  { %v2686_v18 = vpop.f32.mrf.mxu1 }
 0x1fd   :  { %5295 = vmatpush2.bf16.msra.mxu1 %v7852_v36  ;;  %v7881_v18 = vld [vmem:[#allocation4 + $0x3c4] ss:$28 sps:$4 sm:$0xff]  }
 0x1fe   :  { %v2687_v20 = vpop.f32.mrf.mxu1  ;;  %5296 = vmatprep.subr.bf16.mxu1 %v7857_v17 }
 0x200   :  { %v2764_v23 = vpop.f32.mrf.mxu1 }
 0x201   :  { %5297 = vmatpush2.bf16.msra.mxu1 %v7855_v8 }
 0x202   :  { %v2766_v24 = vpop.f32.mrf.mxu1  ;;  %5298 = vmatprep.subr.bf16.mxu1 %v7860_v22 }
 0x204   :  { %v2768_v27 = vpop.f32.mrf.mxu1 }
 0x205   :  { %5299 = vmatpush2.bf16.msra.mxu1 %v7858_v6  ;;  %v7879_v6 = vld [vmem:[#allocation4 + $0x3c0] ss:$28 sps:$4 sm:$0xff]   ;;  %v7887_v27 = vld [vmem:[#allocation4 + $0x38c] ss:$28 sps:$4 sm:$0xff]  }
 0x206   :  { %v2769_v28 = vpop.f32.mrf.mxu1  ;;  %5391 = vmatprep.subr.bf16.mxu1 %v7863_v25 }
 0x220   :  { %v6961_v31 = vpop.f32.mrf.mxu1 }
 0x222   :  { %v6962_v34 = vpop.f32.mrf.mxu1 }
 0x223   :  { %v6963_v36 = vadd.f32 %v6962_v34, %v6961_v31  ;;  %v7885_v34 = vld [vmem:[#allocation4 + $0x388] ss:$28 sps:$4 sm:$0xff]  }
 0x224   :  { %v6964_v52 = vpop.f32.mrf.mxu1 }
 0x226   :  { %v6965_v41 = vpop.f32.mrf.mxu1 }
 0x227   :  { %v2723_v44 = vpop.f32.mrf.mxu0  ;;  %v7893_v41 = vld [vmem:[#allocation4 + $0x6d4] ss:$28 sps:$4 sm:$0xff]  }
 0x228   :  { %v2724_v46 = vadd.f32 %v2723_v44, %v2683_v43  ;;  %v7891_v44 = vld [vmem:[#allocation4 + $0x6d0] ss:$28 sps:$4 sm:$0xff]  }
 0x229   :  { %v2725_v49 = vpop.f32.mrf.mxu0 }
 0x22a   :  { %v2765_v48 = vadd.f32 %v2764_v23, %v2724_v46  ;;  %v2726_v50 = vadd.f32 %v2725_v49, %v2685_v45  ;;  %v2806_v23 = vadd.f32 %v6963_v36, %v503_v14  ;;  %v7894_v45 = vld [vmem:[#allocation4 + $0x190] ss:$28 sps:$4 sm:$0xff]   ;;  %v7899_v49 = vld [vmem:[#allocation4 + $0x69c] ss:$28 sps:$4 sm:$0xff]   ;;  %v7932_v14 = vld [vmem:[#allocation4 + $0x44] ss:$28 sps:$4 sm:$0xff]  }
 0x22b   :  { %v2727_v53 = vpop.f32.mrf.mxu0  ;;  %v7927_v36 = vld [vmem:[#allocation4 + $0x580] ss:$28 sps:$4 sm:$0xff]  }
 0x22c   :  { %v2767_v54 = vadd.f32 %v2766_v24, %v2726_v50  ;;  %v2935_v55 = vmax.f32 %v2765_v48, 0.0  ;;  %v7902_v48 = vld [vmem:[#allocation4 + $0x15c] ss:$28 sps:$4 sm:$0xff]  }
 0x22d   :  { %v2728_v56 = vpop.f32.mrf.mxu0  ;;  %v7897_v50 = vld [vmem:[#allocation4 + $0x698] ss:$28 sps:$4 sm:$0xff]  }
 0x22e   :  { %v2936_v57 = vmax.f32 %v2767_v54, 0.0  ;;  %v8483_v61 = vpack.c.bf16 %v2935_v55, %v2935_v55  ;;  %v7900_v53 = vld [vmem:[#allocation4 + $0x158] ss:$28 sps:$4 sm:$0xff]   ;;  %v7905_v54 = vld [vmem:[#allocation4 + $0x664] ss:$28 sps:$4 sm:$0xff]  }
 0x22f   :  { %v7908_v55 = vld [vmem:[#allocation4 + $0x124] ss:$28 sps:$4 sm:$0xff]  }
 0x230   :  { %v8481_v60 = vpack.c.bf16 %v2936_v57, %v2936_v57  ;;  %v7903_v56 = vld [vmem:[#allocation4 + $0x660] ss:$28 sps:$4 sm:$0xff]  }
 0x231   :  { %v7906_v57 = vld [vmem:[#allocation4 + $0x120] ss:$28 sps:$4 sm:$0xff]  }
 0x232   :  { %5300 = vmatprep.mubr.bf16.mxu1 %v8481_v60 }
 0x233   :  { %5301 = vmatmul.mubr.bf16.vlgmr.msra.gmra.mxu1 %v8483_v61 }
 0x234   :  { %5392 = vmatpush1.bf16.msra.mxu1 %v7861_v9  ;;  %5423 = vmatprep.mubr.bf16.mxu1 %v8462_v26  ;;  %v7911_v9 = vld [vmem:[#allocation4 + $0x62c] ss:$28 sps:$4 sm:$0xff]  }
 0x235   :  { %5393 = vmatprep.subr.bf16.mxu1 %v7866_v62  ;;  %v7914_v62 = vld [vmem:[#allocation4 + $0xec] ss:$28 sps:$4 sm:$0xff]  }
 0x238   :  { %5394 = vmatpush1.bf16.msra.mxu1 %v7864_v63  ;;  %v7909_v63 = vld [vmem:[#allocation4 + $0x628] ss:$28 sps:$4 sm:$0xff]  }
 0x239   :  { %5395 = vmatprep.subr.bf16.mxu1 %v7869_v1  ;;  %v7912_v1 = vld [vmem:[#allocation4 + $0xe8] ss:$28 sps:$4 sm:$0xff]  }
 0x23c   :  { %5396 = vmatpush1.bf16.msra.mxu1 %v7867_v2  ;;  %v7917_v2 = vld [vmem:[#allocation4 + $0x5f4] ss:$28 sps:$4 sm:$0xff]  }
 0x23d   :  { %5397 = vmatprep.subr.bf16.mxu1 %v7872_v3  ;;  %v7920_v3 = vld [vmem:[#allocation4 + $0xb4] ss:$28 sps:$4 sm:$0xff]  }
 0x240   :  { %v6983_v21 = vpop.f32.mrf.mxu1  ;;  %5398 = vmatpush1.bf16.msra.mxu1 %v7870_v4  ;;  %v7915_v4 = vld [vmem:[#allocation4 + $0x5f0] ss:$28 sps:$4 sm:$0xff]  }
 0x241   :  { %5399 = vmatprep.subr.bf16.mxu1 %v7875_v19  ;;  %v7918_v19 = vld [vmem:[#allocation4 + $0xb0] ss:$28 sps:$4 sm:$0xff]  }
 0x242   :  { %v6984_v10 = vpop.f32.mrf.mxu1 }
 0x243   :  { %v6985_v8 = vadd.f32 %v6984_v10, %v6983_v21  ;;  %v7923_v21 = vld [vmem:[#allocation4 + $0x5bc] ss:$28 sps:$4 sm:$0xff]  }
 0x244   :  { %v6986_v13 = vpop.f32.mrf.mxu1  ;;  %5400 = vmatpush1.bf16.msra.mxu1 %v7873_v7  ;;  %v7926_v7 = vld [vmem:[#allocation4 + $0x7c] ss:$28 sps:$4 sm:$0xff]  }
 0x245   :  { %5401 = vmatprep.subr.bf16.mxu1 %v7878_v12  ;;  %v2846_v28 = vadd.f32 %v6985_v8, %v2806_v23  ;;  %v7921_v10 = vld [vmem:[#allocation4 + $0x5b8] ss:$28 sps:$4 sm:$0xff]   ;;  %v7929_v13 = vld [vmem:[#allocation4 + $0x584] ss:$28 sps:$4 sm:$0xff]  }
 0x246   :  { %v6987_v17 = vpop.f32.mrf.mxu1  ;;  %v7924_v12 = vld [vmem:[#allocation4 + $0x78] ss:$28 sps:$4 sm:$0xff]   ;;  %v7933_v8 = vld [vmem:[#allocation4 + $0x548] ss:$28 sps:$4 sm:$0xff]  }
 0x247   :  { %v7005_v20 = vpop.f32.mrf.mxu0  ;;  %v7935_v17 = vld [vmem:[#allocation4 + $0x54c] ss:$28 sps:$4 sm:$0xff]   ;;  %v7944_v23 = vld [vmem:[#allocation4 + $0x354] ss:$28 sps:$4 sm:$0xff]  }
 0x248   :  { %v2925_v22 = vpop.f32.mrf.mxu1  ;;  %5402 = vmatpush1.bf16.msra.mxu1 %v7876_v15  ;;  %v7930_v15 = vld [vmem:[#allocation4 + $0x40] ss:$28 sps:$4 sm:$0xff]  }
 0x249   :  { %v7006_v24 = vpop.f32.mrf.mxu0  ;;  %5403 = vmatprep.subr.bf16.mxu1 %v7881_v18  ;;  %v7938_v18 = vld [vmem:[#allocation4 + $0xc] ss:$28 sps:$4 sm:$0xff]  }
 0x24a   :  { %v7196_v25 = vpop.f32.mrf.mxu1  ;;  %v7007_v32 = vadd.f32 %v7006_v24, %v7005_v20  ;;  %v7936_v20 = vld [vmem:[#allocation4 + $0x8] ss:$28 sps:$4 sm:$0xff]   ;;  %v7942_v24 = vld [vmem:[#allocation4 + $0x350] ss:$28 sps:$4 sm:$0xff]  }
 0x24b   :  { %v7008_v11 = vpop.f32.mrf.mxu0  ;;  %v7947_v25 = vld [vmem:[#allocation4 + $0xa8c] ss:$28 sps:$4 sm:$0xff]  }
 0x24c   :  { %v2928_v51 = vpop.f32.mrf.mxu1  ;;  %v2886_v31 = vadd.f32 %v7007_v32, %v2846_v28  ;;  %5404 = vmatpush1.bf16.msra.mxu1 %v7879_v6  ;;  %v7939_v6 = vld [vmem:[#allocation4 + $0xac0] ss:$28 sps:$4 sm:$0xff]   ;;  %v7945_v28 = vld [vmem:[#allocation4 + $0xa88] ss:$28 sps:$4 sm:$0xff]   ;;  %v7948_v32 = vld [vmem:[#allocation4 + $0x318] ss:$28 sps:$4 sm:$0xff]  }
 0x24d   :  { %v7009_v52 = vpop.f32.mrf.mxu0  ;;  %5405 = vmatprep.subr.bf16.mxu1 %v7887_v27  ;;  %v7950_v27 = vld [vmem:[#allocation4 + $0x31c] ss:$28 sps:$4 sm:$0xff]   ;;  %v7956_v51 = vld [vmem:[#allocation4 + $0x2e4] ss:$28 sps:$4 sm:$0xff]  }
 0x24e   :  { %v7197_v39 = vpop.f32.mrf.mxu1  ;;  %v2926_v42 = vadd.f32 %v2925_v22, %v2886_v31  ;;  %v7941_v22 = vld [vmem:[#allocation4 + $0xac4] ss:$28 sps:$4 sm:$0xff]   ;;  %v7953_v11 = vld [vmem:[#allocation4 + $0x19c] ss:$28 sps:$4 sm:$0xff]  }
 0x24f   :  { %v7951_v31 = vld [vmem:[#allocation4 + $0x198] ss:$28 sps:$4 sm:$0xff]   ;;  %v7959_v52 = vld [vmem:[#allocation4 + $0x164] ss:$28 sps:$4 sm:$0xff]   ;;  %v7962_v39 = vld [vmem:[#allocation4 + $0x2ac] ss:$28 sps:$4 sm:$0xff]  }
 0x250   :  { %v2937_v43 = vmax.f32 %v2926_v42, 0.0  ;;  %5406 = vmatpush1.bf16.msra.mxu1 %v7885_v34  ;;  %v7954_v34 = vld [vmem:[#allocation4 + $0x2e0] ss:$28 sps:$4 sm:$0xff]   ;;  %v7960_v42 = vld [vmem:[#allocation4 + $0x2a8] ss:$28 sps:$4 sm:$0xff]  }
 0x251   :  { %5407 = vmatprep.subr.bf16.mxu1 %v7893_v41  ;;  %v7957_v41 = vld [vmem:[#allocation4 + $0x160] ss:$28 sps:$4 sm:$0xff]  }
 0x252   :  { %v8492_v46 = vpack.c.bf16 %v2937_v43, %v2937_v43  ;;  %v7965_v43 = vld [vmem:[#allocation4 + $0x12c] ss:$28 sps:$4 sm:$0xff]  }
 0x254   :  { %5408 = vmatpush2.bf16.msra.mxu1 %v7891_v44  ;;  %6939 = vmatmul.mubr.msk.bf16.vlgmr.msra.gmra.mxu0 %vm5182_vm2, %v8492_v46  ;;  %v7968_v44 = vld [vmem:[#allocation4 + $0x274] ss:$28 sps:$4 sm:$0xff]  }
 0x255   :  { %5351 = vmatpush1.bf16.msra.mxu0 %v7894_v45  ;;  %5382 = vmatprep.mubr.bf16.mxu0 %v8441_v58  ;;  %v7963_v45 = vld [vmem:[#allocation4 + $0x128] ss:$28 sps:$4 sm:$0xff]  }
 0x256   :  { %5409 = vmatprep.subr.bf16.mxu1 %v7899_v49  ;;  %5352 = vmatprep.subr.bf16.mxu0 %v7902_v48  ;;  %v3345_v49 = vld [vmem:[%s8611_s4] sm:$0x7f] }
 0x257   :  { %v7966_v48 = vld [vmem:[#allocation4 + $0x270] ss:$28 sps:$4 sm:$0xff]  }
 0x258   :  { %5410 = vmatpush2.bf16.msra.mxu1 %v7897_v50  ;;  %v7971_v50 = vld [vmem:[#allocation4 + $0xf4] ss:$28 sps:$4 sm:$0xff]  }
 0x259   :  { %5353 = vmatpush1.bf16.msra.mxu0 %v7900_v53  ;;  %5411 = vmatprep.subr.bf16.mxu1 %v7905_v54  ;;  %v7974_v53 = vld [vmem:[#allocation4 + $0x23c] ss:$28 sps:$4 sm:$0xff]   ;;  %v3350_v54 = vrot.slane %v3345_v49, %v478_v38 }
 0x25a   :  { %5354 = vmatprep.subr.bf16.mxu0 %v7908_v55  ;;  %v7969_v55 = vld [vmem:[#allocation4 + $0xf0] ss:$28 sps:$4 sm:$0xff]   ;;  %v7978_v38 = vld [vmem:[#allocation4 + $0x200] ss:$28 sps:$4 sm:$0xff]  }
 0x25c   :  { %5412 = vmatpush2.bf16.msra.mxu1 %v7903_v56  ;;  %v7972_v56 = vld [vmem:[#allocation4 + $0x238] ss:$28 sps:$4 sm:$0xff]  }
 0x25d   :  { %5355 = vmatpush1.bf16.msra.mxu0 %v7906_v57  ;;  %5413 = vmatprep.subr.bf16.mxu1 %v7911_v9  ;;  %v7977_v57 = vld [vmem:[#allocation4 + $0xbc] ss:$28 sps:$4 sm:$0xff]   ;;  %v3354_v9 = vrot.slane %v3345_v49, %v482_v40 }
 0x25e   :  { %5356 = vmatprep.subr.bf16.mxu0 %v7914_v62  ;;  %v7980_v62 = vld [vmem:[#allocation4 + $0x204] ss:$28 sps:$4 sm:$0xff]   ;;  %v8022_v49 = vld [vmem:[#allocation4 + $0x77c] ss:$28 sps:$4 sm:$0xff]  }
 0x260   :  { %5414 = vmatpush2.bf16.msra.mxu1 %v7909_v63 }
 0x261   :  { %5357 = vmatpush1.bf16.msra.mxu0 %v7912_v1  ;;  %5415 = vmatprep.subr.bf16.mxu1 %v7917_v2 }
 0x262   :  { %5358 = vmatprep.subr.bf16.mxu0 %v7920_v3  ;;  %v7975_v3 = vld [vmem:[#allocation4 + $0xb8] ss:$28 sps:$4 sm:$0xff]  }
 0x264   :  { %5416 = vmatpush2.bf16.msra.mxu1 %v7915_v4 }
 0x265   :  { %5359 = vmatpush1.bf16.msra.mxu0 %v7918_v19  ;;  %5417 = vmatprep.subr.bf16.mxu1 %v7923_v21  ;;  %v7983_v19 = vld [vmem:[#allocation4 + $0x84] ss:$28 sps:$4 sm:$0xff]  }
 0x266   :  { %5360 = vmatprep.subr.bf16.mxu0 %v7926_v7 }
 0x268   :  { %5418 = vmatpush2.bf16.msra.mxu1 %v7921_v10 }
 0x269   :  { %5361 = vmatpush1.bf16.msra.mxu0 %v7924_v12  ;;  %5419 = vmatprep.subr.bf16.mxu1 %v7929_v13  ;;  %v7986_v12 = vld [vmem:[#allocation4 + $0x1cc] ss:$28 sps:$4 sm:$0xff]  }
 0x26a   :  { %5362 = vmatprep.subr.bf16.mxu0 %v7932_v14 }
 0x26c   :  { %5420 = vmatpush2.bf16.msra.mxu1 %v7927_v36  ;;  %v7981_v36 = vld [vmem:[#allocation4 + $0x80] ss:$28 sps:$4 sm:$0xff]  }
 0x26d   :  { %5363 = vmatpush1.bf16.msra.mxu0 %v7930_v15  ;;  %5421 = vmatprep.subr.bf16.mxu1 %v7935_v17  ;;  %v7984_v17 = vld [vmem:[#allocation4 + $0x1c8] ss:$28 sps:$4 sm:$0xff]  }
 0x26e   :  { %5364 = vmatprep.subr.bf16.mxu0 %v7938_v18  ;;  %v7989_v18 = vld [vmem:[#allocation4 + $0x4c] ss:$28 sps:$4 sm:$0xff]  }
 0x270   :  { %5422 = vmatpush2.bf16.msra.mxu1 %v7933_v8 }
 0x271   :  { %5365 = vmatpush1.bf16.msra.mxu0 %v7936_v20  ;;  %5485 = vmatprep.subr.bf16.mxu1 %v7941_v22  ;;  %v7992_v20 = vld [vmem:[#allocation4 + $0x894] ss:$28 sps:$4 sm:$0xff]   ;;  %v7987_v22 = vld [vmem:[#allocation4 + $0x48] ss:$28 sps:$4 sm:$0xff]  }
 0x272   :  { %5366 = vmatprep.subr.bf16.mxu0 %v7944_v23  ;;  %v7990_v23 = vld [vmem:[#allocation4 + $0x890] ss:$28 sps:$4 sm:$0xff]  }
 0x273   :  { %5424 = vmatmul.mubr.bf16.vlgmr.msra.gmra.mxu1 %v8468_v0 }
 0x274   :  { %5486 = vmatpush1.bf16.msra.mxu1 %v7939_v6  ;;  %5505 = vmatprep.mubr.bf16.mxu1 %v8290_v16  ;;  %v7995_v6 = vld [vmem:[#allocation4 + $0x14] ss:$28 sps:$4 sm:$0xff]  }
 0x275   :  { %5367 = vmatpush2.bf16.msra.mxu0 %v7942_v24  ;;  %5487 = vmatprep.subr.bf16.mxu1 %v7947_v25  ;;  %v7998_v24 = vld [vmem:[#allocation4 + $0x85c] ss:$28 sps:$4 sm:$0xff]   ;;  %v7993_v25 = vld [vmem:[#allocation4 + $0x10] ss:$28 sps:$4 sm:$0xff]  }
 0x276   :  { %5368 = vmatprep.subr.bf16.mxu0 %v7950_v27  ;;  %v7996_v27 = vld [vmem:[#allocation4 + $0x858] ss:$28 sps:$4 sm:$0xff]  }
 0x278   :  { %5488 = vmatpush1.bf16.msra.mxu1 %v7945_v28  ;;  %v8001_v28 = vld [vmem:[#allocation4 + $0x35c] ss:$28 sps:$4 sm:$0xff]  }
 0x279   :  { %5369 = vmatpush2.bf16.msra.mxu0 %v7948_v32  ;;  %5514 = vmatprep.subr.bf16.mxu1 %v7953_v11  ;;  %v8004_v32 = vld [vmem:[#allocation4 + $0x824] ss:$28 sps:$4 sm:$0xff]   ;;  %v7999_v11 = vld [vmem:[#allocation4 + $0x358] ss:$28 sps:$4 sm:$0xff]  }
 0x27a   :  { %5370 = vmatprep.subr.bf16.mxu0 %v7956_v51  ;;  %v8002_v51 = vld [vmem:[#allocation4 + $0x820] ss:$28 sps:$4 sm:$0xff]  }
 0x27b   :  { %6940 = vmatmul.mubr.msk.bf16.vlgmr.msra.gmra.mxu1 %vm5182_vm2, %v8492_v46 }
 0x27c   :  { %5515 = vmatpush1.bf16.msra.mxu1 %v7951_v31  ;;  %5546 = vmatprep.mubr.bf16.mxu1 %v8441_v58  ;;  %v8007_v31 = vld [vmem:[#allocation4 + $0x324] ss:$28 sps:$4 sm:$0xff]  }
 0x27d   :  { %5371 = vmatpush2.bf16.msra.mxu0 %v7954_v34  ;;  %5516 = vmatprep.subr.bf16.mxu1 %v7959_v52  ;;  %v8010_v34 = vld [vmem:[#allocation4 + $0x7ec] ss:$28 sps:$4 sm:$0xff]   ;;  %v8005_v52 = vld [vmem:[#allocation4 + $0x320] ss:$28 sps:$4 sm:$0xff]  }
 0x27e   :  { %5372 = vmatprep.subr.bf16.mxu0 %v7962_v39  ;;  %v8008_v39 = vld [vmem:[#allocation4 + $0x7e8] ss:$28 sps:$4 sm:$0xff]  }
 0x280   :  { %5517 = vmatpush1.bf16.msra.mxu1 %v7957_v41  ;;  %v8013_v41 = vld [vmem:[#allocation4 + $0x2ec] ss:$28 sps:$4 sm:$0xff]  }
 0x281   :  { %5373 = vmatpush2.bf16.msra.mxu0 %v7960_v42  ;;  %5518 = vmatprep.subr.bf16.mxu1 %v7965_v43  ;;  %v8016_v42 = vld [vmem:[#allocation4 + $0x7b4] ss:$28 sps:$4 sm:$0xff]   ;;  %v8011_v43 = vld [vmem:[#allocation4 + $0x2e8] ss:$28 sps:$4 sm:$0xff]  }
 0x282   :  { %5374 = vmatprep.subr.bf16.mxu0 %v7968_v44  ;;  %v8014_v44 = vld [vmem:[#allocation4 + $0x7b0] ss:$28 sps:$4 sm:$0xff]  }
 0x284   :  { %5519 = vmatpush1.bf16.msra.mxu1 %v7963_v45  ;;  %v8019_v45 = vld [vmem:[#allocation4 + $0x2b4] ss:$28 sps:$4 sm:$0xff]  }
 0x285   :  { %5375 = vmatpush2.bf16.msra.mxu0 %v7966_v48  ;;  %5520 = vmatprep.subr.bf16.mxu1 %v7971_v50  ;;  %v8017_v48 = vld [vmem:[#allocation4 + $0x2b0] ss:$28 sps:$4 sm:$0xff]   ;;  %v8020_v50 = vld [vmem:[#allocation4 + $0x778] ss:$28 sps:$4 sm:$0xff]  }
 0x286   :  { %5376 = vmatprep.subr.bf16.mxu0 %v7974_v53  ;;  %v8025_v53 = vld [vmem:[#allocation4 + $0x27c] ss:$28 sps:$4 sm:$0xff]  }
 0x287   :  { %v5261_v2 = vpop.f32.mrf.mxu0 }
 0x288   :  { %v5220_v63 = vpop.f32.mrf.mxu1  ;;  %5521 = vmatpush1.bf16.msra.mxu1 %v7969_v55  ;;  %v8023_v55 = vld [vmem:[#allocation4 + $0x278] ss:$28 sps:$4 sm:$0xff]  }
 0x289   :  { %v5221_v1 = vadd.f32 %v5220_v63, %v3350_v54  ;;  %5377 = vmatpush2.bf16.msra.mxu0 %v7972_v56  ;;  %5522 = vmatprep.subr.bf16.mxu1 %v7977_v57  ;;  %v5263_v10 = vpop.f32.mrf.mxu0  ;;  %v8028_v54 = vld [vmem:[#allocation4 + $0x744] ss:$28 sps:$4 sm:$0xff]  }
 0x28a   :  { %v5222_v4 = vpop.f32.mrf.mxu1  ;;  %5378 = vmatprep.subr.bf16.mxu0 %v7980_v62  ;;  %v8026_v56 = vld [vmem:[#allocation4 + $0x740] ss:$28 sps:$4 sm:$0xff]   ;;  %v8032_v63 = vld [vmem:[#allocation4 + $0x708] ss:$28 sps:$4 sm:$0xff]  }
 0x28b   :  { %v5223_v21 = vadd.f32 %v5222_v4, %v3354_v9  ;;  %v8509_v7 = vadd.f32 %v5261_v2, %v5221_v1  ;;  %v5265_v14 = vpop.f32.mrf.mxu0  ;;  %v8031_v57 = vld [vmem:[#allocation4 + $0x244] ss:$28 sps:$4 sm:$0xff]   ;;  %v8034_v9 = vld [vmem:[#allocation4 + $0x70c] ss:$28 sps:$4 sm:$0xff]   ;;  %v8040_v2 = vld [vmem:[#allocation4 + $0xa54] ss:$28 sps:$4 sm:$0xff]  }
 0x28c   :  { %v5224_v13 = vpop.f32.mrf.mxu1  ;;  %5523 = vmatpush1.bf16.msra.mxu1 %v7975_v3  ;;  %v8029_v62 = vld [vmem:[#allocation4 + $0x240] ss:$28 sps:$4 sm:$0xff]   ;;  %v8037_v1 = vld [vmem:[#allocation4 + $0x20c] ss:$28 sps:$4 sm:$0xff]   ;;  %v8047_v14 = vld [vmem:[#allocation4 + $0x898] ss:$28 sps:$4 sm:$0xff]  }
 0x28d   :  { %v8511_v40 = vadd.f32 %v5263_v10, %v5223_v21  ;;  %5379 = vmatpush2.bf16.msra.mxu0 %v7978_v38  ;;  %5524 = vmatprep.subr.bf16.mxu1 %v7983_v19  ;;  %v5266_v8 = vpop.f32.mrf.mxu0  ;;  %v8035_v3 = vld [vmem:[#allocation4 + $0x208] ss:$28 sps:$4 sm:$0xff]   ;;  %v8038_v4 = vld [vmem:[#allocation4 + $0xa50] ss:$28 sps:$4 sm:$0xff]   ;;  %v8046_v19 = vld [vmem:[#allocation4 + $0xa1c] ss:$28 sps:$4 sm:$0xff]  }
 0x28e   :  { %v5225_v15 = vpop.f32.mrf.mxu1  ;;  %5380 = vmatprep.subr.bf16.mxu0 %v7986_v12  ;;  %v8043_v38 = vld [vmem:[#allocation4 + $0x1d4] ss:$28 sps:$4 sm:$0xff]   ;;  %v8049_v12 = vld [vmem:[#allocation4 + $0x89c] ss:$28 sps:$4 sm:$0xff]   ;;  %v8052_v13 = vld [vmem:[#allocation4 + $0x9e4] ss:$28 sps:$4 sm:$0xff]  }
 0x28f   :  { %v8041_v21 = vld [vmem:[#allocation4 + $0x1d0] ss:$28 sps:$4 sm:$0xff]   ;;  %v8044_v10 = vld [vmem:[#allocation4 + $0xa18] ss:$28 sps:$4 sm:$0xff]   ;;  %v8055_v15 = vld [vmem:[#allocation4 + $0x864] ss:$28 sps:$4 sm:$0xff]  }
 0x290   :  { %5525 = vmatpush1.bf16.msra.mxu1 %v7981_v36  ;;  %v8050_v36 = vld [vmem:[#allocation4 + $0x9e0] ss:$28 sps:$4 sm:$0xff]   ;;  %v8056_v8 = vld [vmem:[#allocation4 + $0x9a8] ss:$28 sps:$4 sm:$0xff]  }
 0x291   :  { %5381 = vmatpush2.bf16.msra.mxu0 %v7984_v17  ;;  %5526 = vmatprep.subr.bf16.mxu1 %v7989_v18  ;;  %v8058_v17 = vld [vmem:[#allocation4 + $0x9ac] ss:$28 sps:$4 sm:$0xff]   ;;  %v8053_v18 = vld [vmem:[#allocation4 + $0x860] ss:$28 sps:$4 sm:$0xff]  }
 0x292   :  { %5432 = vmatprep.subr.bf16.mxu0 %v7992_v20  ;;  %v8061_v20 = vld [vmem:[#allocation4 + $0x82c] ss:$28 sps:$4 sm:$0xff]  }
 0x294   :  { %5383 = vmatmul.mubr.bf16.vlgmr.msra.gmra.mxu0 %v8466_v33  ;;  %5527 = vmatpush1.bf16.msra.mxu1 %v7987_v22  ;;  %v8064_v22 = vld [vmem:[#allocation4 + $0x974] ss:$28 sps:$4 sm:$0xff]  }
 0x295   :  { %5433 = vmatpush1.bf16.msra.mxu0 %v7990_v23  ;;  %5464 = vmatprep.mubr.bf16.mxu0 %v8481_v60  ;;  %v8059_v23 = vld [vmem:[#allocation4 + $0x828] ss:$28 sps:$4 sm:$0xff]  }
 0x296   :  { %5528 = vmatprep.subr.bf16.mxu1 %v7995_v6  ;;  %5434 = vmatprep.subr.bf16.mxu0 %v7998_v24  ;;  %v8062_v6 = vld [vmem:[#allocation4 + $0x970] ss:$28 sps:$4 sm:$0xff]  }
 0x297   :  { %v8067_v24 = vld [vmem:[#allocation4 + $0x7f4] ss:$28 sps:$4 sm:$0xff]  }
 0x298   :  { %5529 = vmatpush1.bf16.msra.mxu1 %v7993_v25  ;;  %v8070_v25 = vld [vmem:[#allocation4 + $0x93c] ss:$28 sps:$4 sm:$0xff]  }
 0x299   :  { %5435 = vmatpush1.bf16.msra.mxu0 %v7996_v27  ;;  %5530 = vmatprep.subr.bf16.mxu1 %v8001_v28  ;;  %v8065_v27 = vld [vmem:[#allocation4 + $0x7f0] ss:$28 sps:$4 sm:$0xff]   ;;  %v8068_v28 = vld [vmem:[#allocation4 + $0x938] ss:$28 sps:$4 sm:$0xff]  }
 0x29a   :  { %5436 = vmatprep.subr.bf16.mxu0 %v8004_v32  ;;  %v8073_v32 = vld [vmem:[#allocation4 + $0x7bc] ss:$28 sps:$4 sm:$0xff]  }
 0x29c   :  { %5531 = vmatpush2.bf16.msra.mxu1 %v7999_v11  ;;  %v8076_v11 = vld [vmem:[#allocation4 + $0x904] ss:$28 sps:$4 sm:$0xff]  }
 0x29d   :  { %5437 = vmatpush1.bf16.msra.mxu0 %v8002_v51  ;;  %5532 = vmatprep.subr.bf16.mxu1 %v8007_v31  ;;  %v8071_v51 = vld [vmem:[#allocation4 + $0x7b8] ss:$28 sps:$4 sm:$0xff]   ;;  %v8074_v31 = vld [vmem:[#allocation4 + $0x900] ss:$28 sps:$4 sm:$0xff]  }
 0x29e   :  { %5438 = vmatprep.subr.bf16.mxu0 %v8010_v34  ;;  %v8079_v34 = vld [vmem:[#allocation4 + $0x784] ss:$28 sps:$4 sm:$0xff]  }
 0x2a0   :  { %5533 = vmatpush2.bf16.msra.mxu1 %v8005_v52  ;;  %v8082_v52 = vld [vmem:[#allocation4 + $0x8cc] ss:$28 sps:$4 sm:$0xff]  }
 0x2a1   :  { %5439 = vmatpush1.bf16.msra.mxu0 %v8008_v39  ;;  %5534 = vmatprep.subr.bf16.mxu1 %v8013_v41  ;;  %v8077_v39 = vld [vmem:[#allocation4 + $0x780] ss:$28 sps:$4 sm:$0xff]   ;;  %v8080_v41 = vld [vmem:[#allocation4 + $0x8c8] ss:$28 sps:$4 sm:$0xff]  }
 0x2a2   :  { %5440 = vmatprep.subr.bf16.mxu0 %v8016_v42  ;;  %v8085_v42 = vld [vmem:[#allocation4 + $0x74c] ss:$28 sps:$4 sm:$0xff]  }
 0x2a4   :  { %5535 = vmatpush2.bf16.msra.mxu1 %v8011_v43  ;;  %v8088_v43 = vld [vmem:[#allocation4 + $0x51c] ss:$28 sps:$4 sm:$0xff]  }
 0x2a5   :  { %5441 = vmatpush1.bf16.msra.mxu0 %v8014_v44  ;;  %5536 = vmatprep.subr.bf16.mxu1 %v8019_v45  ;;  %v8083_v44 = vld [vmem:[#allocation4 + $0x748] ss:$28 sps:$4 sm:$0xff]   ;;  %v8086_v45 = vld [vmem:[#allocation4 + $0x518] ss:$28 sps:$4 sm:$0xff]  }
 0x2a6   :  { %5442 = vmatprep.subr.bf16.mxu0 %v8022_v49  ;;  %v8091_v49 = vld [vmem:[#allocation4 + $0x714] ss:$28 sps:$4 sm:$0xff]  }
 0x2a8   :  { %5537 = vmatpush2.bf16.msra.mxu1 %v8017_v48  ;;  %v8094_v48 = vld [vmem:[#allocation4 + $0x4e4] ss:$28 sps:$4 sm:$0xff]  }
 0x2a9   :  { %5443 = vmatpush1.bf16.msra.mxu0 %v8020_v50  ;;  %5538 = vmatprep.subr.bf16.mxu1 %v8025_v53  ;;  %v8089_v50 = vld [vmem:[#allocation4 + $0x710] ss:$28 sps:$4 sm:$0xff]   ;;  %v8092_v53 = vld [vmem:[#allocation4 + $0x4e0] ss:$28 sps:$4 sm:$0xff]  }
 0x2aa   :  { %5444 = vmatprep.subr.bf16.mxu0 %v8028_v54  ;;  %v8097_v54 = vld [vmem:[#allocation4 + $0xa5c] ss:$28 sps:$4 sm:$0xff]  }
 0x2ac   :  { %5539 = vmatpush2.bf16.msra.mxu1 %v8023_v55  ;;  %v8100_v55 = vld [vmem:[#allocation4 + $0x4ac] ss:$28 sps:$4 sm:$0xff]  }
 0x2ad   :  { %5445 = vmatpush1.bf16.msra.mxu0 %v8026_v56  ;;  %5540 = vmatprep.subr.bf16.mxu1 %v8031_v57  ;;  %v8095_v56 = vld [vmem:[#allocation4 + $0xa58] ss:$28 sps:$4 sm:$0xff]   ;;  %v8098_v57 = vld [vmem:[#allocation4 + $0x4a8] ss:$28 sps:$4 sm:$0xff]  }
 0x2ae   :  { %5446 = vmatprep.subr.bf16.mxu0 %v8034_v9  ;;  %v8103_v9 = vld [vmem:[#allocation4 + $0xa24] ss:$28 sps:$4 sm:$0xff]  }
 0x2b0   :  { %5541 = vmatpush2.bf16.msra.mxu1 %v8029_v62  ;;  %v8106_v62 = vld [vmem:[#allocation4 + $0x474] ss:$28 sps:$4 sm:$0xff]  }
 0x2b1   :  { %5447 = vmatpush1.bf16.msra.mxu0 %v8032_v63  ;;  %5542 = vmatprep.subr.bf16.mxu1 %v8037_v1  ;;  %v8101_v63 = vld [vmem:[#allocation4 + $0xa20] ss:$28 sps:$4 sm:$0xff]   ;;  %v8104_v1 = vld [vmem:[#allocation4 + $0x470] ss:$28 sps:$4 sm:$0xff]  }
 0x2b2   :  { %5448 = vmatprep.subr.bf16.mxu0 %v8040_v2  ;;  %v8109_v2 = vld [vmem:[#allocation4 + $0x9ec] ss:$28 sps:$4 sm:$0xff]  }
 0x2b4   :  { %5543 = vmatpush2.bf16.msra.mxu1 %v8035_v3  ;;  %v8112_v3 = vld [vmem:[#allocation4 + $0x43c] ss:$28 sps:$4 sm:$0xff]  }
 0x2b5   :  { %5449 = vmatpush2.bf16.msra.mxu0 %v8038_v4  ;;  %5544 = vmatprep.subr.bf16.mxu1 %v8043_v38  ;;  %v8107_v4 = vld [vmem:[#allocation4 + $0x9e8] ss:$28 sps:$4 sm:$0xff]   ;;  %v8110_v38 = vld [vmem:[#allocation4 + $0x438] ss:$28 sps:$4 sm:$0xff]  }
 0x2b6   :  { %5450 = vmatprep.subr.bf16.mxu0 %v8046_v19  ;;  %v8115_v19 = vld [vmem:[#allocation4 + $0x9b4] ss:$28 sps:$4 sm:$0xff]  }
 0x2b8   :  { %5545 = vmatpush2.bf16.msra.mxu1 %v8041_v21  ;;  %v8118_v21 = vld [vmem:[#allocation4 + $0x404] ss:$28 sps:$4 sm:$0xff]  }
 0x2b9   :  { %5451 = vmatpush2.bf16.msra.mxu0 %v8044_v10  ;;  %5596 = vmatprep.subr.bf16.mxu1 %v8049_v12  ;;  %v8113_v10 = vld [vmem:[#allocation4 + $0x9b0] ss:$28 sps:$4 sm:$0xff]   ;;  %v8116_v12 = vld [vmem:[#allocation4 + $0x400] ss:$28 sps:$4 sm:$0xff]  }
 0x2ba   :  { %5452 = vmatprep.subr.bf16.mxu0 %v8052_v13  ;;  %v8121_v13 = vld [vmem:[#allocation4 + $0x97c] ss:$28 sps:$4 sm:$0xff]  }
 0x2bb   :  { %5547 = vmatmul.mubr.bf16.vlgmr.msra.gmra.mxu1 %v8466_v33 }
 0x2bc   :  { %5597 = vmatpush1.bf16.msra.mxu1 %v8047_v14  ;;  %5628 = vmatprep.mubr.bf16.mxu1 %v8481_v60  ;;  %v8124_v14 = vld [vmem:[#allocation4 + $0x3cc] ss:$28 sps:$4 sm:$0xff]  }
 0x2bd   :  { %5453 = vmatpush2.bf16.msra.mxu0 %v8050_v36  ;;  %5598 = vmatprep.subr.bf16.mxu1 %v8055_v15  ;;  %v8119_v36 = vld [vmem:[#allocation4 + $0x978] ss:$28 sps:$4 sm:$0xff]   ;;  %v8122_v15 = vld [vmem:[#allocation4 + $0x3c8] ss:$28 sps:$4 sm:$0xff]  }
 0x2be   :  { %5454 = vmatprep.subr.bf16.mxu0 %v8058_v17  ;;  %v8127_v17 = vld [vmem:[#allocation4 + $0x944] ss:$28 sps:$4 sm:$0xff]  }
 0x2c0   :  { %5599 = vmatpush1.bf16.msra.mxu1 %v8053_v18  ;;  %v8130_v18 = vld [vmem:[#allocation4 + $0x394] ss:$28 sps:$4 sm:$0xff]  }
 0x2c1   :  { %5455 = vmatpush2.bf16.msra.mxu0 %v8056_v8  ;;  %5600 = vmatprep.subr.bf16.mxu1 %v8061_v20  ;;  %v8125_v8 = vld [vmem:[#allocation4 + $0x940] ss:$28 sps:$4 sm:$0xff]   ;;  %v8128_v20 = vld [vmem:[#allocation4 + $0x390] ss:$28 sps:$4 sm:$0xff]  }
 0x2c2   :  { %5456 = vmatprep.subr.bf16.mxu0 %v8064_v22  ;;  %v8133_v22 = vld [vmem:[#allocation4 + $0x90c] ss:$28 sps:$4 sm:$0xff]  }
 0x2c4   :  { %5601 = vmatpush1.bf16.msra.mxu1 %v8059_v23  ;;  %v8136_v23 = vld [vmem:[#allocation4 + $0x6dc] ss:$28 sps:$4 sm:$0xff]  }
 0x2c5   :  { %5457 = vmatpush2.bf16.msra.mxu0 %v8062_v6  ;;  %5602 = vmatprep.subr.bf16.mxu1 %v8067_v24  ;;  %v8131_v6 = vld [vmem:[#allocation4 + $0x908] ss:$28 sps:$4 sm:$0xff]   ;;  %v8134_v24 = vld [vmem:[#allocation4 + $0x6d8] ss:$28 sps:$4 sm:$0xff]  }
 0x2c6   :  { %5458 = vmatprep.subr.bf16.mxu0 %v8070_v25  ;;  %v8139_v25 = vld [vmem:[#allocation4 + $0x8d4] ss:$28 sps:$4 sm:$0xff]  }
 0x2c8   :  { %5603 = vmatpush1.bf16.msra.mxu1 %v8065_v27  ;;  %v8142_v27 = vld [vmem:[#allocation4 + $0x6a4] ss:$28 sps:$4 sm:$0xff]  }
 0x2c9   :  { %5459 = vmatpush2.bf16.msra.mxu0 %v8068_v28  ;;  %5604 = vmatprep.subr.bf16.mxu1 %v8073_v32 }
 0x2ca   :  { %5460 = vmatprep.subr.bf16.mxu0 %v8076_v11  ;;  %v8137_v11 = vld [vmem:[#allocation4 + $0x8d0] ss:$28 sps:$4 sm:$0xff]  }
 0x2cc   :  { %5605 = vmatpush1.bf16.msra.mxu1 %v8071_v51 }
 0x2cd   :  { %5461 = vmatpush2.bf16.msra.mxu0 %v8074_v31  ;;  %5606 = vmatprep.subr.bf16.mxu1 %v8079_v34  ;;  %v8140_v31 = vld [vmem:[#allocation4 + $0x6a0] ss:$28 sps:$4 sm:$0xff]  }
 0x2ce   :  { %5462 = vmatprep.subr.bf16.mxu0 %v8082_v52  ;;  %v8143_v34 = vld [vmem:[#allocation4 + $0xa60] ss:$28 sps:$4 sm:$0xff]  }
 0x2d0   :  { %5607 = vmatpush1.bf16.msra.mxu1 %v8077_v39  ;;  %v8146_v39 = vld [vmem:[#allocation4 + $0x66c] ss:$28 sps:$4 sm:$0xff]  }
 0x2d1   :  { %5463 = vmatpush2.bf16.msra.mxu0 %v8080_v41  ;;  %5608 = vmatprep.subr.bf16.mxu1 %v8085_v42  ;;  %v8147_v42 = vld [vmem:[#allocation4 + $0x8a0] ss:$28 sps:$4 sm:$0xff]  }
 0x2d2   :  { %5555 = vmatprep.subr.bf16.mxu0 %v8088_v43 }
 0x2d4   :  { %5465 = vmatmul.mubr.bf16.vlgmr.msra.gmra.mxu0 %v8483_v61  ;;  %5609 = vmatpush1.bf16.msra.mxu1 %v8083_v44  ;;  %v8148_v44 = vld [vmem:[#allocation4 + $0xa28] ss:$28 sps:$4 sm:$0xff]  }
 0x2d5   :  { %5556 = vmatpush1.bf16.msra.mxu0 %v8086_v45  ;;  %5587 = vmatprep.mubr.bf16.mxu0 %v8462_v26  ;;  %v8151_v45 = vld [vmem:[#allocation4 + $0x634] ss:$28 sps:$4 sm:$0xff]  }
 0x2d6   :  { %5610 = vmatprep.subr.bf16.mxu1 %v8091_v49  ;;  %5557 = vmatprep.subr.bf16.mxu0 %v8094_v48  ;;  %v8152_v49 = vld [vmem:[#allocation4 + $0x868] ss:$28 sps:$4 sm:$0xff]   ;;  %v8153_v48 = vld [vmem:[#allocation4 + $0x9f0] ss:$28 sps:$4 sm:$0xff]  }
 0x2d8   :  { %5611 = vmatpush1.bf16.msra.mxu1 %v8089_v50  ;;  %v8156_v50 = vld [vmem:[#allocation4 + $0x5fc] ss:$28 sps:$4 sm:$0xff]  }
 0x2d9   :  { %5558 = vmatpush1.bf16.msra.mxu0 %v8092_v53  ;;  %5612 = vmatprep.subr.bf16.mxu1 %v8097_v54  ;;  %v8157_v53 = vld [vmem:[#allocation4 + $0x830] ss:$28 sps:$4 sm:$0xff]   ;;  %v8154_v54 = vld [vmem:[#allocation4 + $0x5f8] ss:$28 sps:$4 sm:$0xff]  }
 0x2da   :  { %5559 = vmatprep.subr.bf16.mxu0 %v8100_v55  ;;  %v8158_v55 = vld [vmem:[#allocation4 + $0x9b8] ss:$28 sps:$4 sm:$0xff]  }
 0x2dc   :  { %5613 = vmatpush2.bf16.msra.mxu1 %v8095_v56  ;;  %v8161_v56 = vld [vmem:[#allocation4 + $0x5c4] ss:$28 sps:$4 sm:$0xff]  }
 0x2dd   :  { %5560 = vmatpush1.bf16.msra.mxu0 %v8098_v57  ;;  %5614 = vmatprep.subr.bf16.mxu1 %v8103_v9  ;;  %v8162_v57 = vld [vmem:[#allocation4 + $0x7f8] ss:$28 sps:$4 sm:$0xff]   ;;  %v8163_v9 = vld [vmem:[#allocation4 + $0x980] ss:$28 sps:$4 sm:$0xff]  }
 0x2de   :  { %5561 = vmatprep.subr.bf16.mxu0 %v8106_v62  ;;  %v8166_v62 = vld [vmem:[#allocation4 + $0x58c] ss:$28 sps:$4 sm:$0xff]  }
 0x2e0   :  { %5615 = vmatpush2.bf16.msra.mxu1 %v8101_v63  ;;  %v8167_v63 = vld [vmem:[#allocation4 + $0x7c0] ss:$28 sps:$4 sm:$0xff]  }
 0x2e1   :  { %5562 = vmatpush1.bf16.msra.mxu0 %v8104_v1  ;;  %5616 = vmatprep.subr.bf16.mxu1 %v8109_v2  ;;  %v8164_v1 = vld [vmem:[#allocation4 + $0x588] ss:$28 sps:$4 sm:$0xff]  }
 0x2e2   :  { %5563 = vmatprep.subr.bf16.mxu0 %v8112_v3  ;;  %v8168_v2 = vld [vmem:[#allocation4 + $0x948] ss:$28 sps:$4 sm:$0xff]   ;;  %v8171_v3 = vld [vmem:[#allocation4 + $0x554] ss:$28 sps:$4 sm:$0xff]  }
 0x2e4   :  { %5617 = vmatpush2.bf16.msra.mxu1 %v8107_v4  ;;  %v8172_v4 = vld [vmem:[#allocation4 + $0x788] ss:$28 sps:$4 sm:$0xff]  }
 0x2e5   :  { %5564 = vmatpush1.bf16.msra.mxu0 %v8110_v38  ;;  %5618 = vmatprep.subr.bf16.mxu1 %v8115_v19  ;;  %v8169_v38 = vld [vmem:[#allocation4 + $0x550] ss:$28 sps:$4 sm:$0xff]  }
 0x2e6   :  { %5565 = vmatprep.subr.bf16.mxu0 %v8118_v21  ;;  %v8173_v19 = vld [vmem:[#allocation4 + $0x910] ss:$28 sps:$4 sm:$0xff]  }
 0x2e7   :  { %v8176_v21 = vld [vmem:[#allocation4 + $0xacc] ss:$28 sps:$4 sm:$0xff]  }
 0x2e8   :  { %5619 = vmatpush2.bf16.msra.mxu1 %v8113_v10  ;;  %v8177_v10 = vld [vmem:[#allocation4 + $0x750] ss:$28 sps:$4 sm:$0xff]  }
 0x2e9   :  { %5566 = vmatpush1.bf16.msra.mxu0 %v8116_v12  ;;  %5620 = vmatprep.subr.bf16.mxu1 %v8121_v13  ;;  %v8174_v12 = vld [vmem:[#allocation4 + $0xac8] ss:$28 sps:$4 sm:$0xff]   ;;  %v8178_v13 = vld [vmem:[#allocation4 + $0x8d8] ss:$28 sps:$4 sm:$0xff]  }
 0x2ea   :  { %5567 = vmatprep.subr.bf16.mxu0 %v8124_v14  ;;  %v8181_v14 = vld [vmem:[#allocation4 + $0xa94] ss:$28 sps:$4 sm:$0xff]  }
 0x2ec   :  { %5621 = vmatpush2.bf16.msra.mxu1 %v8119_v36 }
 0x2ed   :  { %5568 = vmatpush1.bf16.msra.mxu0 %v8122_v15  ;;  %5622 = vmatprep.subr.bf16.mxu1 %v8127_v17  ;;  %v8182_v15 = vld [vmem:[#allocation4 + $0x718] ss:$28 sps:$4 sm:$0xff]  }
 0x2ee   :  { %5569 = vmatprep.subr.bf16.mxu0 %v8130_v18  ;;  %v8179_v18 = vld [vmem:[#allocation4 + $0xa90] ss:$28 sps:$4 sm:$0xff]  }
 0x2f0   :  { %5623 = vmatpush2.bf16.msra.mxu1 %v8125_v8 }
 0x2f1   :  { %5570 = vmatpush1.bf16.msra.mxu0 %v8128_v20  ;;  %5624 = vmatprep.subr.bf16.mxu1 %v8133_v22  ;;  %v8183_v20 = vld [vmem:[#allocation4 + $0x360] ss:$28 sps:$4 sm:$0xff]   ;;  %v5908_v22 = vld [vmem:[#allocation6 + $0x1f8] sm:$0xff] }
 0x2f2   :  { %5571 = vmatprep.subr.bf16.mxu0 %v8136_v23 }
 0x2f3   :  { %v5302_v28 = vpop.f32.mrf.mxu1 }
 0x2f4   :  { %v8520_v32 = vadd.f32 %v5302_v28, %v8509_v7  ;;  %5625 = vmatpush2.bf16.msra.mxu1 %v8131_v6  ;;  %v8144_v7 = vld [vmem:[#allocation4 + $0x668] ss:$28 sps:$4 sm:$0xff]  }
 0x2f5   :  { %5572 = vmatpush2.bf16.msra.mxu0 %v8134_v24  ;;  %v5304_v51 = vpop.f32.mrf.mxu1  ;;  %5626 = vmatprep.subr.bf16.mxu1 %v8139_v25  ;;  %v8184_v24 = vld [vmem:[#allocation4 + $0x1a0] ss:$28 sps:$4 sm:$0xff]   ;;  %v5892_v25 = vld [vmem:[#allocation6 + $0x178] sm:$0xff] }
 0x2f6   :  { %v8523_v52 = vadd.f32 %v5304_v51, %v8511_v40  ;;  %5573 = vmatprep.subr.bf16.mxu0 %v8142_v27  ;;  %v8149_v40 = vld [vmem:[#allocation4 + $0x630] ss:$28 sps:$4 sm:$0xff]   ;;  %v8185_v28 = vld [vmem:[#allocation4 + $0x328] ss:$28 sps:$4 sm:$0xff]   ;;  %v5906_v51 = vld [vmem:[#allocation6 + $0x1e8] sm:$0xff] }
 0x2f7   :  { %v5306_v41 = vpop.f32.mrf.mxu1 }
 0x2f8   :  { %5627 = vmatpush2.bf16.msra.mxu1 %v8137_v11  ;;  %v8186_v11 = vld [vmem:[#allocation4 + $0x168] ss:$28 sps:$4 sm:$0xff]  }
 0x2f9   :  { %5574 = vmatpush2.bf16.msra.mxu0 %v8140_v31  ;;  %v5307_v43 = vpop.f32.mrf.mxu1  ;;  %7057 = vmatprep.subr.bf16.mxu1 %v8143_v34  ;;  %v8187_v31 = vld [vmem:[#allocation4 + $0x2f0] ss:$28 sps:$4 sm:$0xff]   ;;  %v5890_v34 = vld [vmem:[#allocation6 + $0x168] sm:$0xff] }
 0x2fa   :  { %5575 = vmatprep.subr.bf16.mxu0 %v8146_v39  ;;  %v5889_v39 = vld [vmem:[#allocation6 + $0x160] sm:$0xff]  ;;  %v5904_v41 = vld [vmem:[#allocation6 + $0x1d8] sm:$0xff] }
 0x2fb   :  { %5629 = vmatmul.mubr.bf16.vlgmr.msra.gmra.mxu1 %v8483_v61  ;;  %v5888_v43 = vld [vmem:[#allocation6 + $0x158] sm:$0xff] }
 0x2fc   :  { %7058 = vmatpush3.bf16.msra.mxu1 %v8147_v42  ;;  %5790 = vmatprep.mubr.bf16.mxu1 %v8481_v60  ;;  %v8159_v60 = vld [vmem:[#allocation4 + $0x5c0] ss:$28 sps:$4 sm:$0xff]   ;;  %v8189_v42 = vld [vmem:[#allocation4 + $0x2b8] ss:$28 sps:$4 sm:$0xff]  }
 0x2fd   :  { %5576 = vmatpush2.bf16.msra.mxu0 %v8144_v7  ;;  %7059 = vmatprep.subr.bf16.mxu1 %v8148_v44  ;;  %v5887_v7 = vld [vmem:[#allocation6 + $0x150] sm:$0xff]  ;;  %v8190_v44 = vld [vmem:[#allocation4 + $0xf8] ss:$28 sps:$4 sm:$0xff]  }
 0x2fe   :  { %5577 = vmatprep.subr.bf16.mxu0 %v8151_v45  ;;  %v5902_v45 = vld [vmem:[#allocation6 + $0x1c8] sm:$0xff] }
 0x300   :  { %7060 = vmatpush3.bf16.msra.mxu1 %v8152_v49  ;;  %v8191_v49 = vld [vmem:[#allocation4 + $0x280] ss:$28 sps:$4 sm:$0xff]  }
 0x301   :  { %5578 = vmatpush2.bf16.msra.mxu0 %v8149_v40  ;;  %7061 = vmatprep.subr.bf16.mxu1 %v8153_v48  ;;  %v5886_v40 = vld [vmem:[#allocation6 + $0x148] sm:$0xff]  ;;  %v5901_v48 = vld [vmem:[#allocation6 + $0x1c0] sm:$0xff] }
 0x302   :  { %5579 = vmatprep.subr.bf16.mxu0 %v8156_v50  ;;  %v5885_v50 = vld [vmem:[#allocation6 + $0x140] sm:$0xff] }
 0x304   :  { %7062 = vmatpush3.bf16.msra.mxu1 %v8157_v53  ;;  %v8192_v53 = vld [vmem:[#allocation4 + $0xc0] ss:$28 sps:$4 sm:$0xff]  }
 0x305   :  { %5580 = vmatpush2.bf16.msra.mxu0 %v8154_v54  ;;  %7063 = vmatprep.subr.bf16.mxu1 %v8158_v55  ;;  %v5900_v54 = vld [vmem:[#allocation6 + $0x1b8] sm:$0xff] }
 0x306   :  { %5581 = vmatprep.subr.bf16.mxu0 %v8161_v56  ;;  %v8193_v55 = vld [vmem:[#allocation4 + $0x248] ss:$28 sps:$4 sm:$0xff]  }
 0x307   :  { %v5884_v56 = vld [vmem:[#allocation6 + $0x138] sm:$0xff] }
 0x308   :  { %7064 = vmatpush3.bf16.msra.mxu1 %v8162_v57  ;;  %v5899_v57 = vld [vmem:[#allocation6 + $0x1b0] sm:$0xff] }
 0x309   :  { %5582 = vmatpush2.bf16.msra.mxu0 %v8159_v60  ;;  %7065 = vmatprep.subr.bf16.mxu1 %v8163_v9  ;;  %v5883_v60 = vld [vmem:[#allocation6 + $0x130] sm:$0xff] }
 0x30a   :  { %5583 = vmatprep.subr.bf16.mxu0 %v8166_v62  ;;  %v8194_v9 = vld [vmem:[#allocation4 + $0x88] ss:$28 sps:$4 sm:$0xff]   ;;  %v5898_v62 = vld [vmem:[#allocation6 + $0x1a8] sm:$0xff] }
 0x30c   :  { %7066 = vmatpush3.bf16.msra.mxu1 %v8167_v63  ;;  %v8195_v63 = vld [vmem:[#allocation4 + $0x210] ss:$28 sps:$4 sm:$0xff]  }
 0x30d   :  { %5584 = vmatpush2.bf16.msra.mxu0 %v8164_v1  ;;  %7067 = vmatprep.subr.bf16.mxu1 %v8168_v2  ;;  %v5882_v1 = vld [vmem:[#allocation6 + $0x128] sm:$0xff]  ;;  %v5897_v2 = vld [vmem:[#allocation6 + $0x1a0] sm:$0xff] }
 0x30e   :  { %5585 = vmatprep.subr.bf16.mxu0 %v8171_v3  ;;  %v5881_v3 = vld [vmem:[#allocation6 + $0x120] sm:$0xff] }
 0x310   :  { %7068 = vmatpush3.bf16.msra.mxu1 %v8172_v4  ;;  %v8196_v4 = vld [vmem:[#allocation4 + $0x50] ss:$28 sps:$4 sm:$0xff]  }
 0x311   :  { %5586 = vmatpush2.bf16.msra.mxu0 %v8169_v38  ;;  %7069 = vmatprep.subr.bf16.mxu1 %v8173_v19  ;;  %v5896_v38 = vld [vmem:[#allocation6 + $0x198] sm:$0xff]  ;;  %v8197_v19 = vld [vmem:[#allocation4 + $0x1d8] ss:$28 sps:$4 sm:$0xff]  }
 0x312   :  { %5649 = vmatprep.subr.bf16.mxu0 %v8176_v21  ;;  %v5880_v21 = vld [vmem:[#allocation6 + $0x118] sm:$0xff] }
 0x314   :  { %5588 = vmatmul.mubr.bf16.vlgmr.msra.gmra.mxu0 %v8468_v0  ;;  %7070 = vmatpush3.bf16.msra.mxu1 %v8177_v10  ;;  %v5343_v36 = vpop.f32.mrf.mxu0 }
 0x315   :  { %v8529_v17 = vadd.f32 %v5343_v36, %v8520_v32  ;;  %5650 = vmatpush1.bf16.msra.mxu0 %v8174_v12  ;;  %7071 = vmatprep.subr.bf16.mxu1 %v8178_v13  ;;  %v5907_v32 = vld [vmem:[#allocation6 + $0x1f0] sm:$0xff]  ;;  %v8198_v36 = vld [vmem:[#allocation4 + $0x18] ss:$28 sps:$4 sm:$0xff]  }
 0x316   :  { %v5345_v8 = vpop.f32.mrf.mxu0  ;;  %5651 = vmatprep.subr.bf16.mxu0 %v8181_v14  ;;  %5669 = vmatprep.mubr.bf16.mxu0 %v8290_v16  ;;  %v5891_v16 = vld [vmem:[#allocation6 + $0x170] sm:$0xff] }
 0x317   :  { %v8533_v23 = vadd.f32 %v5345_v8, %v8523_v52  ;;  %v5905_v52 = vld [vmem:[#allocation6 + $0x1e0] sm:$0xff]  ;;  %v5895_v12 = vld [vmem:[#allocation6 + $0x190] sm:$0xff]  ;;  %v5878_v8 = vld [vmem:[#allocation6 + $0x108] sm:$0xff] }
 0x318   :  { %7072 = vmatpush3.bf16.msra.mxu1 %v8182_v15  ;;  %v5347_v6 = vpop.f32.mrf.mxu0  ;;  %v5879_v13 = vld [vmem:[#allocation6 + $0x110] sm:$0xff]  ;;  %v5894_v15 = vld [vmem:[#allocation6 + $0x188] sm:$0xff] }
 0x319   :  { %5652 = vmatpush1.bf16.msra.mxu0 %v8179_v18  ;;  %7117 = vmatprep.subr.mxu1 %v5908_v22  ;;  %v8199_v18 = vld [vmem:[#allocation4 + $0x6e0] ss:$28 sps:$4 sm:$0xff]   ;;  %v5893_v22 = vld [vmem:[#allocation6 + $0x180] sm:$0xff] }
 0x31a   :  { %v5348_v27 = vpop.f32.mrf.mxu0  ;;  %7013 = vmatprep.subr.bf16.mxu0 %v8183_v20  ;;  %v5877_v6 = vld [vmem:[#allocation6 + $0x100] sm:$0xff] }
 0x31b   :  { %5791 = vmatmul.mubr.bf16.vlgmr.msra.gmra.mxu1 %v8483_v61  ;;  %v8188_v61 = vld [vmem:[#allocation4 + $0x130] ss:$28 sps:$4 sm:$0xff]   ;;  %v8201_v27 = vld [vmem:[#allocation4 + $0x6a8] ss:$28 sps:$4 sm:$0xff]  }
 0x31c   :  { %6941 = vmatmul.mubr.msk.bf16.vlgmr.msra.gmra.mxu0 %vm5182_vm2, %v8492_v46  ;;  %7118 = vmatpush3.msra.mxu1 %v5892_v25  ;;  %v8200_v25 = vld [vmem:[#allocation4 + $0x520] ss:$28 sps:$4 sm:$0xff]  }
 0x31d   :  { %7014 = vmatpush3.bf16.msra.mxu0 %v8184_v24  ;;  %5710 = vmatprep.mubr.bf16.mxu0 %v8441_v58  ;;  %v5903_v58 = vld [vmem:[#allocation6 + $0x1d0] sm:$0xff] }
 0x31e   :  { %7015 = vmatprep.subr.bf16.mxu0 %v8185_v28  ;;  %7119 = vmatprep.subr.mxu1 %v5907_v32 }
 0x31f   :  { %7120 = vmatpush3.msra.mxu1 %v5891_v16  ;;  %v8202_v16 = vld [vmem:[#allocation4 + $0x4e8] ss:$28 sps:$4 sm:$0xff]  }
 0x320   :  { %7121 = vmatprep.subr.mxu1 %v5906_v51 }
 0x321   :  { %7016 = vmatpush3.bf16.msra.mxu0 %v8186_v11  ;;  %7122 = vmatpush3.msra.mxu1 %v5890_v34  ;;  %v8203_v11 = vld [vmem:[#allocation4 + $0x670] ss:$28 sps:$4 sm:$0xff]  }
 0x322   :  { %7017 = vmatprep.subr.bf16.mxu0 %v8187_v31  ;;  %7123 = vmatprep.subr.mxu1 %v5905_v52  ;;  %v8204_v34 = vld [vmem:[#allocation4 + $0x4b0] ss:$28 sps:$4 sm:$0xff]   ;;  %v8205_v52 = vld [vmem:[#allocation4 + $0x638] ss:$28 sps:$4 sm:$0xff]  }
 0x323   :  { %7124 = vmatpush3.msra.mxu1 %v5889_v39  ;;  %v8206_v39 = vld [vmem:[#allocation4 + $0x478] ss:$28 sps:$4 sm:$0xff]  }
 0x324   :  { %7125 = vmatprep.subr.mxu1 %v5904_v41  ;;  %v8209_v41 = vld [vmem:[#allocation4 + $0x5c8] ss:$28 sps:$4 sm:$0xff]  }
 0x325   :  { %7018 = vmatpush3.bf16.msra.mxu0 %v8188_v61  ;;  %7126 = vmatpush3.msra.mxu1 %v5888_v43  ;;  %v8208_v61 = vld [vmem:[#allocation4 + $0x440] ss:$28 sps:$4 sm:$0xff]   ;;  %v8212_v43 = vld [vmem:[#allocation4 + $0x3d0] ss:$28 sps:$4 sm:$0xff]  }
 0x326   :  { %7019 = vmatprep.subr.bf16.mxu0 %v8189_v42  ;;  %7127 = vmatprep.subr.mxu1 %v5903_v58  ;;  %v8210_v42 = vld [vmem:[#allocation4 + $0x408] ss:$28 sps:$4 sm:$0xff]   ;;  %v8213_v58 = vld [vmem:[#allocation4 + $0x558] ss:$28 sps:$4 sm:$0xff]  }
 0x327   :  { %7128 = vmatpush3.msra.mxu1 %v5887_v7 }
 0x328   :  { %7129 = vmatprep.subr.mxu1 %v5902_v45 }
 0x329   :  { %7020 = vmatpush3.bf16.msra.mxu0 %v8190_v44  ;;  %7130 = vmatpush3.msra.mxu1 %v5886_v40  ;;  %v8214_v44 = vld [vmem:[#allocation4 + $0x398] ss:$28 sps:$4 sm:$0xff]   ;;  %v8215_v40 = vld [vmem:[#allocation4 + $0xad0] ss:$28 sps:$4 sm:$0xff]  }
 0x32a   :  { %7021 = vmatprep.subr.bf16.mxu0 %v8191_v49  ;;  %7131 = vmatprep.subr.mxu1 %v5901_v48 }
 0x32b   :  { %7132 = vmatpush3.msra.mxu1 %v5885_v50  ;;  %v8216_v50 = vld [vmem:[#allocation4 + $0xa98] ss:$28 sps:$4 sm:$0xff]  }
 0x32c   :  { %7133 = vmatprep.subr.mxu1 %v5900_v54  ;;  %v5860_v54 = vld [vmem:[#allocation6 + $0x78] sm:$0xff] }
 0x32d   :  { %7022 = vmatpush3.bf16.msra.mxu0 %v8192_v53  ;;  %7134 = vmatpush3.msra.mxu1 %v5884_v56  ;;  %v5876_v53 = vld [vmem:[#allocation6 + $0xf8] sm:$0xff]  ;;  %v5875_v56 = vld [vmem:[#allocation6 + $0xf0] sm:$0xff] }
 0x32e   :  { %7023 = vmatprep.subr.bf16.mxu0 %v8193_v55  ;;  %7135 = vmatprep.subr.mxu1 %v5899_v57  ;;  %v5839_v55 = vmax.f32 %v8533_v23, 0.0  ;;  %v5859_v57 = vld [vmem:[#allocation6 + $0x70] sm:$0xff] }
 0x32f   :  { %7136 = vmatpush3.msra.mxu1 %v5883_v60  ;;  %v5858_v60 = vld [vmem:[#allocation6 + $0x68] sm:$0xff]  ;;  %v5871_v23 = vld [vmem:[#allocation6 + $0xd0] sm:$0xff] }
 0x330   :  { %7137 = vmatprep.subr.mxu1 %v5898_v62  ;;  %v5857_v62 = vld [vmem:[#allocation6 + $0x60] sm:$0xff] }
 0x331   :  { %7024 = vmatpush3.bf16.msra.mxu0 %v8194_v9  ;;  %7138 = vmatpush3.msra.mxu1 %v5882_v1  ;;  %v5873_v9 = vld [vmem:[#allocation6 + $0xe0] sm:$0xff]  ;;  %v5856_v1 = vld [vmem:[#allocation6 + $0x58] sm:$0xff] }
 0x332   :  { %7025 = vmatprep.subr.bf16.mxu0 %v8195_v63  ;;  %7139 = vmatprep.subr.mxu1 %v5897_v2  ;;  %v5872_v63 = vld [vmem:[#allocation6 + $0xd8] sm:$0xff]  ;;  %v5855_v2 = vld [vmem:[#allocation6 + $0x50] sm:$0xff] }
 0x333   :  { %v8539_v10 = vpop.f32.mrf.mxu1  ;;  %7140 = vmatpush3.msra.mxu1 %v5881_v3  ;;  %v5854_v3 = vld [vmem:[#allocation6 + $0x48] sm:$0xff] }
 0x334   :  { %7141 = vmatprep.subr.mxu1 %v5896_v38  ;;  %v5853_v38 = vld [vmem:[#allocation6 + $0x40] sm:$0xff] }
 0x335   :  { %v8541_v14 = vpop.f32.mrf.mxu1  ;;  %7026 = vmatpush3.bf16.msra.mxu0 %v8196_v4  ;;  %7142 = vmatpush3.msra.mxu1 %v5880_v21  ;;  %v5869_v4 = vld [vmem:[#allocation6 + $0xc0] sm:$0xff]  ;;  %v5852_v21 = vld [vmem:[#allocation6 + $0x38] sm:$0xff] }
 0x336   :  { %7027 = vmatprep.subr.bf16.mxu0 %v8197_v19  ;;  %7143 = vmatprep.subr.mxu1 %v5895_v12  ;;  %v5868_v19 = vld [vmem:[#allocation6 + $0xb8] sm:$0xff]  ;;  %v5867_v12 = vld [vmem:[#allocation6 + $0xb0] sm:$0xff] }
 0x337   :  { %v5429_v20 = vpop.f32.mrf.mxu1  ;;  %7144 = vmatpush3.msra.mxu1 %v5879_v13  ;;  %v5851_v13 = vld [vmem:[#allocation6 + $0x30] sm:$0xff] }
 0x338   :  { %7145 = vmatprep.subr.mxu1 %v5894_v15  ;;  %v5850_v15 = vld [vmem:[#allocation6 + $0x28] sm:$0xff]  ;;  %v5864_v20 = vld [vmem:[#allocation6 + $0x98] sm:$0xff] }
 0x339   :  { %v5430_v24 = vpop.f32.mrf.mxu1  ;;  %7028 = vmatpush3.bf16.msra.mxu0 %v8198_v36  ;;  %7146 = vmatpush3.msra.mxu1 %v5878_v8  ;;  %v5866_v36 = vld [vmem:[#allocation6 + $0xa8] sm:$0xff]  ;;  %v5849_v8 = vld [vmem:[#allocation6 + $0x20] sm:$0xff] }
 0x33a   :  { %7035 = vmatprep.subr.bf16.mxu0 %v8199_v18  ;;  %7147 = vmatprep.subr.mxu1 %v5893_v22  ;;  %v5865_v18 = vld [vmem:[#allocation6 + $0xa0] sm:$0xff]  ;;  %v5848_v22 = vld [vmem:[#allocation6 + $0x18] sm:$0xff]  ;;  %v5863_v24 = vld [vmem:[#allocation6 + $0x90] sm:$0xff] }
 0x33b   :  { %v8543_v28 = vpop.f32.mrf.mxu1  ;;  %7148 = vmatpush3.msra.mxu1 %v5877_v6 }
 0x33c   :  { %5711 = vmatmul.mubr.bf16.vlgmr.msra.gmra.mxu0 %v8466_v33  ;;  %7206 = vmatprep.subr.mxu1 %v8291_v47  ;;  %v8207_v33 = vld [vmem:[#allocation4 + $0x600] ss:$28 sps:$4 sm:$0xff]  }
 0x33d   :  { %v8547_v32 = vpop.f32.mrf.mxu1  ;;  %7036 = vmatpush3.bf16.msra.mxu0 %v8200_v25  ;;  %5750 = vmatprep.mubr.bf16.mxu0 %v8462_v26  ;;  %v8211_v26 = vld [vmem:[#allocation4 + $0x590] ss:$28 sps:$4 sm:$0xff]   ;;  %v5847_v25 = vld [vmem:[#allocation6 + $0x10] sm:$0xff] }
 0x33e   :  { %7037 = vmatprep.subr.bf16.mxu0 %v8201_v27 }
 0x33f   :  { %v5511_v51 = vpop.f32.mrf.mxu1 }
 0x341   :  { %v5512_v31 = vpop.f32.mrf.mxu1  ;;  %7038 = vmatpush3.bf16.msra.mxu0 %v8202_v16  ;;  %v5862_v16 = vld [vmem:[#allocation6 + $0x88] sm:$0xff] }
 0x342   :  { %7039 = vmatprep.subr.bf16.mxu0 %v8203_v11  ;;  %v5846_v11 = vld [vmem:[#allocation6 + $0x8] sm:$0xff]  ;;  %v5861_v31 = vld [vmem:[#allocation6 + $0x80] sm:$0xff] }
 0x345   :  { %7040 = vmatpush3.bf16.msra.mxu0 %v8204_v34  ;;  %v5845_v34 = vld [vmem:[#allocation6] sm:$0xff] }
 0x346   :  { %7041 = vmatprep.subr.bf16.mxu0 %v8205_v52 }
 0x349   :  { %7042 = vmatpush3.bf16.msra.mxu0 %v8206_v39  ;;  %v5940_v39 = vld [vmem:[#allocation6 + $0x2f8] sm:$0xff] }
 0x34a   :  { %7043 = vmatprep.subr.bf16.mxu0 %v8207_v33  ;;  %v5838_v33 = vmax.f32 %v8529_v17, 0.0  ;;  %v8570_v17 = vld [vmem:[%s8611_s4] sm:$0x7f] }
 0x34d   :  { %7044 = vmatpush3.bf16.msra.mxu0 %v8208_v61  ;;  %v5924_v61 = vld [vmem:[#allocation6 + $0x278] sm:$0xff] }
 0x34e   :  { %7045 = vmatprep.subr.bf16.mxu0 %v8209_v41  ;;  %v5939_v41 = vld [vmem:[#allocation6 + $0x2f0] sm:$0xff] }
 0x351   :  { %7046 = vmatpush3.bf16.msra.mxu0 %v8210_v42  ;;  %v5923_v42 = vld [vmem:[#allocation6 + $0x270] sm:$0xff] }
 0x352   :  { %7047 = vmatprep.subr.bf16.mxu0 %v8211_v26  ;;  %v5938_v26 = vld [vmem:[#allocation6 + $0x2e8] sm:$0xff] }
 0x354   :  { %v8550_v7 = vpop.f32.mrf.mxu0 }
 0x355   :  { %7048 = vmatpush3.bf16.msra.mxu0 %v8212_v43  ;;  %v5922_v43 = vld [vmem:[#allocation6 + $0x268] sm:$0xff] }
 0x356   :  { %v8552_v45 = vpop.f32.mrf.mxu0  ;;  %7049 = vmatprep.subr.bf16.mxu0 %v8213_v58  ;;  %v5937_v58 = vld [vmem:[#allocation6 + $0x2e0] sm:$0xff] }
 0x358   :  { %v5388_v49 = vpop.f32.mrf.mxu0 }
 0x359   :  { %7050 = vmatpush3.bf16.msra.mxu0 %v8214_v44  ;;  %v5921_v44 = vld [vmem:[#allocation6 + $0x260] sm:$0xff]  ;;  %v5936_v49 = vld [vmem:[#allocation6 + $0x2d8] sm:$0xff] }
 0x35a   :  { %v5389_v48 = vpop.f32.mrf.mxu0  ;;  %7198 = vmatprep.subr.bf16.mxu0 %v8291_v47 }
 0x35b   :  { %v3358_v48 = vrot.slane %v8570_v17, %v486_v35 }
 0x35c   :  { %5751 = vmatmul.mubr.bf16.vlgmr.msra.gmra.mxu0 %v8468_v0  ;;  %v5874_v0 = vld [vmem:[#allocation6 + $0xe8] sm:$0xff] }
 0x35d   :  { %7199 = vmatpush3.bf16.msra.mxu0 %v8215_v40  ;;  %7202 = vmatprep.mubr.msk.bf16.mxu0 %vm8292_vm1, %v8291_v47  ;;  %v5920_v40 = vld [vmem:[#allocation6 + $0x258] sm:$0xff] }
 0x35e   :  { %7200 = vmatprep.subr.bf16.mxu0 %v8291_v47 }
 0x361   :  { %7201 = vmatpush3.bf16.msra.mxu0 %v8216_v50  ;;  %v5935_v50 = vld [vmem:[#allocation6 + $0x2d0] sm:$0xff] }
 0x362   :  { %7082 = vmatprep.subr.mxu0 %v5876_v53  ;;  %v5919_v53 = vld [vmem:[#allocation6 + $0x250] sm:$0xff] }
 0x364   :  { %7203 = vmatmul.mubr.msk.bf16.vlgmr.msra.gmra.mxu0 %vm5182_vm2, %v8492_v46  ;;  %v5870_v46 = vld [vmem:[#allocation6 + $0xc8] sm:$0xff] }
 0x365   :  { %7083 = vmatpush3.msra.mxu0 %v5860_v54  ;;  %6019 = vmatprep.mubr.f32.mxu0 %v5839_v55  ;;  %v3362_v54 = vrot.slane %v8570_v17, %v490_v37  ;;  %v5934_v55 = vld [vmem:[#allocation6 + $0x2c8] sm:$0xff]  ;;  %v5931_v37 = vld [vmem:[#allocation6 + $0x2b0] sm:$0xff] }
 0x366   :  { %7084 = vmatprep.subr.mxu0 %v5875_v56  ;;  %v5918_v56 = vld [vmem:[#allocation6 + $0x248] sm:$0xff] }
 0x367   :  { %7085 = vmatpush3.msra.mxu0 %v5859_v57  ;;  %v5385_v57 = vadd.f32 %v8550_v7, %v3358_v48  ;;  %v5387_v35 = vadd.f32 %v8552_v45, %v3362_v54 }
 0x368   :  { %7086 = vmatprep.subr.mxu0 %v5874_v0  ;;  %v5933_v0 = vld [vmem:[#allocation6 + $0x2c0] sm:$0xff] }
 0x369   :  { %7087 = vmatpush3.msra.mxu0 %v5858_v60  ;;  %v5917_v60 = vld [vmem:[#allocation6 + $0x240] sm:$0xff]  ;;  %v5428_v7 = vadd.f32 %v8541_v14, %v5387_v35  ;;  %v5912_v14 = vld [vmem:[#allocation6 + $0x218] sm:$0xff] }
 0x36a   :  { %7088 = vmatprep.subr.mxu0 %v5873_v9  ;;  %v5932_v9 = vld [vmem:[#allocation6 + $0x2b8] sm:$0xff] }
 0x36b   :  { %7089 = vmatpush3.msra.mxu0 %v5857_v62  ;;  %v5916_v62 = vld [vmem:[#allocation6 + $0x238] sm:$0xff] }
 0x36c   :  { %7090 = vmatprep.subr.mxu0 %v5872_v63  ;;  %v5426_v63 = vadd.f32 %v8539_v10, %v5385_v57  ;;  %v5913_v10 = vld [vmem:[#allocation6 + $0x220] sm:$0xff] }
 0x36d   :  { %7091 = vmatpush3.msra.mxu0 %v5856_v1 }
 0x36e   :  { %7092 = vmatprep.subr.mxu0 %v5871_v23  ;;  %v5915_v23 = vld [vmem:[#allocation6 + $0x230] sm:$0xff] }
 0x36f   :  { %7093 = vmatpush3.msra.mxu0 %v5855_v2 }
 0x370   :  { %7094 = vmatprep.subr.mxu0 %v5870_v46  ;;  %v5930_v46 = vld [vmem:[#allocation6 + $0x2a8] sm:$0xff] }
 0x371   :  { %7095 = vmatpush3.msra.mxu0 %v5854_v3 }
 0x372   :  { %7096 = vmatprep.subr.mxu0 %v5869_v4  ;;  %v5914_v4 = vld [vmem:[#allocation6 + $0x228] sm:$0xff] }
 0x373   :  { %7097 = vmatpush3.msra.mxu0 %v5853_v38  ;;  %v5929_v38 = vld [vmem:[#allocation6 + $0x2a0] sm:$0xff] }
 0x374   :  { %7098 = vmatprep.subr.mxu0 %v5868_v19 }
 0x375   :  { %7099 = vmatpush3.msra.mxu0 %v5852_v21 }
 0x376   :  { %7100 = vmatprep.subr.mxu0 %v5867_v12 }
 0x377   :  { %7101 = vmatpush3.msra.mxu0 %v5851_v13  ;;  %v5928_v13 = vld [vmem:[#allocation6 + $0x298] sm:$0xff] }
 0x378   :  { %7102 = vmatprep.subr.mxu0 %v5866_v36 }
 0x379   :  { %7103 = vmatpush3.msra.mxu0 %v5850_v15 }
 0x37a   :  { %7104 = vmatprep.subr.mxu0 %v5865_v18  ;;  %v5927_v18 = vld [vmem:[#allocation6 + $0x290] sm:$0xff] }
 0x37b   :  { %v8562_v6 = vpop.f32.mrf.mxu1  ;;  %7105 = vmatpush3.msra.mxu0 %v5849_v8 }
 0x37c   :  { %7106 = vmatprep.subr.mxu0 %v5864_v20  ;;  %v5911_v20 = vld [vmem:[#allocation6 + $0x210] sm:$0xff] }
 0x37d   :  { %v8564_v27 = vpop.f32.mrf.mxu1  ;;  %7107 = vmatpush3.msra.mxu0 %v5848_v22  ;;  %v5926_v22 = vld [vmem:[#allocation6 + $0x288] sm:$0xff] }
 0x37e   :  { %7108 = vmatprep.subr.mxu0 %v5863_v24  ;;  %v5925_v24 = vld [vmem:[#allocation6 + $0x280] sm:$0xff] }
 0x37f   :  { %v5552_v51 = vpop.f32.mrf.mxu1  ;;  %7109 = vmatpush3.msra.mxu0 %v5847_v25  ;;  %v5944_v25 = vld [vmem:[#allocation6 + $0x318] sm:$0xff] }
 0x380   :  { %7110 = vmatprep.subr.mxu0 %v5862_v16  ;;  %v5943_v16 = vld [vmem:[#allocation6 + $0x310] sm:$0xff]  ;;  %v5941_v51 = vld [vmem:[#allocation6 + $0x300] sm:$0xff] }
 0x381   :  { %v5553_v52 = vpop.f32.mrf.mxu1  ;;  %7111 = vmatpush3.msra.mxu0 %v5846_v11  ;;  %v5942_v11 = vld [vmem:[#allocation6 + $0x308] sm:$0xff] }
 0x382   :  { %7112 = vmatprep.subr.mxu0 %v5861_v31 }
 0x383   :  { %7113 = vmatpush3.msra.mxu0 %v5845_v34 }
 0x384   :  { %6020 = vmatmul.mubr.f32.vlgmr.msra.gmra.mxu0 %v5838_v33  ;;  %7152 = vmatprep.subr.mxu0 %v5940_v39  ;;  %v3366_v33 = vrot.slane %v8570_v17, %v494_v59 }
 0x385   :  { %7153 = vmatpush3.msra.mxu0 %v5924_v61  ;;  %v3370_v61 = vrot.slane %v8570_v17, %v498_v29 }
 0x386   :  { %7154 = vmatprep.subr.mxu0 %v5939_v41 }
 0x387   :  { %7155 = vmatpush3.msra.mxu0 %v5923_v42  ;;  %v5549_v42 = vadd.f32 %v8562_v6, %v3366_v33 }
 0x388   :  { %7156 = vmatprep.subr.mxu0 %v5938_v26 }
 0x389   :  { %7157 = vmatpush3.msra.mxu0 %v5922_v43  ;;  %v5551_v43 = vadd.f32 %v8564_v27, %v3370_v61 }
 0x38a   :  { %7158 = vmatprep.subr.mxu0 %v5937_v58 }
 0x38b   :  { %7159 = vmatpush3.msra.mxu0 %v5921_v44 }
 0x38c   :  { %7160 = vmatprep.subr.mxu0 %v5936_v49 }
 0x38d   :  { %7161 = vmatpush3.msra.mxu0 %v5920_v40 }
 0x38e   :  { %7162 = vmatprep.subr.mxu0 %v5935_v50 }
 0x38f   :  { %7163 = vmatpush3.msra.mxu0 %v5919_v53 }
 0x390   :  { %7164 = vmatprep.subr.mxu0 %v5934_v55 }
 0x391   :  { %7165 = vmatpush3.msra.mxu0 %v5918_v56 }
 0x392   :  { %7166 = vmatprep.subr.mxu0 %v5933_v0 }
 0x393   :  { %7167 = vmatpush3.msra.mxu0 %v5917_v60 }
 0x394   :  { %v5466_v1 = vpop.f32.mrf.mxu0  ;;  %7168 = vmatprep.subr.mxu0 %v5932_v9 }
 0x395   :  { %v5467_v2 = vadd.f32 %v5466_v1, %v5426_v63  ;;  %7169 = vmatpush3.msra.mxu0 %v5916_v62  ;;  %v3374_v1 = vrot.slane %v8570_v17, %v502_v5 }
 0x396   :  { %v5468_v3 = vpop.f32.mrf.mxu0  ;;  %7170 = vmatprep.subr.mxu0 %v5931_v37 }
 0x397   :  { %v5469_v45 = vadd.f32 %v5468_v3, %v5428_v7  ;;  %7171 = vmatpush3.msra.mxu0 %v5915_v23  ;;  %v5508_v19 = vadd.f32 %v8543_v28, %v5467_v2  ;;  %v5910_v28 = vld [vmem:[#allocation6 + $0x208] sm:$0xff] }
 0x398   :  { %v5470_v21 = vpop.f32.mrf.mxu0  ;;  %7172 = vmatprep.subr.mxu0 %v5930_v46 }
 0x399   :  { %v5510_v12 = vadd.f32 %v8547_v32, %v5469_v45  ;;  %7173 = vmatpush3.msra.mxu0 %v5914_v4  ;;  %v5840_v8 = vmax.f32 %v5508_v19, 0.0  ;;  %v5909_v32 = vld [vmem:[#allocation6 + $0x200] sm:$0xff] }
 0x39a   :  { %v5471_v36 = vpop.f32.mrf.mxu0  ;;  %7174 = vmatprep.subr.mxu0 %v5929_v38 }
 0x39b   :  { %v5841_v15 = vmax.f32 %v5510_v12, 0.0  ;;  %7175 = vmatpush3.msra.mxu0 %v5913_v10 }
 0x39c   :  { %7176 = vmatprep.subr.mxu0 %v5928_v13 }
 0x39d   :  { %6089 = vmatprep.mubr.f32.mxu1 %v5841_v15  ;;  %7177 = vmatpush3.msra.mxu0 %v5912_v14 }
 0x39e   :  { %6090 = vmatmul.mubr.f32.vlgmr.msra.gmra.mxu1 %v5840_v8  ;;  %7178 = vmatprep.subr.mxu0 %v5927_v18 }
 0x39f   :  { %7179 = vmatpush3.msra.mxu0 %v5911_v20  ;;  %7214 = vmatprep.mubr.msk.f32.mxu1 %vm8292_vm1, %v8291_v47  ;;  %v6943_v20 = vld [vmem:[%s8613_s6] ss:$0 sm:$0xff] }
 0x3a0   :  { %7180 = vmatprep.subr.mxu0 %v5926_v22  ;;  %7207 = vmatpush3.msra.mxu1 %v5944_v25 }
 0x3a1   :  { %7181 = vmatpush3.msra.mxu0 %v5910_v28  ;;  %7208 = vmatprep.subr.mxu1 %v8291_v47 }
 0x3a2   :  { %7182 = vmatprep.subr.mxu0 %v5925_v24  ;;  %7209 = vmatpush3.msra.mxu1 %v5943_v16 }
 0x3a3   :  { %7183 = vmatpush3.msra.mxu0 %v5909_v32  ;;  %7210 = vmatprep.subr.mxu1 %v8291_v47 }
 0x3a4   :  { %7211 = vmatpush3.msra.mxu1 %v5942_v11 }
 0x3a5   :  { %7212 = vmatprep.subr.mxu1 %v8291_v47 }
 0x3a6   :  { %7213 = vmatpush3.msra.mxu1 %v5941_v51 }
 0x3bb   :  { %v5630_v31 = vpop.f32.mrf.mxu1 }
 0x3bd   :  { %v5632_v34 = vpop.f32.mrf.mxu1 }
 0x3bf   :  { %v5634_v52 = vpop.f32.mrf.mxu1 }
 0x3c1   :  { %v5635_v39 = vpop.f32.mrf.mxu1 }
 0x3d4   :  { %v5589_v41 = vpop.f32.mrf.mxu0 }
 0x3d5   :  { %v5590_v47 = vadd.f32 %v5589_v41, %v5549_v42 }
 0x3d6   :  { %v5591_v26 = vpop.f32.mrf.mxu0 }
 0x3d7   :  { %v5592_v44 = vadd.f32 %v5591_v26, %v5551_v43  ;;  %v5631_v48 = vadd.f32 %v5630_v31, %v5590_v47 }
 0x3d8   :  { %v5593_v58 = vpop.f32.mrf.mxu0 }
 0x3d9   :  { %v5633_v54 = vadd.f32 %v5632_v34, %v5592_v44 }
 0x3da   :  { %v5594_v49 = vpop.f32.mrf.mxu0 }
 0x3db   :  { %v7073_v40 = vpop.f32.mrf.mxu1 }
 0x3dc   :  { %v5671_v50 = vpop.f32.mrf.mxu0 }
 0x3dd   :  { %v7074_v53 = vpop.f32.mrf.mxu1  ;;  %v5672_v59 = vadd.f32 %v5671_v50, %v5631_v48 }
 0x3de   :  { %v7075_v55 = vadd.f32 %v7074_v53, %v7073_v40  ;;  %v5673_v56 = vpop.f32.mrf.mxu0 }
 0x3df   :  { %v5674_v57 = vadd.f32 %v5673_v56, %v5633_v54  ;;  %v7076_v29 = vpop.f32.mrf.mxu1  ;;  %v5842_v35 = vmax.f32 %v5672_v59, 0.0 }
 0x3e0   :  { %v5675_v0 = vpop.f32.mrf.mxu0 }
 0x3e1   :  { %v5843_v60 = vmax.f32 %v5674_v57, 0.0  ;;  %v7077_v6 = vpop.f32.mrf.mxu1 }
 0x3e2   :  { %v5676_v9 = vpop.f32.mrf.mxu0 }
 0x3e3   :  { %6159 = vmatprep.mubr.f32.mxu0 %v5843_v60 }
 0x3e4   :  { %6160 = vmatmul.mubr.f32.vlgmr.msra.gmra.mxu0 %v5842_v35 }
 0x3fc   :  { %v7029_v27 = vpop.f32.mrf.mxu0 }
 0x3fe   :  { %v7030_v62 = vpop.f32.mrf.mxu0 }
 0x3ff   :  { %v7031_v23 = vadd.f32 %v7030_v62, %v7029_v27 }
 0x400   :  { %v7032_v63 = vpop.f32.mrf.mxu0 }
 0x401   :  { %v5713_v46 = vadd.f32 %v7031_v23, %v3374_v1 }
 0x402   :  { %v7033_v37 = vpop.f32.mrf.mxu0 }
 0x41c   :  { %v7051_v2 = vpop.f32.mrf.mxu0 }
 0x41e   :  { %v7052_v7 = vpop.f32.mrf.mxu0 }
 0x41f   :  { %v7053_v3 = vadd.f32 %v7052_v7, %v7051_v2 }
 0x420   :  { %v7054_v4 = vpop.f32.mrf.mxu0 }
 0x421   :  { %v5753_v45 = vadd.f32 %v7053_v3, %v5713_v46 }
 0x422   :  { %v7055_v38 = vpop.f32.mrf.mxu0 }
 0x423   :  { %v5793_v19 = vadd.f32 %v7075_v55, %v5753_v45 }
 0x424   :  { %v5832_v21 = vpop.f32.mrf.mxu0 }
 0x425   :  { %v5833_v10 = vadd.f32 %v5832_v21, %v5793_v19 }
 0x426   :  { %v7204_v12 = vpop.f32.mrf.mxu0 }
 0x427   :  { %v5844_v13 = vmax.f32 %v5833_v10, 0.0 }
 0x428   :  { %v5835_v36 = vpop.f32.mrf.mxu0 }
 0x429   :  { %7215 = vmatmul.mubr.msk.f32.vlgmr.msra.gmra.mxu1 %vm5182_vm2, %v5844_v13 }
 0x42a   :  { %v7205_v14 = vpop.f32.mrf.mxu0 }
 0x444   :  { %v7114_v30 = vpop.f32.mrf.mxu0 }
 0x446   :  { %v7115_v15 = vpop.f32.mrf.mxu0 }
 0x447   :  { %v7116_v8 = vadd.f32 %v7115_v15, %v7114_v30 }
 0x449   :  { %v6022_v24 = vadd.f32 %v7116_v8, %v6943_v20 }
 0x45e   :  { %v7149_v5 = vpop.f32.mrf.mxu1 }
 0x460   :  { %v7150_v18 = vpop.f32.mrf.mxu1 }
 0x461   :  { %v7151_v28 = vadd.f32 %v7150_v18, %v7149_v5 }
 0x463   :  { %v6092_v25 = vadd.f32 %v7151_v28, %v6022_v24 }
 0x4a4   :  { %v7184_v17 = vpop.f32.mrf.mxu0 }
 0x4a6   :  { %v7185_v22 = vpop.f32.mrf.mxu0 }
 0x4a7   :  { %v7186_v32 = vadd.f32 %v7185_v22, %v7184_v17 }
 0x4a9   :  { %v6162_v16 = vadd.f32 %v7186_v32, %v6092_v25 }
 0x4e9   :  { %v6231_v11 = vpop.f32.mrf.mxu1 }
 0x4ea   :  { %v6232_v51 = vadd.f32 %v6231_v11, %v6162_v16 }
 0x4eb   :  { %v7216_v31 = vpop.f32.mrf.mxu1 }
 0x4ec   :  { %6235 = vst [vmem:[%s8614_s7] sm:$0xff] %v6232_v51 }
 0x4ed   :  { %6240 = vsyncpa [#allocation3], 1 }
 0x4ee   :  { %6241 = vsyncpa [#allocation5], 1 }

</bundles_post_ra>
